<compile_context>
chip_gen: v7x
topology: tpu7x:2x2x1
jax: 0.10.0
libtpu: 0.0.40
codegen_flags: <defaults>
</compile_context>

<pallas_src>
import functools

import jax
import jax.numpy as jnp
from jax.experimental import pallas as pl
from jax.experimental.pallas import tpu as pltpu


def _round_up(x, m):
    return ((x + m - 1) // m) * m


def pfn_fused_kernel(inp_ref, gate_ref, w_ref, shift_ref,
                     x_out_ref, scan_out_ref, carry_ref, *, tile_n, n_steps):
    """Linear(+folded BN scale) + shift + ReLU, then a vectorized segmented
    (per-pillar) inclusive max-scan over the pillar-sorted point tile."""
    # carry_ref holds the running max of the pillar "open" at the previous
    # tile's last row.  Grid axis is sequential ("arbitrary"), so this chain
    # is well defined.  Must be zeroed before first use (gate*NaN would
    # otherwise poison the max).
    @pl.when(pl.program_id(0) == 0)
    def _():
        carry_ref[...] = jnp.zeros_like(carry_ref)

    # MXU matmul: bf16 operands, f32 accumulation; f32 epilogue on the VPU.
    x = jnp.dot(inp_ref[...], w_ref[...], preferred_element_type=jnp.float32)
    x = jnp.maximum(x + shift_ref[...], 0.0)          # folded BN shift + ReLU
    x_out_ref[...] = x.astype(jnp.bfloat16)           # lane-dense bf16 store

    # Segmented max-scan (Hillis-Steele doubling).  gate bit k of row i is 1
    # iff row i-2^k belongs to the same pillar AND lies inside this tile.
    # Post-ReLU values are >= 0, so 0 is the max identity and "gate * shifted"
    # is an exact masked combine (no select needed).
    gates = gate_ref[...]                              # (tile_n, 1) int32
    cout_pad = x.shape[1]
    s = x
    for k in range(n_steps):
        d = 1 << k
        g = ((gates >> k) & 1).astype(jnp.float32)     # (tile_n, 1)
        shifted = jnp.concatenate(
            [jnp.zeros((d, cout_pad), jnp.float32), s[:tile_n - d, :]], axis=0)
        s = jnp.maximum(s, shifted * g)

    # Fold in the cross-tile carry (rows continuing the pillar that was open
    # at the previous tile's end), then refresh the carry from this tile.
    g_carry = ((gates >> n_steps) & 1).astype(jnp.float32)
    s = jnp.maximum(s, carry_ref[...] * g_carry)
    carry_ref[...] = s[tile_n - 1:tile_n, :]

    # s at the LAST sorted point of each pillar == that pillar's global max.
    scan_out_ref[...] = s.astype(jnp.bfloat16)


@functools.partial(jax.jit, static_argnames=("num_pillars", "eps", "tile_n"))
def pfn_layer_forward(inputs, unq_inv, weight, bn_gamma, bn_beta,
                      bn_mean, bn_var, num_pillars, eps=1e-3, tile_n=256):
    """inputs: (N, Cin) f32, unq_inv: (N,) int32 in [0, P), weight: (Cout, Cin)."""
    n, cin = inputs.shape
    cout = weight.shape[0]

    cin_pad = _round_up(cin, 16)               # contraction dim, bf16 granule
    cout_pad = _round_up(cout, 128)            # lane-dense channel dim
    n_pad = _round_up(n, tile_n)
    n_tiles = n_pad // tile_n
    n_steps = max(1, (tile_n - 1).bit_length())   # ceil(log2(tile_n))

    # Fold eval-mode BatchNorm: scale into the weight columns (f32 math, then
    # bf16 cast); only the per-channel shift survives into the epilogue.
    scale = bn_gamma / jnp.sqrt(bn_var + eps)
    shift = bn_beta - bn_mean * scale
    w_scaled = jnp.asarray(weight, jnp.float32).T * scale[None, :]   # (Cin, Cout)
    w_p = jnp.zeros((cin_pad, cout_pad), jnp.bfloat16)
    w_p = w_p.at[:cin, :cout].set(w_scaled.astype(jnp.bfloat16))
    shift_p = jnp.zeros((1, cout_pad), jnp.float32).at[0, :cout].set(shift)

    # Sort points by pillar id so every pillar is one contiguous run.
    ids = unq_inv.astype(jnp.int32)
    order = jnp.argsort(ids)
    ids_sorted = ids[order]
    inp_p = jnp.zeros((n_pad, cin_pad), jnp.bfloat16)
    inp_p = inp_p.at[:n, :cin].set(inputs[order].astype(jnp.bfloat16))

    # Padded tail -> sentinel pillar id (its own trash segment, never gathered).
    ids_pad = jnp.full((n_pad,), num_pillars, jnp.int32).at[:n].set(ids_sorted)

    # Bit-packed scan gates: bit k of row i <=> same pillar as row i-2^k and
    # still inside the same tile; bit n_steps <=> same pillar as the last row
    # of the previous tile (cross-tile carry gate).
    pos = jnp.arange(n_pad, dtype=jnp.int32)
    pos_in_tile = pos % tile_n
    tile_idx = pos // tile_n
    gates = jnp.zeros((n_pad,), jnp.int32)
    for k in range(n_steps):
        d = 1 << k
        same = jnp.concatenate(
            [jnp.zeros((d,), jnp.bool_), ids_pad[d:] == ids_pad[:-d]])
        same = jnp.logical_and(same, pos_in_tile >= d)
        gates = gates | (same.astype(jnp.int32) << k)
    prev_tile_last = ids_pad[jnp.maximum(tile_idx * tile_n - 1, 0)]
    carry_same = jnp.logical_and(ids_pad == prev_tile_last, tile_idx > 0)
    gates = gates | (carry_same.astype(jnp.int32) << n_steps)
    gates = gates[:, None]                                     # (n_pad, 1)

    # ---------------- Fused Pallas kernel: matmul + BN/ReLU + segment scan ---
    x_sorted, scan_sorted = pl.pallas_call(
        functools.partial(pfn_fused_kernel, tile_n=tile_n, n_steps=n_steps),
        grid=(n_tiles,),
        in_specs=[
            pl.BlockSpec((tile_n, cin_pad), lambda i: (i, 0)),
            pl.BlockSpec((tile_n, 1), lambda i: (i, 0)),
            pl.BlockSpec((cin_pad, cout_pad), lambda i: (0, 0)),
            pl.BlockSpec((1, cout_pad), lambda i: (0, 0)),
        ],
        out_specs=(
            pl.BlockSpec((tile_n, cout_pad), lambda i: (i, 0)),
            pl.BlockSpec((tile_n, cout_pad), lambda i: (i, 0)),
        ),
        out_shape=(
            jax.ShapeDtypeStruct((n_pad, cout_pad), jnp.bfloat16),  # x (sorted)
            jax.ShapeDtypeStruct((n_pad, cout_pad), jnp.bfloat16),  # segment scan
        ),
        scratch_shapes=[pltpu.VMEM((1, cout_pad), jnp.float32)],    # carry
        compiler_params=pltpu.CompilerParams(
            dimension_semantics=("arbitrary",),    # sequential: scan carry
            vmem_limit_bytes=32 * 1024 * 1024,     # safe on v5e/v6e/v7x
        ),
        cost_estimate=pl.CostEstimate(
            flops=2 * n_pad * cin_pad * cout_pad,
            transcendentals=0,
            bytes_accessed=(n_pad * cin_pad * 2          # bf16 inputs in
                            + n_pad * 4                  # gates in
                            + 2 * n_pad * cout_pad * 2), # bf16 x + scan out
        ),
    )(inp_p, gates, w_p, shift_p)

    # Wrapper-side layout plumbing (review-sanctioned XLA gathers, no loops):
    #   first half : un-permute x back to original point order,
    #   second half: x_max[unq_inv[i]] == scan[last sorted point of pillar].
    inv_order = jnp.argsort(order)
    last_pos = jnp.searchsorted(
        ids_sorted, jnp.arange(num_pillars, dtype=jnp.int32), side="right") - 1
    x_first = x_sorted[:, :cout][inv_order]
    x_second = scan_sorted[:, :cout][last_pos[ids]]
    return jnp.concatenate([x_first, x_second], axis=1).astype(jnp.float32)


if __name__ == "__main__":
    key = jax.random.PRNGKey(0)
    k_inp, k_w, k_id = jax.random.split(key, 3)

    # Module-consistent small shapes: N points, Cin=10 raw features,
    # out_channels=64 -> Cout=32 (last_layer=False), P pillars.
    # N=1000 with tile_n=256 gives 4 N-tiles and exercises the cross-tile carry.
    N, CIN, OUT_CHANNELS, P = 1000, 10, 64, 37
    COUT = OUT_CHANNELS // 2
    TILE_N = 256

    inputs = jax.random.normal(k_inp, (N, CIN), dtype=jnp.float32)
    # Pillar ids: every pillar in [0, P) occurs at least once (unique-inverse
    # semantics), remaining points assigned at random.
    unq_inv = jnp.concatenate([
        jnp.arange(P, dtype=jnp.int32),
        jax.random.randint(k_id, (N - P,), 0, P, dtype=jnp.int32)])

    weight = 0.1 * jax.random.normal(k_w, (COUT, CIN), dtype=jnp.float32)
    bn_gamma = jnp.full((COUT,), 1.1, jnp.float32)
    bn_beta = jnp.full((COUT,), 0.05, jnp.float32)
    bn_mean = 0.01 * jnp.arange(COUT, dtype=jnp.float32)
    bn_var = jnp.linspace(0.5, 1.5, COUT).astype(jnp.float32)

    out = pfn_layer_forward(inputs, unq_inv, weight, bn_gamma, bn_beta,
                            bn_mean, bn_var, num_pillars=P, tile_n=TILE_N)
    out = jax.block_until_ready(out)

    # Pure-JAX reference with the same bf16 operand/weight rounding as the kernel.
    scale_r = bn_gamma / jnp.sqrt(bn_var + 1e-3)
    shift_r = bn_beta - bn_mean * scale_r
    a = inputs.astype(jnp.bfloat16).astype(jnp.float32)
    w_s = (jnp.asarray(weight, jnp.float32).T * scale_r[None, :]
           ).astype(jnp.bfloat16).astype(jnp.float32)
    x_ref = jnp.maximum(a @ w_s + shift_r[None, :], 0.0)
    xmax_ref = jax.ops.segment_max(x_ref, unq_inv, num_segments=P)
    ref = jnp.concatenate([x_ref, xmax_ref[unq_inv]], axis=1)

    assert out.shape == (N, 2 * COUT), out.shape
    err = float(jnp.max(jnp.abs(out - ref)))
    assert jnp.allclose(out, ref, atol=2e-2, rtol=2e-2), err
    print("KERNEL_OK")
</pallas_src>

<mosaic_0001>
module attributes {stable_mosaic.version = 11 : i64} {
  func.func @pfn_fused_kernel(%arg0: i32, %arg1: memref<256x16xbf16, #tpu.memory_space<vmem>>, %arg2: memref<256x1xi32, #tpu.memory_space<vmem>>, %arg3: memref<16x128xbf16, #tpu.memory_space<vmem>>, %arg4: memref<1x128xf32, #tpu.memory_space<vmem>>, %arg5: memref<256x128xbf16, #tpu.memory_space<vmem>>, %arg6: memref<256x128xbf16, #tpu.memory_space<vmem>>, %arg7: memref<1x128xf32, #tpu.memory_space<vmem>>) attributes {dimension_semantics = [#tpu.dimension_semantics<arbitrary>], iteration_bounds = array<i64: 4>, scalar_prefetch = 0 : i64, scratch_operands = 1 : i64, tpu.core_type = #tpu.core_type<tc>, window_params = [{transform_indices = @transform_0, window_bounds = array<i64: 256, 16>}, {transform_indices = @transform_1, window_bounds = array<i64: 256, 1>}, {pipeline_mode = #tpu.pipeline_mode<synchronous>, transform_indices = @transform_2, window_bounds = array<i64: 16, 128>}, {pipeline_mode = #tpu.pipeline_mode<synchronous>, transform_indices = @transform_3, window_bounds = array<i64: 1, 128>}, {transform_indices = @transform_4, window_bounds = array<i64: 256, 128>}, {transform_indices = @transform_5, window_bounds = array<i64: 256, 128>}]} {
    %c0_i32 = arith.constant 0 : i32
    %0 = arith.cmpi eq, %arg0, %c0_i32 : i32
    %1 = arith.extui %0 : i1 to i32
    %c0_i32_0 = arith.constant 0 : i32
    %2 = arith.cmpi ne, %1, %c0_i32_0 : i32
    scf.if %2 {
      %cst_35 = arith.constant 0.000000e+00 : f32
      %116 = vector.broadcast %cst_35 : f32 to vector<1x128xf32>
      %c0_36 = arith.constant 0 : index
      %c0_37 = arith.constant 0 : index
      %117 = vector.load %arg7[%c0_36, %c0_37] : memref<1x128xf32, #tpu.memory_space<vmem>>, vector<1x128xf32>
      tpu.vector_store %arg7[%c0_36, %c0_37], %116 {strides = array<i32>} : memref<1x128xf32, #tpu.memory_space<vmem>>, vector<1x128xf32>,
    } else {
    }
    %c0 = arith.constant 0 : index
    %c0_1 = arith.constant 0 : index
    %3 = vector.load %arg1[%c0, %c0_1] : memref<256x16xbf16, #tpu.memory_space<vmem>>, vector<256x16xbf16>
    %c0_2 = arith.constant 0 : index
    %c0_3 = arith.constant 0 : index
    %4 = vector.load %arg3[%c0_2, %c0_3] : memref<16x128xbf16, #tpu.memory_space<vmem>>, vector<16x128xbf16>
    %cst = arith.constant dense<0.000000e+00> : vector<256x128xf32>
    %5 = tpu.matmul %3, %4, %cst {dimension_numbers = #tpu.dot_dimension_numbers<[1], [0], [0], [1], [0, 0, 1, 1], [], []>} : vector<256x16xbf16>, vector<16x128xbf16>, vector<256x128xf32> -> vector<256x128xf32>
    %c0_4 = arith.constant 0 : index
    %c0_5 = arith.constant 0 : index
    %6 = vector.load %arg4[%c0_4, %c0_5] : memref<1x128xf32, #tpu.memory_space<vmem>>, vector<1x128xf32>
    %7 = vector.broadcast %6 : vector<1x128xf32> to vector<256x128xf32>
    %8 = arith.addf %5, %7 : vector<256x128xf32>
    %cst_6 = arith.constant 0.000000e+00 : f32
    %9 = vector.broadcast %cst_6 : f32 to vector<256x128xf32>
    %10 = arith.maximumf %8, %9 : vector<256x128xf32>
    %11 = arith.truncf %10 : vector<256x128xf32> to vector<256x128xbf16>
    %c0_7 = arith.constant 0 : index
    %c0_8 = arith.constant 0 : index
    %12 = vector.load %arg5[%c0_7, %c0_8] : memref<256x128xbf16, #tpu.memory_space<vmem>>, vector<256x128xbf16>
    tpu.vector_store %arg5[%c0_7, %c0_8], %11 {strides = array<i32>} : memref<256x128xbf16, #tpu.memory_space<vmem>>, vector<256x128xbf16>,
    %c0_9 = arith.constant 0 : index
    %c0_10 = arith.constant 0 : index
    %13 = vector.load %arg2[%c0_9, %c0_10] : memref<256x1xi32, #tpu.memory_space<vmem>>, vector<256x1xi32>
    %c0_i32_11 = arith.constant 0 : i32
    %14 = vector.broadcast %c0_i32_11 : i32 to vector<256x1xi32>
    %15 = arith.shrsi %13, %14 : vector<256x1xi32>
    %c1_i32 = arith.constant 1 : i32
    %16 = vector.broadcast %c1_i32 : i32 to vector<256x1xi32>
    %17 = arith.andi %15, %16 : vector<256x1xi32>
    %18 = arith.sitofp %17 : vector<256x1xi32> to vector<256x1xf32>
    %cst_12 = arith.constant 0.000000e+00 : f32
    %19 = vector.broadcast %cst_12 : f32 to vector<1x128xf32>
    %20 = vector.extract_strided_slice %10 {offsets = [0, 0], sizes = [255, 128], strides = [1, 1]} : vector<256x128xf32> to vector<255x128xf32>
    %21 = tpu.concatenate %19, %20 in 0 : vector<1x128xf32>, vector<255x128xf32> -> vector<256x128xf32>
    %22 = vector.broadcast %18 : vector<256x1xf32> to vector<256x128xf32>
    %23 = arith.mulf %21, %22 : vector<256x128xf32>
    %24 = arith.maximumf %10, %23 : vector<256x128xf32>
    %c1_i32_13 = arith.constant 1 : i32
    %25 = vector.broadcast %c1_i32_13 : i32 to vector<256x1xi32>
    %26 = arith.shrsi %13, %25 : vector<256x1xi32>
    %c1_i32_14 = arith.constant 1 : i32
    %27 = vector.broadcast %c1_i32_14 : i32 to vector<256x1xi32>
    %28 = arith.andi %26, %27 : vector<256x1xi32>
    %29 = arith.sitofp %28 : vector<256x1xi32> to vector<256x1xf32>
    %cst_15 = arith.constant 0.000000e+00 : f32
    %30 = vector.broadcast %cst_15 : f32 to vector<2x128xf32>
    %31 = vector.extract_strided_slice %24 {offsets = [0, 0], sizes = [254, 128], strides = [1, 1]} : vector<256x128xf32> to vector<254x128xf32>
    %32 = tpu.concatenate %30, %31 in 0 : vector<2x128xf32>, vector<254x128xf32> -> vector<256x128xf32>
    %33 = vector.broadcast %29 : vector<256x1xf32> to vector<256x128xf32>
    %34 = arith.mulf %32, %33 : vector<256x128xf32>
    %35 = arith.maximumf %24, %34 : vector<256x128xf32>
    %c2_i32 = arith.constant 2 : i32
    %36 = vector.broadcast %c2_i32 : i32 to vector<256x1xi32>
    %37 = arith.shrsi %13, %36 : vector<256x1xi32>
    %c1_i32_16 = arith.constant 1 : i32
    %38 = vector.broadcast %c1_i32_16 : i32 to vector<256x1xi32>
    %39 = arith.andi %37, %38 : vector<256x1xi32>
    %40 = arith.sitofp %39 : vector<256x1xi32> to vector<256x1xf32>
    %cst_17 = arith.constant 0.000000e+00 : f32
    %41 = vector.broadcast %cst_17 : f32 to vector<4x128xf32>
    %42 = vector.extract_strided_slice %35 {offsets = [0, 0], sizes = [252, 128], strides = [1, 1]} : vector<256x128xf32> to vector<252x128xf32>
    %43 = tpu.concatenate %41, %42 in 0 : vector<4x128xf32>, vector<252x128xf32> -> vector<256x128xf32>
    %44 = vector.broadcast %40 : vector<256x1xf32> to vector<256x128xf32>
    %45 = arith.mulf %43, %44 : vector<256x128xf32>
    %46 = arith.maximumf %35, %45 : vector<256x128xf32>
    %c3_i32 = arith.constant 3 : i32
    %47 = vector.broadcast %c3_i32 : i32 to vector<256x1xi32>
    %48 = arith.shrsi %13, %47 : vector<256x1xi32>
    %c1_i32_18 = arith.constant 1 : i32
    %49 = vector.broadcast %c1_i32_18 : i32 to vector<256x1xi32>
    %50 = arith.andi %48, %49 : vector<256x1xi32>
    %51 = arith.sitofp %50 : vector<256x1xi32> to vector<256x1xf32>
    %cst_19 = arith.constant 0.000000e+00 : f32
    %52 = vector.broadcast %cst_19 : f32 to vector<8x128xf32>
    %53 = vector.extract_strided_slice %46 {offsets = [0, 0], sizes = [248, 128], strides = [1, 1]} : vector<256x128xf32> to vector<248x128xf32>
    %54 = tpu.concatenate %52, %53 in 0 : vector<8x128xf32>, vector<248x128xf32> -> vector<256x128xf32>
    %55 = vector.broadcast %51 : vector<256x1xf32> to vector<256x128xf32>
    %56 = arith.mulf %54, %55 : vector<256x128xf32>
    %57 = arith.maximumf %46, %56 : vector<256x128xf32>
    %c4_i32 = arith.constant 4 : i32
    %58 = vector.broadcast %c4_i32 : i32 to vector<256x1xi32>
    %59 = arith.shrsi %13, %58 : vector<256x1xi32>
    %c1_i32_20 = arith.constant 1 : i32
    %60 = vector.broadcast %c1_i32_20 : i32 to vector<256x1xi32>
    %61 = arith.andi %59, %60 : vector<256x1xi32>
    %62 = arith.sitofp %61 : vector<256x1xi32> to vector<256x1xf32>
    %cst_21 = arith.constant 0.000000e+00 : f32
    %63 = vector.broadcast %cst_21 : f32 to vector<16x128xf32>
    %64 = vector.extract_strided_slice %57 {offsets = [0, 0], sizes = [240, 128], strides = [1, 1]} : vector<256x128xf32> to vector<240x128xf32>
    %65 = tpu.concatenate %63, %64 in 0 : vector<16x128xf32>, vector<240x128xf32> -> vector<256x128xf32>
    %66 = vector.broadcast %62 : vector<256x1xf32> to vector<256x128xf32>
    %67 = arith.mulf %65, %66 : vector<256x128xf32>
    %68 = arith.maximumf %57, %67 : vector<256x128xf32>
    %c5_i32 = arith.constant 5 : i32
    %69 = vector.broadcast %c5_i32 : i32 to vector<256x1xi32>
    %70 = arith.shrsi %13, %69 : vector<256x1xi32>
    %c1_i32_22 = arith.constant 1 : i32
    %71 = vector.broadcast %c1_i32_22 : i32 to vector<256x1xi32>
    %72 = arith.andi %70, %71 : vector<256x1xi32>
    %73 = arith.sitofp %72 : vector<256x1xi32> to vector<256x1xf32>
    %cst_23 = arith.constant 0.000000e+00 : f32
    %74 = vector.broadcast %cst_23 : f32 to vector<32x128xf32>
    %75 = vector.extract_strided_slice %68 {offsets = [0, 0], sizes = [224, 128], strides = [1, 1]} : vector<256x128xf32> to vector<224x128xf32>
    %76 = tpu.concatenate %74, %75 in 0 : vector<32x128xf32>, vector<224x128xf32> -> vector<256x128xf32>
    %77 = vector.broadcast %73 : vector<256x1xf32> to vector<256x128xf32>
    %78 = arith.mulf %76, %77 : vector<256x128xf32>
    %79 = arith.maximumf %68, %78 : vector<256x128xf32>
    %c6_i32 = arith.constant 6 : i32
    %80 = vector.broadcast %c6_i32 : i32 to vector<256x1xi32>
    %81 = arith.shrsi %13, %80 : vector<256x1xi32>
    %c1_i32_24 = arith.constant 1 : i32
    %82 = vector.broadcast %c1_i32_24 : i32 to vector<256x1xi32>
    %83 = arith.andi %81, %82 : vector<256x1xi32>
    %84 = arith.sitofp %83 : vector<256x1xi32> to vector<256x1xf32>
    %cst_25 = arith.constant 0.000000e+00 : f32
    %85 = vector.broadcast %cst_25 : f32 to vector<64x128xf32>
    %86 = vector.extract_strided_slice %79 {offsets = [0, 0], sizes = [192, 128], strides = [1, 1]} : vector<256x128xf32> to vector<192x128xf32>
    %87 = tpu.concatenate %85, %86 in 0 : vector<64x128xf32>, vector<192x128xf32> -> vector<256x128xf32>
    %88 = vector.broadcast %84 : vector<256x1xf32> to vector<256x128xf32>
    %89 = arith.mulf %87, %88 : vector<256x128xf32>
    %90 = arith.maximumf %79, %89 : vector<256x128xf32>
    %c7_i32 = arith.constant 7 : i32
    %91 = vector.broadcast %c7_i32 : i32 to vector<256x1xi32>
    %92 = arith.shrsi %13, %91 : vector<256x1xi32>
    %c1_i32_26 = arith.constant 1 : i32
    %93 = vector.broadcast %c1_i32_26 : i32 to vector<256x1xi32>
    %94 = arith.andi %92, %93 : vector<256x1xi32>
    %95 = arith.sitofp %94 : vector<256x1xi32> to vector<256x1xf32>
    %cst_27 = arith.constant 0.000000e+00 : f32
    %96 = vector.broadcast %cst_27 : f32 to vector<128x128xf32>
    %97 = vector.extract_strided_slice %90 {offsets = [0, 0], sizes = [128, 128], strides = [1, 1]} : vector<256x128xf32> to vector<128x128xf32>
    %98 = tpu.concatenate %96, %97 in 0 : vector<128x128xf32>, vector<128x128xf32> -> vector<256x128xf32>
    %99 = vector.broadcast %95 : vector<256x1xf32> to vector<256x128xf32>
    %100 = arith.mulf %98, %99 : vector<256x128xf32>
    %101 = arith.maximumf %90, %100 : vector<256x128xf32>
    %c8_i32 = arith.constant 8 : i32
    %102 = vector.broadcast %c8_i32 : i32 to vector<256x1xi32>
    %103 = arith.shrsi %13, %102 : vector<256x1xi32>
    %c1_i32_28 = arith.constant 1 : i32
    %104 = vector.broadcast %c1_i32_28 : i32 to vector<256x1xi32>
    %105 = arith.andi %103, %104 : vector<256x1xi32>
    %106 = arith.sitofp %105 : vector<256x1xi32> to vector<256x1xf32>
    %c0_29 = arith.constant 0 : index
    %c0_30 = arith.constant 0 : index
    %107 = vector.load %arg7[%c0_29, %c0_30] : memref<1x128xf32, #tpu.memory_space<vmem>>, vector<1x128xf32>
    %108 = vector.broadcast %107 : vector<1x128xf32> to vector<256x128xf32>
    %109 = vector.broadcast %106 : vector<256x1xf32> to vector<256x128xf32>
    %110 = arith.mulf %108, %109 : vector<256x128xf32>
    %111 = arith.maximumf %101, %110 : vector<256x128xf32>
    %112 = vector.extract_strided_slice %111 {offsets = [255, 0], sizes = [1, 128], strides = [1, 1]} : vector<256x128xf32> to vector<1x128xf32>
    %c0_31 = arith.constant 0 : index
    %c0_32 = arith.constant 0 : index
    %113 = vector.load %arg7[%c0_31, %c0_32] : memref<1x128xf32, #tpu.memory_space<vmem>>, vector<1x128xf32>
    tpu.vector_store %arg7[%c0_31, %c0_32], %112 {strides = array<i32>} : memref<1x128xf32, #tpu.memory_space<vmem>>, vector<1x128xf32>,
    %114 = arith.truncf %111 : vector<256x128xf32> to vector<256x128xbf16>
    %c0_33 = arith.constant 0 : index
    %c0_34 = arith.constant 0 : index
    %115 = vector.load %arg6[%c0_33, %c0_34] : memref<256x128xbf16, #tpu.memory_space<vmem>>, vector<256x128xbf16>
    tpu.vector_store %arg6[%c0_33, %c0_34], %114 {strides = array<i32>} : memref<256x128xbf16, #tpu.memory_space<vmem>>, vector<256x128xbf16>,
    return
  }
  func.func @transform_0(%arg0: i32) -> (i32, i32) {
    %c0_i32 = arith.constant 0 : i32
    %c0_i32_0 = arith.constant 0 : i32
    return %arg0, %c0_i32 : i32, i32
  }
  func.func @transform_1(%arg0: i32) -> (i32, i32) {
    %c0_i32 = arith.constant 0 : i32
    %c0_i32_0 = arith.constant 0 : i32
    return %arg0, %c0_i32 : i32, i32
  }
  func.func @transform_2(%arg0: i32) -> (i32, i32) {
    %c0_i32 = arith.constant 0 : i32
    %c0_i32_0 = arith.constant 0 : i32
    %c0_i32_1 = arith.constant 0 : i32
    return %c0_i32, %c0_i32_0 : i32, i32
  }
  func.func @transform_3(%arg0: i32) -> (i32, i32) {
    %c0_i32 = arith.constant 0 : i32
    %c0_i32_0 = arith.constant 0 : i32
    %c0_i32_1 = arith.constant 0 : i32
    return %c0_i32, %c0_i32_0 : i32, i32
  }
  func.func @transform_4(%arg0: i32) -> (i32, i32) {
    %c0_i32 = arith.constant 0 : i32
    %c0_i32_0 = arith.constant 0 : i32
    return %arg0, %c0_i32 : i32, i32
  }
  func.func @transform_5(%arg0: i32) -> (i32, i32) {
    %c0_i32 = arith.constant 0 : i32
    %c0_i32_0 = arith.constant 0 : i32
    return %arg0, %c0_i32 : i32, i32
  }
}

</mosaic_0001>

<bundles_post_ra>
// kernel: custom-call.1
= control target key start
LH: loop header
LB: loop body
LE: loop exit
PB: predicated region body
PF: predicated region fallthrough
CT: control target
= control target key end

     0   :  { %s6_s0 = inlined_call_operand.vmem [shape: u32[37], index: 0, kind: output, shape index: {}]  }

// kernel: pfn_layer_forward.1
= control target key start
LH: loop header
LB: loop body
LE: loop exit
PB: predicated region body
PF: predicated region fallthrough
CT: control target
= control target key end

     0   :  { %s4895_s18 = smov 0   ;;  %s7748_s0 = inlined_call_operand.vmem [shape: bf16[1024,16], index: 0, kind: input, shape index: {}]   ;;  %s7749_s1 = inlined_call_operand.vmem [shape: s32[1024,1], index: 1, kind: input, shape index: {}]   ;;  %s7750_s2 = inlined_call_operand.vmem [shape: bf16[16,128], index: 2, kind: input, shape index: {}]   ;;  %s7751_s3 = inlined_call_operand.vmem [shape: f32[1,128], index: 3, kind: input, shape index: {}]   ;;  %s7752_s4 = inlined_call_operand.vmem [shape: bf16[1024,128], index: 4, kind: output, shape index: {0}]   ;;  %s7753_s5 = inlined_call_operand.vmem [shape: bf16[1024,128], index: 5, kind: output, shape index: {1}]  }
   0x1 LB: > { %s4336_s19 = sadd.s32 4294967295, %s4861_s18   ;;  %p4340_p0 = scmp.ge.s32.totalorder %s4861_s18, 1  ;;  %s4861_s18 = sphi %s4895_s18, %s16_s18  }
   0x2   : > { %p202_p1 = scmp.lt.s32.totalorder %s4861_s18, 5 }
   0x4   : > { %p203_p2 = pnand %p4340_p0, %p202_p1 }
   0x6   : > { %206 = sbr.rel (%p203_p2) target bundleno = 762 (0x2fa), region = 36 }
   0xd   : > { %s4341_s20 = sshll.u32 %s4336_s19, 5  ;;  %p4349_p4 = scmp.ne.s32.totalorder %s4336_s19, 0 }
   0xe   : > { %p241_p3 = scmp.lt.s32.totalorder %s4341_s20, 127  ;;  %v4863_v0 = vmov (!%p4349_p4), 0.0  }
   0xf   : > { %268 = sbr.rel (%p4349_p4) target bundleno = 22 (0x16), region = 40  ;;  %269 = vst [vmem:[#allocation2] sm:$0x1] (!%p4349_p4), %v4863_v0 }
  0x10   : > { %s8459_s20 = smov (!%p241_p3, %s4341_s20), 127 }
  0x11   : > { %s4342_s21 = sshll.u32 %s8459_s20, 2  ;;  %s4344_s22 = sshll.u32 %s8459_s20, 3 }
  0x12   : > { %s4906_s25 = scalar_lea.vmem %s7748_s0, %s4342_s21  ;;  %s4911_s28 = scalar_lea.vmem %s7749_s1, %s4344_s22 }
  0x13   : > { %s4916_s6 = scalar_lea.vmem %s7752_s4, %s4342_s21  ;;  %s4921_s9 = scalar_lea.vmem %s7753_s5, %s4342_s21 }
  0x16 PF: > { %v4770_v1 = vld [vmem:[%s7750_s2] sm:$0xff]   ;;  %v4864_v2 = vmov 0   ;;  %v4927_v3 = vld [vmem:[%s4911_s28 + $0x10] sm:$0xff]  ;;  %vm397_vm0 = vcmask 130048   ;;  %v4773_v11 = vld [vmem:[%s4906_s25 + $0x8] sm:$0xff]   ;;  %vm927_vm1 = vcmask 1040384  }
  0x17   : > { %4769 = vset.pattern.permute.xlu1 %v4864_v2  ;;  %4768 = vset.pattern.permute.xlu0 %v4864_v2  ;;  %v4930_v4 = vld [vmem:[%s4911_s28] sm:$0xff]  ;;  %v833_v5 = vand.u32 1, %v4927_v3  ;;  %v4774_v12 = vld [vmem:[%s4906_s25 + $0x48] sm:$0xff]   ;;  %v4941_v13 = vld [vmem:[%s4911_s28 + $0x18] sm:$0xff]  ;;  %vm1376_vm2 = vcmask 1041408   ;;  %vm1825_vm3 = vcmask 1043456  }
  0x18   : > { %4722 = vmatprep.subr.bf16.mxu0 %v4770_v1  ;;  %4756 = vmatprep.subr.bf16.mxu1 %v4770_v1  ;;  %v831_v6 = vand.u32 1, %v4930_v4  ;;  %v4771_v7 = vld [vmem:[%s4906_s25] sm:$0xff]   ;;  %v834_v14 = vand.u32 1, %v4941_v13  ;;  %v4945_v15 = vld [vmem:[%s4911_s28 + $0x8] sm:$0xff]  ;;  %v4775_v21 = vld [vmem:[%s4906_s25 + $0x10] sm:$0xff]  }
  0x19   : > { %v4772_v8 = vld [vmem:[%s4906_s25 + $0x40] sm:$0xff]   ;;  %4723 = vmatpush3.bf16.msra.mxu0 %v4770_v1  ;;  %4757 = vmatpush3.bf16.msra.mxu1 %v4770_v1  ;;  %v865_v9 = vcvt.s32.f32 %v833_v5  ;;  %v4948_v16 = vld [vmem:[%s4911_s28 + $0x28] sm:$0xff]  ;;  %v832_v18 = vand.u32 1, %v4945_v15  ;;  %v4776_v24 = vld [vmem:[%s4906_s25 + $0x50] sm:$0xff]  }
  0x1a   : > { %v863_v10 = vcvt.s32.f32 %v831_v6  ;;  %4724 = vmatprep.mubr.msk.bf16.mxu0 %vm397_vm0, %v4771_v7  ;;  %4740 = vmatprep.mubr.msk.bf16.mxu1 %vm397_vm0, %v4772_v8  ;;  %v4951_v17 = vld [vmem:[%s4911_s28 + $0x20] sm:$0xff]  ;;  %v836_v19 = vand.u32 1, %v4948_v16  ;;  %v866_v22 = vcvt.s32.f32 %v834_v14  ;;  %v4777_v26 = vld [vmem:[%s4906_s25 + $0x18] sm:$0xff]   ;;  %v4968_v30 = vld [vmem:[%s4911_s28 + $0x30] sm:$0xff] }
  0x1b   : > { %1036 = vperm.xlu1 %4769, %v865_v9   ;;  %v835_v20 = vand.u32 1, %v4951_v17  ;;  %v864_v23 = vcvt.s32.f32 %v832_v18  ;;  %v4778_v28 = vld [vmem:[%s4906_s25 + $0x58] sm:$0xff]   ;;  %v837_v32 = vand.u32 1, %v4968_v30  ;;  %v4973_v33 = vld [vmem:[%s4911_s28 + $0x48] sm:$0xff]  ;;  %v4976_v34 = vld [vmem:[%s4911_s28 + $0x40] sm:$0xff] }
  0x1c   : > { %1026 = vperm.xlu0 %4768, %v863_v10   ;;  %4725 = vmatmul.mubr.msk.bf16.vlgmr.msra.gmra.mrb[0].mxu0 %vm397_vm0, %v4773_v11  ;;  %v868_v25 = vcvt.s32.f32 %v836_v19  ;;  %v4965_v29 = vld [vmem:[%s4911_s28 + $0x38] sm:$0xff]  ;;  %v840_v35 = vand.u32 1, %v4973_v33  ;;  %v4779_v36 = vld [vmem:[%s4906_s25 + $0x20] sm:$0xff]   ;;  %v839_v40 = vand.u32 1, %v4976_v34  ;;  %v4781_v42 = vld [vmem:[%s4906_s25 + $0x28] sm:$0xff]  }
  0x1d   : > { %4741 = vmatmul.mubr.msk.bf16.vlgmr.msra.gmra.mrb[0].mxu1 %vm397_vm0, %v4774_v12  ;;  %4728 = vmatprep.mubr.msk.bf16.mxu0 %vm397_vm0, %v4775_v21  ;;  %v867_v27 = vcvt.s32.f32 %v835_v20  ;;  %v838_v31 = vand.u32 1, %v4965_v29  ;;  %v4780_v37 = vld [vmem:[%s4906_s25 + $0x60] sm:$0xff]   ;;  %v869_v39 = vcvt.s32.f32 %v837_v32  ;;  %v4986_v41 = vld [vmem:[%s4911_s28 + $0x58] sm:$0xff]  ;;  %v4991_v43 = vld [vmem:[%s4911_s28 + $0x50] sm:$0xff] }
  0x1e   : > { %4744 = vmatprep.mubr.msk.bf16.mxu1 %vm397_vm0, %v4776_v24  ;;  %v872_v44 = vcvt.s32.f32 %v840_v35  ;;  %v4782_v45 = vld [vmem:[%s4906_s25 + $0x68] sm:$0xff]   ;;  %v842_v46 = vand.u32 1, %v4986_v41  ;;  %v841_v47 = vand.u32 1, %v4991_v43  ;;  %v5000_v49 = vld [vmem:[%s4911_s28 + $0x60] sm:$0xff]  ;;  %v871_v50 = vcvt.s32.f32 %v839_v40  ;;  %v4783_v51 = vld [vmem:[%s4906_s25 + $0x30] sm:$0xff]  }
  0x1f   : > { %1041 = vperm.xlu1 %4769, %v866_v22   ;;  %v870_v38 = vcvt.s32.f32 %v838_v31  ;;  %v4997_v48 = vld [vmem:[%s4911_s28 + $0x68] sm:$0xff]  ;;  %v4784_v52 = vld [vmem:[%s4906_s25 + $0x70] sm:$0xff]   ;;  %v843_v56 = vand.u32 1, %v5000_v49  ;;  %v5008_v57 = vld [vmem:[%s4911_s28 + $0x78] sm:$0xff] }
  0x20   : > { %1031 = vperm.xlu0 %4768, %v864_v23   ;;  %v874_v53 = vcvt.s32.f32 %v842_v46  ;;  %v844_v54 = vand.u32 1, %v4997_v48  ;;  %v873_v55 = vcvt.s32.f32 %v841_v47  ;;  %v5013_v58 = vld [vmem:[%s4911_s28 + $0x70] sm:$0xff]  ;;  %v846_v60 = vand.u32 1, %v5008_v57  ;;  %v4785_v62 = vld [vmem:[%s4906_s25 + $0x38] sm:$0xff]   ;;  %v5020_v0 = vld [vmem:[%s4911_s28 + $0x88] sm:$0xff] }
  0x21   : > { %v875_v61 = vcvt.s32.f32 %v843_v56  ;;  %v845_v63 = vand.u32 1, %v5013_v58  ;;  %v4786_v1 = vld [vmem:[%s4906_s25 + $0x78] sm:$0xff]   ;;  %v5024_v2 = vld [vmem:[%s4911_s28 + $0x80] sm:$0xff]  ;;  %v848_v6 = vand.u32 1, %v5020_v0  ;;  %v5034_v10 = vld [vmem:[%s4911_s28 + $0x90] sm:$0xff] }
  0x22   : > { %v876_v59 = vcvt.s32.f32 %v844_v54  ;;  %v878_v5 = vcvt.s32.f32 %v846_v60  ;;  %v847_v8 = vand.u32 1, %v5024_v2  ;;  %v5030_v9 = vld [vmem:[%s4911_s28 + $0x98] sm:$0xff]  ;;  %v849_v18 = vand.u32 1, %v5034_v10  ;;  %v5039_v19 = vld [vmem:[%s4911_s28 + $0xa8] sm:$0xff]  ;;  %v5042_v20 = vld [vmem:[%s4911_s28 + $0xa0] sm:$0xff] }
  0x23   : > { %1051 = vperm.xlu1 %4769, %v868_v25   ;;  %v877_v7 = vcvt.s32.f32 %v845_v63  ;;  %v880_v11 = vcvt.s32.f32 %v848_v6  ;;  %v850_v12 = vand.u32 1, %v5030_v9  ;;  %v852_v22 = vand.u32 1, %v5039_v19  ;;  %v5047_v25 = vld [vmem:[%s4911_s28 + $0xb8] sm:$0xff]  ;;  %v5055_v35 = vld [vmem:[%s4911_s28 + $0xc8] sm:$0xff]  ;;  %v5082_v60 = vld [vmem:[%s4911_s28 + $0xf0] sm:$0xff] }
  0x24   : > { %1046 = vperm.xlu0 %4768, %v867_v27   ;;  %4729 = vmatmul.mubr.msk.bf16.gmra.mrb[4].mxu0 %vm397_vm0, %v4777_v26  ;;  %v879_v14 = vcvt.s32.f32 %v847_v8  ;;  %v881_v23 = vcvt.s32.f32 %v849_v18  ;;  %v851_v24 = vand.u32 1, %v5042_v20  ;;  %v5050_v26 = vld [vmem:[%s4911_s28 + $0xb0] sm:$0xff]  ;;  %v1249_v63 = vshra.s32 %v4945_v15, 1 }
  0x25   : > { %4745 = vmatmul.mubr.msk.bf16.gmra.mrb[4].mxu1 %vm397_vm0, %v4778_v28  ;;  %4732 = vmatprep.mubr.msk.bf16.mxu0 %vm397_vm0, %v4779_v36  ;;  %v882_v21 = vcvt.s32.f32 %v850_v12  ;;  %v884_v27 = vcvt.s32.f32 %v852_v22  ;;  %v854_v28 = vand.u32 1, %v5047_v25  ;;  %v853_v32 = vand.u32 1, %v5050_v26  ;;  %v5058_v36 = vld [vmem:[%s4911_s28 + $0xc0] sm:$0xff] }
  0x26   : > { %4748 = vmatprep.mubr.msk.bf16.mxu1 %vm397_vm0, %v4780_v37  ;;  %v883_v31 = vcvt.s32.f32 %v851_v24  ;;  %v855_v40 = vand.u32 1, %v5058_v36  ;;  %v1248_v6 = vshra.s32 %v4930_v4, 1  ;;  %v1281_v8 = vand.u32 1, %v1249_v63 }
  0x27   : > { %1061 = vperm.xlu1 %4769, %v870_v38   ;;  %v886_v37 = vcvt.s32.f32 %v854_v28  ;;  %v856_v38 = vand.u32 1, %v5055_v35  ;;  %v1250_v18 = vshra.s32 %v4927_v3, 1  ;;  %v1252_v28 = vshra.s32 %v4951_v17, 1 }
  0x28   : > { %1056 = vperm.xlu0 %4768, %v869_v39   ;;  %v885_v39 = vcvt.s32.f32 %v853_v32  ;;  %v887_v47 = vcvt.s32.f32 %v855_v40  ;;  %v1254_v40 = vshra.s32 %v4968_v30, 1 }
  0x2b   : > { %1071 = vperm.xlu1 %4769, %v872_v44   ;;  %v5066_v44 = vld [vmem:[%s4911_s28 + $0xd0] sm:$0xff] }
  0x2c   : > { %1066 = vperm.xlu0 %4768, %v871_v50   ;;  %4733 = vmatmul.mubr.msk.bf16.gmra.mrb[8].mxu0 %vm397_vm0, %v4781_v42  ;;  %v5063_v42 = vld [vmem:[%s4911_s28 + $0xd8] sm:$0xff]  ;;  %v857_v50 = vand.u32 1, %v5066_v44 }
  0x2d   : > { %4749 = vmatmul.mubr.msk.bf16.gmra.mrb[8].mxu1 %vm397_vm0, %v4782_v45  ;;  %4736 = vmatprep.mubr.msk.bf16.mxu0 %vm397_vm0, %v4783_v51  ;;  %v888_v45 = vcvt.s32.f32 %v856_v38  ;;  %v858_v46 = vand.u32 1, %v5063_v42  ;;  %v5071_v51 = vld [vmem:[%s4911_s28 + $0xe8] sm:$0xff] }
  0x2e   : > { %4752 = vmatprep.mubr.msk.bf16.mxu1 %vm397_vm0, %v4784_v52  ;;  %v5074_v52 = vld [vmem:[%s4911_s28 + $0xe0] sm:$0xff]  ;;  %v860_v54 = vand.u32 1, %v5071_v51 }
  0x2f   : > { %1081 = vperm.xlu1 %4769, %v874_v53   ;;  %v890_v53 = vcvt.s32.f32 %v858_v46  ;;  %v859_v56 = vand.u32 1, %v5074_v52 }
  0x30   : > { %1076 = vperm.xlu0 %4768, %v873_v55   ;;  %v889_v55 = vcvt.s32.f32 %v857_v50 }
  0x33   : > { %1091 = vperm.xlu1 %4769, %v876_v59   ;;  %v5079_v59 = vld [vmem:[%s4911_s28 + $0xf8] sm:$0xff] }
  0x34   : > { %1086 = vperm.xlu0 %4768, %v875_v61   ;;  %4737 = vmatmul.mubr.msk.bf16.gmra.mrb[12].mxu0 %vm397_vm0, %v4785_v62  ;;  %v892_v61 = vcvt.s32.f32 %v860_v54  ;;  %v862_v62 = vand.u32 1, %v5079_v59  ;;  %v1256_v54 = vshra.s32 %v4976_v34, 1 }
  0x35   : > { %4753 = vmatmul.mubr.msk.bf16.gmra.mrb[12].mxu1 %vm397_vm0, %v4786_v1  ;;  %v891_v1 = vcvt.s32.f32 %v859_v56 }
  0x36   : > { %v1288_v63 = vand.u32 1, %v1256_v54 }
  0x37   : > { %1101 = vperm.xlu1 %4769, %v878_v5   ;;  %v861_v5 = vand.u32 1, %v5082_v60 }
  0x38   : > { %1096 = vperm.xlu0 %4768, %v877_v7   ;;  %v894_v7 = vcvt.s32.f32 %v862_v62 }
  0x39   : > { %v893_v12 = vcvt.s32.f32 %v861_v5 }
  0x3b   : > { %1111 = vperm.xlu1 %4769, %v880_v11   ;;  %v1251_v11 = vshra.s32 %v4941_v13, 1 }
  0x3c   : > { %1106 = vperm.xlu0 %4768, %v879_v14   ;;  %v1280_v14 = vand.u32 1, %v1248_v6 }
  0x3d   : > { %v1283_v22 = vand.u32 1, %v1251_v11 }
  0x3e   : > { %v1312_v24 = vcvt.s32.f32 %v1280_v14 }
  0x3f   : > { %1121 = vperm.xlu1 %4769, %v882_v21   ;;  %v1313_v21 = vcvt.s32.f32 %v1281_v8  ;;  %v1320_v8 = vcvt.s32.f32 %v1288_v63 }
  0x40   : > { %1116 = vperm.xlu0 %4768, %v881_v23   ;;  %v1253_v23 = vshra.s32 %v4948_v16, 1 }
  0x42   : > { %v1285_v32 = vand.u32 1, %v1253_v23 }
  0x43   : > { %1131 = vperm.xlu1 %4769, %v884_v27   ;;  %v1282_v27 = vand.u32 1, %v1250_v18 }
  0x44   : > { %1126 = vperm.xlu0 %4768, %v883_v31   ;;  %v1315_v31 = vcvt.s32.f32 %v1283_v22 }
  0x45   : > { %v1314_v38 = vcvt.s32.f32 %v1282_v27 }
  0x47   : > { %1141 = vperm.xlu1 %4769, %v886_v37   ;;  %v1255_v37 = vshra.s32 %v4965_v29, 1 }
  0x48   : > { %1136 = vperm.xlu0 %4768, %v885_v39   ;;  %v1284_v39 = vand.u32 1, %v1252_v28 }
  0x49   : > { %v1287_v46 = vand.u32 1, %v1255_v37 }
  0x4a   : > { %v1316_v50 = vcvt.s32.f32 %v1284_v39 }
  0x4b   : > { %1151 = vperm.xlu1 %4769, %v888_v45   ;;  %v1317_v45 = vcvt.s32.f32 %v1285_v32 }
  0x4c   : > { %1146 = vperm.xlu0 %4768, %v887_v47   ;;  %v1257_v47 = vshra.s32 %v4973_v33, 1 }
  0x4e   : > { %v1289_v56 = vand.u32 1, %v1257_v47 }
  0x4f   : > { %1161 = vperm.xlu1 %4769, %v890_v53   ;;  %v1286_v53 = vand.u32 1, %v1254_v40 }
  0x50   : > { %1156 = vperm.xlu0 %4768, %v889_v55   ;;  %v1319_v55 = vcvt.s32.f32 %v1287_v46  ;;  %v1321_v5 = vcvt.s32.f32 %v1289_v56 }
  0x51   : > { %v1318_v62 = vcvt.s32.f32 %v1286_v53 }
  0x53   : > { %1171 = vperm.xlu1 %4769, %v892_v61   ;;  %v1259_v61 = vshra.s32 %v4986_v41, 1 }
  0x54   : > { %1166 = vperm.xlu0 %4768, %v891_v1   ;;  %v1258_v1 = vshra.s32 %v4991_v43, 1 }
  0x55   : > { %v1291_v6 = vand.u32 1, %v1259_v61 }
  0x56   : > { %v1290_v11 = vand.u32 1, %v1258_v1 }
  0x57   : > { %1181 = vperm.xlu1 %4769, %v894_v7   ;;  %v1261_v7 = vshra.s32 %v4997_v48, 1  ;;  %v1323_v14 = vcvt.s32.f32 %v1291_v6 }
  0x58   : > { %1176 = vperm.xlu0 %4768, %v893_v12   ;;  %v1260_v12 = vshra.s32 %v5000_v49, 1  ;;  %v1322_v22 = vcvt.s32.f32 %v1290_v11 }
  0x59   : > { %v1293_v18 = vand.u32 1, %v1261_v7 }
  0x5a   : > { %v1292_v23 = vand.u32 1, %v1260_v12 }
  0x5b   : > { %1480 = vperm.xlu1 %4769, %v1313_v21   ;;  %v1263_v21 = vshra.s32 %v5008_v57, 1  ;;  %v1325_v27 = vcvt.s32.f32 %v1293_v18 }
  0x5c   : > { %1475 = vperm.xlu0 %4768, %v1312_v24   ;;  %v1262_v24 = vshra.s32 %v5013_v58, 1  ;;  %v1324_v32 = vcvt.s32.f32 %v1292_v23 }
  0x5d   : > { %v1295_v28 = vand.u32 1, %v1263_v21 }
  0x5e   : > { %v1294_v37 = vand.u32 1, %v1262_v24 }
  0x5f   : > { %1490 = vperm.xlu1 %4769, %v1315_v31   ;;  %v1265_v31 = vshra.s32 %v5020_v0, 1  ;;  %v1327_v39 = vcvt.s32.f32 %v1295_v28 }
  0x60   : > { %1485 = vperm.xlu0 %4768, %v1314_v38   ;;  %v1264_v38 = vshra.s32 %v5024_v2, 1  ;;  %v1326_v46 = vcvt.s32.f32 %v1294_v37 }
  0x61   : > { %v1297_v40 = vand.u32 1, %v1265_v31 }
  0x62   : > { %v1296_v47 = vand.u32 1, %v1264_v38 }
  0x63   : > { %1500 = vperm.xlu1 %4769, %v1317_v45   ;;  %v1267_v45 = vshra.s32 %v5030_v9, 1  ;;  %v1329_v53 = vcvt.s32.f32 %v1297_v40 }
  0x64   : > { %1495 = vperm.xlu0 %4768, %v1316_v50   ;;  %v1266_v50 = vshra.s32 %v5034_v10, 1  ;;  %v1328_v56 = vcvt.s32.f32 %v1296_v47 }
  0x65   : > { %v1299_v54 = vand.u32 1, %v1267_v45 }
  0x66   : > { %v1298_v61 = vand.u32 1, %v1266_v50 }
  0x67   : > { %1510 = vperm.xlu1 %4769, %v1319_v55   ;;  %v1269_v55 = vshra.s32 %v5039_v19, 1  ;;  %v1331_v63 = vcvt.s32.f32 %v1299_v54 }
  0x68   : > { %1505 = vperm.xlu0 %4768, %v1318_v62   ;;  %v1268_v62 = vshra.s32 %v5042_v20, 1  ;;  %v1330_v6 = vcvt.s32.f32 %v1298_v61 }
  0x69   : > { %v1301_v1 = vand.u32 1, %v1269_v55 }
  0x6a   : > { %v1300_v7 = vand.u32 1, %v1268_v62 }
  0x6b   : > { %1520 = vperm.xlu1 %4769, %v1321_v5   ;;  %v1271_v5 = vshra.s32 %v5047_v25, 1  ;;  %v1333_v11 = vcvt.s32.f32 %v1301_v1 }
  0x6c   : > { %1515 = vperm.xlu0 %4768, %v1320_v8   ;;  %v1270_v8 = vshra.s32 %v5050_v26, 1  ;;  %v1332_v18 = vcvt.s32.f32 %v1300_v7 }
  0x6d   : > { %v1303_v12 = vand.u32 1, %v1271_v5 }
  0x6e   : > { %v1302_v21 = vand.u32 1, %v1270_v8 }
  0x6f   : > { %1530 = vperm.xlu1 %4769, %v1323_v14   ;;  %v1273_v14 = vshra.s32 %v5055_v35, 1  ;;  %v1335_v23 = vcvt.s32.f32 %v1303_v12 }
  0x70   : > { %1525 = vperm.xlu0 %4768, %v1322_v22   ;;  %v1272_v22 = vshra.s32 %v5058_v36, 1  ;;  %v1334_v28 = vcvt.s32.f32 %v1302_v21 }
  0x71   : > { %v1305_v24 = vand.u32 1, %v1273_v14 }
  0x72   : > { %v1304_v31 = vand.u32 1, %v1272_v22 }
  0x73   : > { %1540 = vperm.xlu1 %4769, %v1325_v27   ;;  %v1275_v27 = vshra.s32 %v5063_v42, 1  ;;  %v1337_v37 = vcvt.s32.f32 %v1305_v24 }
  0x74   : > { %1535 = vperm.xlu0 %4768, %v1324_v32   ;;  %v1274_v32 = vshra.s32 %v5066_v44, 1  ;;  %v1336_v40 = vcvt.s32.f32 %v1304_v31 }
  0x75   : > { %v1307_v38 = vand.u32 1, %v1275_v27 }
  0x76   : > { %v1306_v45 = vand.u32 1, %v1274_v32 }
  0x77   : > { %1550 = vperm.xlu1 %4769, %v1327_v39   ;;  %v1277_v39 = vshra.s32 %v5071_v51, 1  ;;  %v1339_v47 = vcvt.s32.f32 %v1307_v38 }
  0x78   : > { %1545 = vperm.xlu0 %4768, %v1326_v46   ;;  %v1276_v46 = vshra.s32 %v5074_v52, 1  ;;  %v1338_v54 = vcvt.s32.f32 %v1306_v45 }
  0x79   : > { %v1309_v50 = vand.u32 1, %v1277_v39  ;;  %v1704_v39 = vshra.s32 %v4965_v29, 2 }
  0x7a   : > { %v1308_v55 = vand.u32 1, %v1276_v46  ;;  %v1703_v46 = vshra.s32 %v4968_v30, 2 }
  0x7b   : > { %1560 = vperm.xlu1 %4769, %v1329_v53   ;;  %v1279_v53 = vshra.s32 %v5079_v59, 1  ;;  %v1341_v61 = vcvt.s32.f32 %v1309_v50 }
  0x7c   : > { %1555 = vperm.xlu0 %4768, %v1328_v56   ;;  %v1278_v56 = vshra.s32 %v5082_v60, 1  ;;  %v1340_v1 = vcvt.s32.f32 %v1308_v55  ;;  %v1706_v55 = vshra.s32 %v4973_v33, 2 }
  0x7d   : > { %v1311_v62 = vand.u32 1, %v1279_v53 }
  0x7e   : > { %v1310_v5 = vand.u32 1, %v1278_v56 }
  0x7f   : > { %1570 = vperm.xlu1 %4769, %v1331_v63   ;;  %v1698_v63 = vshra.s32 %v4945_v15, 2  ;;  %v1343_v7 = vcvt.s32.f32 %v1311_v62  ;;  %v1705_v62 = vshra.s32 %v4976_v34, 2 }
  0x80   : > { %1565 = vperm.xlu0 %4768, %v1330_v6   ;;  %v1697_v6 = vshra.s32 %v4930_v4, 2  ;;  %v1342_v12 = vcvt.s32.f32 %v1310_v5 }
  0x81   : > { %v1730_v8 = vand.u32 1, %v1698_v63 }
  0x82   : > { %v1729_v14 = vand.u32 1, %v1697_v6  ;;  %v1738_v6 = vand.u32 1, %v1706_v55 }
  0x83   : > { %1580 = vperm.xlu1 %4769, %v1333_v11   ;;  %v1700_v11 = vshra.s32 %v4941_v13, 2  ;;  %v1762_v21 = vcvt.s32.f32 %v1730_v8 }
  0x84   : > { %1575 = vperm.xlu0 %4768, %v1332_v18   ;;  %v1699_v18 = vshra.s32 %v4927_v3, 2  ;;  %v1761_v24 = vcvt.s32.f32 %v1729_v14 }
  0x85   : > { %v1732_v22 = vand.u32 1, %v1700_v11  ;;  %v1737_v11 = vand.u32 1, %v1705_v62 }
  0x86   : > { %v1731_v27 = vand.u32 1, %v1699_v18 }
  0x87   : > { %1590 = vperm.xlu1 %4769, %v1335_v23   ;;  %v1702_v23 = vshra.s32 %v4948_v16, 2 }
  0x88   : > { %1585 = vperm.xlu0 %4768, %v1334_v28   ;;  %v1701_v28 = vshra.s32 %v4951_v17, 2 }
  0x89   : > { %v1734_v38 = vand.u32 1, %v1702_v23  ;;  %v1710_v23 = vshra.s32 %v4997_v48, 2 }
  0x8a   : > { %v1733_v45 = vand.u32 1, %v1701_v28  ;;  %v1709_v28 = vshra.s32 %v5000_v49, 2 }
  0x8b   : > { %1600 = vperm.xlu1 %4769, %v1337_v37   ;;  %v1764_v37 = vcvt.s32.f32 %v1732_v22  ;;  %v1766_v53 = vcvt.s32.f32 %v1734_v38 }
  0x8c   : > { %1595 = vperm.xlu0 %4768, %v1336_v40   ;;  %v1763_v40 = vcvt.s32.f32 %v1731_v27  ;;  %v1765_v56 = vcvt.s32.f32 %v1733_v45  ;;  %v1712_v45 = vshra.s32 %v5008_v57, 2 }
  0x8e   : > { %v1744_v62 = vand.u32 1, %v1712_v45  ;;  %v1720_v45 = vshra.s32 %v5047_v25, 2 }
  0x8f   : > { %1610 = vperm.xlu1 %4769, %v1339_v47  }
  0x90   : > { %1605 = vperm.xlu0 %4768, %v1338_v54   ;;  %v1736_v54 = vand.u32 1, %v1704_v39 }
  0x92   : > { %v1768_v5 = vcvt.s32.f32 %v1736_v54  ;;  %v1711_v54 = vshra.s32 %v5013_v58, 2 }
  0x93   : > { %1620 = vperm.xlu1 %4769, %v1341_v61   ;;  %v1735_v61 = vand.u32 1, %v1703_v46 }
  0x94   : > { %1615 = vperm.xlu0 %4768, %v1340_v1  }
  0x95   : > { %v1767_v8 = vcvt.s32.f32 %v1735_v61 }
  0x97   : > { %1630 = vperm.xlu1 %4769, %v1343_v7   ;;  %v1708_v7 = vshra.s32 %v4986_v41, 2 }
  0x98   : > { %1625 = vperm.xlu0 %4768, %v1342_v12   ;;  %v1707_v12 = vshra.s32 %v4991_v43, 2 }
  0x99   : > { %v1740_v22 = vand.u32 1, %v1708_v7 }
  0x9a   : > { %v5124_v31 = vpop.permute.xlu1 %1036  ;;  %v1739_v27 = vand.u32 1, %v1707_v12  ;;  %v1715_v12 = vshra.s32 %v5034_v10, 2 }
  0x9b   : > { %7894 = vst [vmem:[#allocation3_spill] sm:$0xff] %v5124_v31  ;;  %v5126_v32 = vpop.permute.xlu0 %1026  ;;  %1929 = vperm.xlu1 %4769, %v1762_v21   ;;  %v1770_v21 = vcvt.s32.f32 %v1738_v6  ;;  %v1772_v39 = vcvt.s32.f32 %v1740_v22  ;;  %v1713_v6 = vshra.s32 %v5024_v2, 2 }
  0x9c   : > { %7895 = vst [vmem:[#allocation4_spill] sm:$0xff] %v5126_v32  ;;  %1924 = vperm.xlu0 %4768, %v1761_v24   ;;  %v1769_v24 = vcvt.s32.f32 %v1737_v11  ;;  %v1771_v46 = vcvt.s32.f32 %v1739_v27  ;;  %v1716_v11 = vshra.s32 %v5030_v9, 2  ;;  %v1776_v27 = vcvt.s32.f32 %v1744_v62 }
  0x9d   : > { %v1724_v62 = vshra.s32 %v5063_v42, 2 }
  0x9e   : > { %v5130_v47 = vpop.permute.xlu1 %1041 }
  0x9f   : > { %7896 = vst [vmem:[#allocation5_spill] sm:$0xff] %v5130_v47  ;;  %v5132_v50 = vpop.permute.xlu0 %1031  ;;  %1939 = vperm.xlu1 %4769, %v1764_v37  }
  0xa0   : > { %7897 = vst [vmem:[#allocation6_spill] sm:$0xff] %v5132_v50  ;;  %1934 = vperm.xlu0 %4768, %v1763_v40   ;;  %v1742_v40 = vand.u32 1, %v1710_v23  ;;  %v1717_v23 = vshra.s32 %v5042_v20, 2 }
  0xa2   : > { %v5136_v63 = vpop.permute.xlu1 %1051  ;;  %v1774_v61 = vcvt.s32.f32 %v1742_v40 }
  0xa3   : > { %7898 = vst [vmem:[#allocation7_spill] sm:$0xff] %v5136_v63  ;;  %v5138_v1 = vpop.permute.xlu0 %1046  ;;  %1949 = vperm.xlu1 %4769, %v1766_v53   ;;  %v1741_v53 = vand.u32 1, %v1709_v28 }
  0xa4   : > { %7899 = vst [vmem:[#allocation8_spill] sm:$0xff] %v5138_v1  ;;  %1944 = vperm.xlu0 %4768, %v1765_v56  }
  0xa5   : > { %v1773_v7 = vcvt.s32.f32 %v1741_v53  ;;  %v1748_v53 = vand.u32 1, %v1716_v11  ;;  %v1726_v11 = vshra.s32 %v5071_v51, 2 }
  0xa6   : > { %v5142_v14 = vpop.permute.xlu1 %1061 }
  0xa7   : > { %7900 = vst [vmem:[#allocation9_spill] sm:$0xff] %v5142_v14  ;;  %v5144_v18 = vpop.permute.xlu0 %1056  ;;  %1959 = vperm.xlu1 %4769, %v1768_v5   ;;  %v1714_v5 = vshra.s32 %v5020_v0, 2  ;;  %v5204_v63 = vand.u32 1, %v1726_v11  ;;  %v2151_v11 = vshra.s32 %v4948_v16, 3 }
  0xa8   : > { %7901 = vst [vmem:[#allocation10_spill] sm:$0xff] %v5144_v18  ;;  %1954 = vperm.xlu0 %4768, %v1767_v8   ;;  %v1743_v8 = vand.u32 1, %v1711_v54  ;;  %v1747_v54 = vand.u32 1, %v1715_v12  ;;  %v1725_v12 = vshra.s32 %v5074_v52, 2 }
  0xa9   : > { %v1746_v28 = vand.u32 1, %v1714_v5  ;;  %v1723_v5 = vshra.s32 %v5066_v44, 2  ;;  %v7942_v32 = vcvt.s32.f32 %v5204_v63  ;;  %v5383_v63 = vld [vmem:[%s4911_s28] sm:$0xff] }
  0xaa   : > { %v5148_v37 = vpop.permute.xlu1 %1071  ;;  %v1775_v40 = vcvt.s32.f32 %v1743_v8 }
  0xab   : > { %7902 = vst [vmem:[#allocation11_spill] sm:$0xff] %v5148_v37  ;;  %v5150_v38 = vpop.permute.xlu0 %1066  ;;  %1969 = vperm.xlu1 %4769, %v1770_v21   ;;  %v1718_v21 = vshra.s32 %v5039_v19, 2  ;;  %v5175_v37 = vand.u32 1, %v1717_v23 }
  0xac   : > { %7903 = vst [vmem:[#allocation12_spill] sm:$0xff] %v5150_v38  ;;  %1964 = vperm.xlu0 %4768, %v1769_v24   ;;  %v1779_v38 = vcvt.s32.f32 %v1747_v54 }
  0xad   : > { %v5170_v18 = vand.u32 1, %v1718_v21  ;;  %v5184_v21 = vand.u32 1, %v1720_v45  ;;  %v5200_v45 = vand.u32 1, %v1723_v5  ;;  %v2149_v5 = vshra.s32 %v4941_v13, 3 }
  0xae   : > { %v5154_v55 = vpop.permute.xlu1 %1081  ;;  %v5242_v13 = vand.u32 1, %v2151_v11  ;;  %v2160_v11 = vshra.s32 %v5013_v58, 3 }
  0xaf   : > { %7904 = vst [vmem:[#allocation13_spill] sm:$0xff] %v5154_v55  ;;  %v5156_v56 = vpop.permute.xlu0 %1076  ;;  %1979 = vperm.xlu1 %4769, %v1772_v39   ;;  %v1745_v39 = vand.u32 1, %v1713_v6  ;;  %v1780_v55 = vcvt.s32.f32 %v1748_v53  ;;  %v5206_v53 = vand.u32 1, %v1725_v12  ;;  %v2150_v12 = vshra.s32 %v4951_v17, 3 }
  0xb0   : > { %7905 = vst [vmem:[#allocation14_spill] sm:$0xff] %v5156_v56  ;;  %1974 = vperm.xlu0 %4768, %v1771_v46   ;;  %v1719_v46 = vshra.s32 %v5050_v26, 2  ;;  %v7934_v50 = vcvt.s32.f32 %v5200_v45 }
  0xb1   : > { %v1777_v8 = vcvt.s32.f32 %v1745_v39  ;;  %v1781_v39 = vcvt.s32.f32 %v5175_v37  ;;  %v1784_v37 = vcvt.s32.f32 %v5184_v21  ;;  %v2153_v21 = vshra.s32 %v4965_v29, 3 }
  0xb2   : > { %v5163_v22 = vpop.permute.xlu1 %1091  ;;  %v5186_v23 = vand.u32 1, %v1719_v46  ;;  %v2156_v29 = vshra.s32 %v4991_v43, 3 }
  0xb3   : > { %7906 = vst [vmem:[#allocation15_spill] sm:$0xff] %v5163_v22  ;;  %v5166_v24 = vpop.permute.xlu0 %1086  ;;  %1989 = vperm.xlu1 %4769, %v1774_v61   ;;  %v1722_v22 = vshra.s32 %v5055_v35, 2  ;;  %v1721_v61 = vshra.s32 %v5058_v36, 2 }
  0xb4   : > { %7907 = vst [vmem:[#allocation16_spill] sm:$0xff] %v5166_v24  ;;  %1984 = vperm.xlu0 %4768, %v1773_v7   ;;  %v1778_v7 = vcvt.s32.f32 %v1746_v28  ;;  %v1727_v24 = vshra.s32 %v5082_v60, 2  ;;  %v1783_v54 = vcvt.s32.f32 %v5186_v23 }
  0xb5   : > { %v5196_v14 = vand.u32 1, %v1721_v61 }
  0xb6   : > { %v5173_v56 = vpop.permute.xlu1 %1101 }
  0xb7   : > { %7908 = vst [vmem:[#allocation17_spill] sm:$0xff] %v5173_v56  ;;  %v5180_v6 = vpop.permute.xlu0 %1096  ;;  %1999 = vperm.xlu1 %4769, %v1776_v27   ;;  %v1728_v56 = vshra.s32 %v5079_v59, 2  ;;  %v5191_v27 = vand.u32 1, %v1722_v22  ;;  %v2146_v22 = vshra.s32 %v4930_v4, 3  ;;  %v5238_v4 = vand.u32 1, %v2149_v5 }
  0xb8   : > { %7909 = vst [vmem:[#allocation18_spill] sm:$0xff] %v5180_v6  ;;  %1994 = vperm.xlu0 %4768, %v1775_v40   ;;  %v1782_v6 = vcvt.s32.f32 %v5170_v18  ;;  %v5198_v40 = vand.u32 1, %v1724_v62  ;;  %v2147_v18 = vshra.s32 %v4945_v15, 3  ;;  %v5214_v62 = vand.u32 1, %v1727_v24 }
  0xb9   : > { %v5212_v61 = vand.u32 1, %v1728_v56  ;;  %v5232_v17 = vand.u32 1, %v2146_v22  ;;  %v2152_v56 = vshra.s32 %v4968_v30, 3  ;;  %v2154_v22 = vshra.s32 %v4976_v34, 3 }
  0xba   : > { %v5193_v28 = vpop.permute.xlu1 %1111  ;;  %v5230_v16 = vand.u32 1, %v2147_v18  ;;  %v2159_v30 = vshra.s32 %v4997_v48, 3  ;;  %v2158_v5 = vshra.s32 %v5000_v49, 3  ;;  %v2165_v34 = vshra.s32 %v5030_v9, 3 }
  0xbb   : > { %7910 = vst [vmem:[#allocation19_spill] sm:$0xff] %v5193_v28  ;;  %v5202_v46 = vpop.permute.xlu0 %1106  ;;  %2009 = vperm.xlu1 %4769, %v1778_v7   ;;  %v2148_v7 = vshra.s32 %v4927_v3, 3  ;;  %v5244_v3 = vand.u32 1, %v2150_v12  ;;  %v5260_v12 = vand.u32 1, %v2153_v21  ;;  %v5276_v21 = vand.u32 1, %v2156_v29 }
  0xbc   : > { %7911 = vst [vmem:[#allocation20_spill] sm:$0xff] %v5202_v46  ;;  %2004 = vperm.xlu0 %4768, %v1777_v8   ;;  %v2157_v8 = vshra.s32 %v4986_v41, 3  ;;  %v5262_v41 = vand.u32 1, %v2152_v56  ;;  %v5280_v43 = vand.u32 1, %v2159_v30  ;;  %v2162_v29 = vshra.s32 %v5024_v2, 3 }
  0xbd   : > { %v2167_v30 = vshra.s32 %v5039_v19, 3 }
  0xbe   : > { %v5220_v15 = vpop.permute.xlu1 %1121 }
  0xbf   : > { %7912 = vst [vmem:[#allocation21_spill] sm:$0xff] %v5220_v15  ;;  %v5226_v24 = vpop.permute.xlu0 %1116  ;;  %2019 = vperm.xlu1 %4769, %v1780_v55   ;;  %v5240_v55 = vand.u32 1, %v2148_v7  ;;  %v2161_v7 = vshra.s32 %v5008_v57, 3  ;;  %v5379_v15 = vld [vmem:[%s4911_s28 + $0x8] sm:$0xff] }
  0xc0   : > { %7913 = vst [vmem:[#allocation22_spill] sm:$0xff] %v5226_v24  ;;  %2014 = vperm.xlu0 %4768, %v1779_v38   ;;  %v2155_v38 = vshra.s32 %v4973_v33, 3  ;;  %v5274_v33 = vand.u32 1, %v2157_v8  ;;  %v2163_v8 = vshra.s32 %v5020_v0, 3  ;;  %v5322_v24 = vand.u32 1, %v2167_v30 }
  0xc1   : > { %v5284_v46 = vand.u32 1, %v2161_v7  ;;  %v2174_v30 = vshra.s32 %v5074_v52, 3 }
  0xc2   : > { %v5246_v18 = vpop.permute.xlu1 %1131  ;;  %v5270_v1 = vand.u32 1, %v2155_v38  ;;  %v2169_v38 = vshra.s32 %v5047_v25, 3  ;;  %7929 = vst [vmem:[#allocation36_spill] sm:$0xff] %v5322_v24 }
  0xc3   : > { %7914 = vst [vmem:[#allocation23_spill] sm:$0xff] %v5246_v18  ;;  %v5252_v23 = vpop.permute.xlu0 %1126  ;;  %2029 = vperm.xlu1 %4769, %v1782_v6   ;;  %v5282_v6 = vand.u32 1, %v2158_v5  ;;  %7919 = vst [vmem:[#allocation28_spill] sm:$0xff] %v5284_v46  ;;  %v5286_v18 = vand.u32 1, %v2160_v11  ;;  %v2166_v5 = vshra.s32 %v5042_v20, 3  ;;  %v5312_v11 = vand.u32 1, %v2163_v8 }
  0xc4   : > { %7915 = vst [vmem:[#allocation24_spill] sm:$0xff] %v5252_v23  ;;  %2024 = vperm.xlu0 %4768, %v1781_v39   ;;  %v5272_v39 = vand.u32 1, %v2154_v22  ;;  %v5314_v22 = vand.u32 1, %v2162_v29  ;;  %v2170_v8 = vshra.s32 %v5058_v36, 3  ;;  %v2173_v29 = vshra.s32 %v5063_v42, 3 }
  0xc5   : > { %7918 = vst [vmem:[#allocation27_spill] sm:$0xff] %v5282_v6  ;;  %7920 = vst [vmem:[#allocation29_spill] sm:$0xff] %v5286_v18  ;;  %v5324_v31 = vand.u32 1, %v2166_v5  ;;  %v2177_v5 = vshra.s32 %v5079_v59, 3  ;;  %v5344_v18 = vand.u32 1, %v2169_v38 }
  0xc6   : > { %v5268_v23 = vpop.permute.xlu1 %1141  ;;  %7925 = vst [vmem:[#allocation32_spill] sm:$0xff] %v5312_v11  ;;  %7926 = vst [vmem:[#allocation33_spill] sm:$0xff] %v5314_v22  ;;  %v5356_v45 = vand.u32 1, %v2170_v8  ;;  %v5358_v38 = vand.u32 1, %v2173_v29  ;;  %v7947_v29 = vcvt.s32.f32 %v5206_v53  ;;  %v5427_v22 = vld [vmem:[%s4911_s28 + $0x30] sm:$0xff] }
  0xc7   : > { %7916 = vst [vmem:[#allocation25_spill] sm:$0xff] %v5268_v23  ;;  %v5278_v56 = vpop.permute.xlu0 %1136  ;;  %2039 = vperm.xlu1 %4769, %v1784_v37   ;;  %v2164_v37 = vshra.s32 %v5034_v10, 3  ;;  %v7923_v23 = vcvt.s32.f32 %v5191_v27  ;;  %v2168_v27 = vshra.s32 %v5050_v26, 3  ;;  %7930 = vst [vmem:[#allocation37_spill] sm:$0xff] %v5324_v31 }
  0xc8   : > { %7917 = vst [vmem:[#allocation26_spill] sm:$0xff] %v5278_v56  ;;  %2034 = vperm.xlu0 %4768, %v1783_v54   ;;  %v7924_v54 = vcvt.s32.f32 %v5196_v14  ;;  %v2171_v14 = vshra.s32 %v5055_v35, 3  ;;  %7935 = vst [vmem:[#allocation40_spill] sm:$0xff] %v5344_v18  ;;  %v7951_v18 = vcvt.s32.f32 %v5214_v62 }
  0xc9   : > { %v5320_v28 = vand.u32 1, %v2164_v37  ;;  %v2175_v37 = vshra.s32 %v5071_v51, 3  ;;  %7938 = vst [vmem:[#allocation43_spill] sm:$0xff] %v5356_v45  ;;  %7939 = vst [vmem:[#allocation44_spill] sm:$0xff] %v5358_v38 }
  0xca   : > { %v5296_v7 = vpop.permute.xlu1 %1151 }
  0xcb   : > { %7921 = vst [vmem:[#allocation30_spill] sm:$0xff] %v5296_v7  ;;  %v5302_v56 = vpop.permute.xlu0 %1146  ;;  %2049 = vperm.xlu1 %4769, %v7923_v23   ;;  %v5318_v23 = vand.u32 1, %v2165_v34  ;;  %7928 = vst [vmem:[#allocation35_spill] sm:$0xff] %v5320_v28  ;;  %v7933_v34 = vcvt.s32.f32 %v5198_v40  ;;  %v5366_v46 = vand.u32 1, %v2175_v37  ;;  %v2466_v37 = vshra.s32 %v5383_v63, 4 }
  0xcc   : > { %7922 = vst [vmem:[#allocation31_spill] sm:$0xff] %v5302_v56  ;;  %2044 = vperm.xlu0 %4768, %v7924_v54   ;;  %v2172_v54 = vshra.s32 %v5066_v44, 3 }
  0xcd   : > { %7927 = vst [vmem:[#allocation34_spill] sm:$0xff] %v5318_v23  ;;  %7943 = vst [vmem:[#allocation47_spill] sm:$0xff] %v5366_v46  ;;  %v7950_v23 = vcvt.s32.f32 %v5212_v61  ;;  %v5420_v31 = vand.u32 1, %v2466_v37  ;;  %v5423_v61 = vld [vmem:[%s4911_s28 + $0x38] sm:$0xff]  ;;  %v4795_v37 = vld [vmem:[%s4911_s28 + $0x48] sm:$0xff] }
  0xce   : > { %v5326_v7 = vpop.permute.xlu1 %1161 }
  0xcf   : > { %7931 = vst [vmem:[#allocation38_spill] sm:$0xff] %v5326_v7  ;;  %v5332_v56 = vpop.permute.xlu0 %1156  ;;  %2059 = vperm.xlu1 %4769, %v7933_v34   ;;  %v2176_v7 = vshra.s32 %v5082_v60, 3  ;;  %v5368_v34 = vand.u32 1, %v2174_v30  ;;  %v5387_v30 = vld [vmem:[%s4911_s28 + $0x18] sm:$0xff] }
  0xd0   : > { %7932 = vst [vmem:[#allocation39_spill] sm:$0xff] %v5332_v56  ;;  %2054 = vperm.xlu0 %4768, %v7934_v50   ;;  %v5346_v56 = vand.u32 1, %v2168_v27  ;;  %v5354_v50 = vand.u32 1, %v2171_v14  ;;  %v5360_v27 = vand.u32 1, %v2172_v54  ;;  %v5370_v14 = vand.u32 1, %v2177_v5  ;;  %v5391_v5 = vld [vmem:[%s4911_s28 + $0x10] sm:$0xff] }
  0xd1   : > { %7944 = vst [vmem:[#allocation48_spill] sm:$0xff] %v5368_v34  ;;  %v5372_v8 = vand.u32 1, %v2176_v7  ;;  %v2469_v7 = vshra.s32 %v5387_v30, 4  ;;  %v2468_v53 = vshra.s32 %v5391_v5, 4  ;;  %v5399_v54 = vld [vmem:[%s4911_s28 + $0x20] sm:$0xff]  ;;  %v4797_v34 = vld [vmem:[%s4911_s28 + $0x58] sm:$0xff] }
  0xd2   : > { %7936 = vst [vmem:[#allocation41_spill] sm:$0xff] %v5346_v56  ;;  %v5352_v6 = vpop.permute.xlu1 %1171  ;;  %7940 = vst [vmem:[#allocation45_spill] sm:$0xff] %v5360_v27  ;;  %v2477_v46 = vshra.s32 %v4797_v34, 4  ;;  %v4798_v27 = vld [vmem:[%s4911_s28 + $0x50] sm:$0xff] }
  0xd3   : > { %7937 = vst [vmem:[#allocation42_spill] sm:$0xff] %v5352_v6  ;;  %v5362_v40 = vpop.permute.xlu0 %1166  ;;  %2069 = vperm.xlu1 %4769, %v7942_v32   ;;  %7945 = vst [vmem:[#allocation49_spill] sm:$0xff] %v5370_v14  ;;  %v2467_v32 = vshra.s32 %v5379_v15, 4  ;;  %v2470_v6 = vshra.s32 %v5399_v54, 4  ;;  %v5430_v11 = vand.u32 1, %v2469_v7  ;;  %v5432_v56 = vand.u32 1, %v2468_v53 }
  0xd4   : > { %7941 = vst [vmem:[#allocation46_spill] sm:$0xff] %v5362_v40  ;;  %7946 = vst [vmem:[#allocation50_spill] sm:$0xff] %v5372_v8  ;;  %2064 = vperm.xlu0 %4768, %v7947_v29   ;;  %v5395_v29 = vld [vmem:[%s4911_s28 + $0x28] sm:$0xff]  ;;  %v4796_v8 = vld [vmem:[%s4911_s28 + $0x40] sm:$0xff]  ;;  %v2476_v38 = vshra.s32 %v4798_v27, 4  ;;  %v7954_v7 = vcvt.s32.f32 %v5230_v16  ;;  %v2481_v53 = vshra.s32 %v5008_v57, 4  ;;  %v7964_v16 = vcvt.s32.f32 %v5238_v4 }
  0xd5   : > { %v2471_v47 = vshra.s32 %v5395_v29, 4  ;;  %v5418_v24 = vand.u32 1, %v2467_v32  ;;  %v2474_v14 = vshra.s32 %v4796_v8, 4  ;;  %v2482_v4 = vshra.s32 %v5024_v2, 4 }
  0xd6   : > { %v5402_v40 = vpop.permute.xlu1 %1181  ;;  %v5482_v57 = vand.u32 1, %v2481_v53  ;;  %v2487_v53 = vshra.s32 %v5039_v19, 4  ;;  %v7972_v2 = vcvt.s32.f32 %v5242_v13  ;;  %v2488_v13 = vshra.s32 %v5050_v26, 4 }
  0xd7   : > { %7948 = vst [vmem:[#allocation51_spill] sm:$0xff] %v5402_v40  ;;  %v5408_v28 = vpop.permute.xlu0 %1176  ;;  %2079 = vperm.xlu1 %4769, %v7950_v23   ;;  %v2473_v23 = vshra.s32 %v5423_v61, 4  ;;  %v2472_v40 = vshra.s32 %v5427_v22, 4  ;;  %v5434_v62 = vand.u32 1, %v2471_v47  ;;  %v2479_v47 = vshra.s32 %v4997_v48, 4 }
  0xd8   : > { %7949 = vst [vmem:[#allocation52_spill] sm:$0xff] %v5408_v28  ;;  %2074 = vperm.xlu0 %4768, %v7951_v18   ;;  %v5436_v18 = vand.u32 1, %v2470_v6  ;;  %v2475_v28 = vshra.s32 %v4795_v37, 4  ;;  %v2478_v6 = vshra.s32 %v5000_v49, 4  ;;  %v7955_v37 = vcvt.s32.f32 %v5232_v17  ;;  %7967 = vst [vmem:[#allocation65_spill] sm:$0xff] %v5482_v57 }
  0xd9   : > { %v5456_v8 = vand.u32 1, %v2473_v23  ;;  %v5472_v23 = vand.u32 1, %v2476_v38  ;;  %v5478_v48 = vand.u32 1, %v2479_v47  ;;  %v2485_v47 = vshra.s32 %v5030_v9, 4 }
  0xda   : > { %v5438_v32 = vpop.permute.xlu1 %1480  ;;  %v5466_v17 = vand.u32 1, %v2475_v28  ;;  %v5480_v49 = vand.u32 1, %v2478_v6  ;;  %v7969_v28 = vcvt.s32.f32 %v5240_v55  ;;  %v2484_v6 = vshra.s32 %v5034_v10, 4 }
  0xdb   : > { %7952 = vst [vmem:[#allocation53_spill] sm:$0xff] %v5438_v32  ;;  %v5444_v45 = vpop.permute.xlu0 %1475  ;;  %2249 = vperm.xlu1 %4769, %v7954_v7   ;;  %v2480_v32 = vshra.s32 %v5013_v58, 4  ;;  %7956 = vst [vmem:[#allocation55_spill] sm:$0xff] %v5456_v8  ;;  %v5468_v7 = vand.u32 1, %v2474_v14  ;;  %v2483_v14 = vshra.s32 %v5020_v0, 4  ;;  %v7973_v55 = vcvt.s32.f32 %v5244_v3 }
  0xdc   : > { %7953 = vst [vmem:[#allocation54_spill] sm:$0xff] %v5444_v45  ;;  %2244 = vperm.xlu0 %4768, %v7955_v37   ;;  %v5458_v45 = vand.u32 1, %v2472_v40  ;;  %7959 = vst [vmem:[#allocation58_spill] sm:$0xff] %v5466_v17  ;;  %v5470_v37 = vand.u32 1, %v2477_v46  ;;  %v5514_v38 = vand.u32 1, %v2482_v4  ;;  %v2489_v0 = vshra.s32 %v5047_v25, 4 }
  0xdd   : > { %7960 = vst [vmem:[#allocation59_spill] sm:$0xff] %v5468_v7  ;;  %7962 = vst [vmem:[#allocation61_spill] sm:$0xff] %v5472_v23  ;;  %v5484_v27 = vand.u32 1, %v2480_v32  ;;  %v2486_v32 = vshra.s32 %v5042_v20, 4  ;;  %v5520_v9 = vand.u32 1, %v2484_v6  ;;  %v5522_v10 = vand.u32 1, %v2487_v53 }
  0xde   : > { %7957 = vst [vmem:[#allocation56_spill] sm:$0xff] %v5458_v45  ;;  %v5464_v58 = vpop.permute.xlu1 %1490  ;;  %7961 = vst [vmem:[#allocation60_spill] sm:$0xff] %v5470_v37  ;;  %v2491_v3 = vshra.s32 %v5055_v35, 4  ;;  %v2493_v4 = vshra.s32 %v5063_v42, 4  ;;  %v2492_v25 = vshra.s32 %v5066_v44, 4  ;;  %v7982_v26 = vcvt.s32.f32 %v5260_v12 }
  0xdf   : > { %7958 = vst [vmem:[#allocation57_spill] sm:$0xff] %v5464_v58  ;;  %v5474_v40 = vpop.permute.xlu0 %1485  ;;  %2259 = vperm.xlu1 %4769, %v7964_v16   ;;  %7965 = vst [vmem:[#allocation63_spill] sm:$0xff] %v5478_v48  ;;  %v5524_v19 = vand.u32 1, %v2486_v32  ;;  %v2494_v6 = vshra.s32 %v5074_v52, 4  ;;  %v2497_v53 = vshra.s32 %v5079_v59, 4  ;;  %v2496_v32 = vshra.s32 %v5082_v60, 4 }
  0xe0   : > { %7963 = vst [vmem:[#allocation62_spill] sm:$0xff] %v5474_v40  ;;  %7966 = vst [vmem:[#allocation64_spill] sm:$0xff] %v5480_v49  ;;  %2254 = vperm.xlu0 %4768, %v7969_v28   ;;  %v5512_v28 = vand.u32 1, %v2483_v14  ;;  %v2490_v14 = vshra.s32 %v5058_v36, 4  ;;  %v7983_v35 = vcvt.s32.f32 %v5262_v41  ;;  %v5543_v42 = vand.u32 1, %v2489_v0 }
  0xe1   : > { %7968 = vst [vmem:[#allocation66_spill] sm:$0xff] %v5484_v27  ;;  %7975 = vst [vmem:[#allocation70_spill] sm:$0xff] %v5514_v38  ;;  %v5545_v44 = vand.u32 1, %v2488_v13  ;;  %v5547_v34 = vand.u32 1, %v2491_v3  ;;  %v5553_v59 = vand.u32 1, %v2493_v4  ;;  %v5562_v13 = vand.u32 1, %v2494_v6 }
  0xe2   : > { %v5496_v16 = vpop.permute.xlu1 %1500  ;;  %7974 = vst [vmem:[#allocation69_spill] sm:$0xff] %v5512_v28  ;;  %7977 = vst [vmem:[#allocation72_spill] sm:$0xff] %v5520_v9  ;;  %v5551_v52 = vand.u32 1, %v2490_v14  ;;  %v5572_v12 = vand.u32 1, %v2496_v32  ;;  %v2788_v4 = vshra.s32 %v5391_v5, 5  ;;  %v2791_v36 = vshra.s32 %v5395_v29, 5 }
  0xe3   : > { %7970 = vst [vmem:[#allocation67_spill] sm:$0xff] %v5496_v16  ;;  %v5502_v46 = vpop.permute.xlu0 %1495  ;;  %2269 = vperm.xlu1 %4769, %v7972_v2   ;;  %v5518_v2 = vand.u32 1, %v2485_v47  ;;  %7978 = vst [vmem:[#allocation73_spill] sm:$0xff] %v5522_v10  ;;  %v2495_v47 = vshra.s32 %v5071_v51, 4  ;;  %v5570_v51 = vand.u32 1, %v2497_v53  ;;  %v7999_v53 = vcvt.s32.f32 %v5274_v33  ;;  %v8020_v9 = vld [vmem:[#allocation5_spill] sm:$0xff] }
  0xe4   : > { %7971 = vst [vmem:[#allocation68_spill] sm:$0xff] %v5502_v46  ;;  %2264 = vperm.xlu0 %4768, %v7973_v55   ;;  %7979 = vst [vmem:[#allocation74_spill] sm:$0xff] %v5524_v19  ;;  %v8000_v41 = vcvt.s32.f32 %v5276_v21  ;;  %v8026_v28 = vld [vmem:[#allocation3_spill] sm:$0xff]  ;;  %v8069_v46 = vld [vmem:[#allocation25_spill] sm:$0xff] }
  0xe5   : > { %7976 = vst [vmem:[#allocation71_spill] sm:$0xff] %v5518_v2  ;;  %7984 = vst [vmem:[#allocation77_spill] sm:$0xff] %v5543_v42  ;;  %v5560_v0 = vand.u32 1, %v2495_v47 }
  0xe6   : > { %v5526_v20 = vpop.permute.xlu1 %1510  ;;  %7985 = vst [vmem:[#allocation78_spill] sm:$0xff] %v5545_v44  ;;  %7986 = vst [vmem:[#allocation79_spill] sm:$0xff] %v5547_v34 }
  0xe7   : > { %7980 = vst [vmem:[#allocation75_spill] sm:$0xff] %v5526_v20  ;;  %v5532_v55 = vpop.permute.xlu0 %1505  ;;  %2279 = vperm.xlu1 %4769, %v7982_v26   ;;  %7987 = vst [vmem:[#allocation80_spill] sm:$0xff] %v5551_v52  ;;  %v5558_v26 = vand.u32 1, %v2492_v25  ;;  %v7996_v25 = vcvt.s32.f32 %v5272_v39  ;;  %v2786_v39 = vshra.s32 %v5383_v63, 5 }
  0xe8   : > { %7981 = vst [vmem:[#allocation76_spill] sm:$0xff] %v5532_v55  ;;  %2274 = vperm.xlu0 %4768, %v7983_v35   ;;  %7988 = vst [vmem:[#allocation81_spill] sm:$0xff] %v5553_v59  ;;  %v7993_v35 = vcvt.s32.f32 %v5270_v1  ;;  %v2787_v1 = vshra.s32 %v5379_v15, 5  ;;  %v5631_v59 = vand.u32 1, %v2791_v36 }
  0xe9   : > { %7990 = vst [vmem:[#allocation83_spill] sm:$0xff] %v5558_v26  ;;  %7991 = vst [vmem:[#allocation84_spill] sm:$0xff] %v5560_v0  ;;  %v5612_v6 = vand.u32 1, %v2786_v39 }
  0xea   : > { %v5555_v60 = vpop.permute.xlu1 %1520  ;;  %7992 = vst [vmem:[#allocation85_spill] sm:$0xff] %v5562_v13  ;;  %7994 = vst [vmem:[#allocation86_spill] sm:$0xff] %v5570_v51  ;;  %v5606_v0 = vand.u32 1, %v2787_v1 }
  0xeb   : > { %7989 = vst [vmem:[#allocation82_spill] sm:$0xff] %v5555_v60  ;;  %v5564_v3 = vpop.permute.xlu0 %1515  ;;  %2289 = vperm.xlu1 %4769, %v7993_v35   ;;  %7995 = vst [vmem:[#allocation87_spill] sm:$0xff] %v5572_v12  ;;  %v5583_v35 = vld [vmem:[%s7751_s3] ss:$0 sm:$0xff] }
  0xec   : > { %2284 = vperm.xlu0 %4768, %v7996_v25   ;;  %v2789_v25 = vshra.s32 %v5387_v30, 5  ;;  %8001 = vst [vmem:[#allocation90_spill] sm:$0xff] %v5606_v0  ;;  %8002 = vst [vmem:[#allocation91_spill] sm:$0xff] %v5612_v6  ;;  %v8025_v60 = vld [vmem:[#allocation6_spill] sm:$0xff] }
  0xed   : > { %8008 = vst [vmem:[#allocation96_spill] sm:$0xff] %v5631_v59 }
  0xee   : > { %v5589_v47 = vpop.permute.xlu1 %1530  ;;  %v5614_v21 = vand.u32 1, %v2789_v25  ;;  %v8007_v25 = vcvt.s32.f32 %v5280_v43 }
  0xef   : > { %7997 = vst [vmem:[#allocation88_spill] sm:$0xff] %v5589_v47  ;;  %v5595_v14 = vpop.permute.xlu0 %1525  ;;  %2299 = vperm.xlu1 %4769, %v7999_v53   ;;  %v4726_v32 = vpop.f32.mrb[0].mxu0  ;;  %v5622_v53 = vand.u32 1, %v2788_v4  ;;  %v8010_v4 = vld [vmem:[#allocation27_spill] sm:$0xff] }
  0xf0   : > { %7998 = vst [vmem:[#allocation89_spill] sm:$0xff] %v5595_v14  ;;  %2294 = vperm.xlu0 %4768, %v8000_v41   ;;  %v489_v15 = vadd.f32 %v4726_v32, %v5583_v35  ;;  %v4742_v5 = vpop.f32.mrb[0].mxu1  ;;  %v480_v13 = vpop.f32.mrb[1].mxu0  ;;  %8003 = vst [vmem:[#allocation92_spill] sm:$0xff] %v5614_v21 }
  0xf1   : > { %v553_v63 = vadd.f32 %v4742_v5, %v5583_v35  ;;  %v481_v30 = vadd.f32 %v5583_v35, %v480_v13  ;;  %v544_v29 = vpop.f32.mrb[1].mxu1  ;;  %v4727_v12 = vpop.f32.mrb[2].mxu0  ;;  %8005 = vst [vmem:[#allocation94_spill] sm:$0xff] %v5622_v53  ;;  %v8053_v53 = vld [vmem:[#allocation37_spill] sm:$0xff] }
  0xf2   : > { %v5616_v41 = vmax.f32 %v489_v15, 0.0  ;;  %v545_v32 = vadd.f32 %v5583_v35, %v544_v29  ;;  %v5619_v1 = vpop.permute.xlu1 %1540  ;;  %v492_v33 = vadd.f32 %v4727_v12, %v5583_v35  ;;  %v4743_v51 = vpop.f32.mrb[2].mxu1 }
  0xf3   : > { %8004 = vst [vmem:[#allocation93_spill] sm:$0xff] %v5619_v1  ;;  %v5624_v5 = vmax.f32 %v553_v63, 0.0  ;;  %v607_v13 = vmax.f32 %v481_v30, 0.0  ;;  %v5626_v26 = vpop.permute.xlu0 %1535  ;;  %v556_v39 = vadd.f32 %v4743_v51, %v5583_v35  ;;  %2309 = vperm.xlu1 %4769, %v8007_v25   ;;  %v483_v15 = vpop.f32.mrb[3].mxu0  ;;  %v8011_v63 = vcvt.s32.f32 %v8010_v4  ;;  %v8014_v25 = vld [vmem:[#allocation28_spill] sm:$0xff] }
  0xf4   : > { %8006 = vst [vmem:[#allocation95_spill] sm:$0xff] %v5626_v26  ;;  %v931_v29 = vrot.slane %v5616_v41, 7  ;;  %v5634_v52 = vmax.f32 %v545_v32, 0.0  ;;  %v5636_v12 = vmax.f32 %v492_v33, 0.0  ;;  %v484_v30 = vadd.f32 %v5583_v35, %v483_v15  ;;  %v547_v34 = vpop.f32.mrb[3].mxu1  ;;  %v8016_v32 = vld [vmem:[#allocation4_spill] sm:$0xff] }
  0xf5   : > { %2304 = vperm.xlu0 %4768, %v8011_v63   ;;  %v963_v51 = vrot.slane %v5624_v5, 7  ;;  %v928_v1 = vrot.slane %v607_v13, 7  ;;  %v5642_v43 = vmax.f32 %v556_v39, 0.0  ;;  %v548_v36 = vadd.f32 %v5583_v35, %v547_v34  ;;  %v8018_v39 = vld [vmem:[#allocation29_spill] sm:$0xff] }
  0xf6   : > { %8009 = vst [vmem:[#allocation97_spill] sm:$0xff] %v5634_v52  ;;  %v4523_v33 = vpack.c.bf16 %v5636_v12, %v5616_v41  ;;  %v608_v4 = vmax.f32 %v484_v30, 0.0  ;;  %v5649_v63 = vpop.permute.xlu1 %1550  ;;  %v8015_v44 = vcvt.s32.f32 %v8014_v25  ;;  %v8055_v21 = vrot.slane %v5636_v12, 7 }
  0xf7   : > { %8012 = vst [vmem:[#allocation27_spill] sm:$0xff] %v5649_v63  ;;  %v1023_v15 = vsel %vm927_vm1, 0.0, %v928_v1  ;;  %v4563_v20 = vpack.c.bf16 %v5642_v43, %v5624_v5  ;;  %v5655_v55 = vmax.f32 %v548_v36, 0.0  ;;  %v5657_v34 = vpop.permute.xlu0 %1545  ;;  %v4730_v47 = vpop.f32.mrb[4].mxu0  ;;  %v8017_v63 = vrot.slane %v5636_v12, 7 }
  0xf8   : > { %8013 = vst [vmem:[#allocation98_spill] sm:$0xff] %v5657_v34  ;;  %2319 = vperm.xlu1 %4769, %v8015_v44   ;;  %v1184_v30 = vmul.f32 %v8016_v32, %v1023_v15  ;;  %4675 = vst [vmem:[%s4916_s6 + $0x8] sm:$0xff] %v4523_v33   ;;  %v4518_v14 = vpack.c.bf16 %v608_v4, %v607_v13  ;;  %v929_v19 = vrot.slane %v608_v4, 7  ;;  %v8019_v36 = vcvt.s32.f32 %v8018_v39  ;;  %v4746_v10 = vpop.f32.mrb[4].mxu1  ;;  %v496_v34 = vpop.f32.mrb[5].mxu0  ;;  %v8022_v39 = vld [vmem:[#allocation21_spill] sm:$0xff] }
  0xf9   : > { %v934_v42 = vsel %vm927_vm1, %v931_v29, %v8017_v63  ;;  %4683 = vst [vmem:[%s4916_s6 + $0x48] sm:$0xff] %v4563_v20   ;;  %v8021_v44 = vrot.slane %v5642_v43, 7  ;;  %v4558_v32 = vpack.c.bf16 %v5655_v55, %v5634_v52  ;;  %v961_v63 = vrot.slane %v5655_v55, 7  ;;  %v560_v15 = vpop.f32.mrb[5].mxu1  ;;  %v4731_v58 = vpop.f32.mrb[6].mxu0 }
  0xfa   : > { %2314 = vperm.xlu0 %4768, %v8019_v36   ;;  %v1187_v25 = vmul.f32 %v8020_v9, %v934_v42  ;;  %v5676_v40 = vmax.f32 %v607_v13, %v1184_v30  ;;  %4519 = vst [vmem:[%s4916_s6] sm:$0xff] %v4518_v14   ;;  %v930_v9 = vsel %vm927_vm1, %v928_v1, %v929_v19  ;;  %v5682_v42 = vpop.permute.xlu1 %1560  ;;  %v4747_v2 = vpop.f32.mrb[6].mxu1  ;;  %v8028_v30 = vld [vmem:[#allocation32_spill] sm:$0xff]  ;;  %v8030_v1 = vshra.s32 %v5399_v54, 5 }
  0xfb   : > { %v966_v33 = vsel %vm927_vm1, %v963_v51, %v8021_v44  ;;  %v932_v20 = vsel %vm927_vm1, %v929_v19, %v931_v29  ;;  %8023 = vst [vmem:[#allocation28_spill] sm:$0xff] %v5682_v42  ;;  %v1185_v38 = vmul.f32 %v8025_v60, %v930_v9  ;;  %4682 = vst [vmem:[%s4916_s6 + $0x40] sm:$0xff] %v4558_v32   ;;  %v5690_v13 = vpop.permute.xlu0 %1555  ;;  %v499_v14 = vpop.f32.mrb[7].mxu0  ;;  %v8034_v32 = vshra.s32 %v5423_v61, 5 }
  0xfc   : > { %v1203_v36 = vmul.f32 %v8022_v39, %v966_v33  ;;  %v5685_v44 = vmax.f32 %v5636_v12, %v1187_v25  ;;  %v1186_v27 = vmul.f32 %v8026_v28, %v932_v20  ;;  %8027 = vst [vmem:[#allocation29_spill] sm:$0xff] %v5690_v13  ;;  %v8029_v33 = vcvt.s32.f32 %v8028_v30  ;;  %v8032_v39 = vld [vmem:[#allocation33_spill] sm:$0xff]  ;;  %v563_v28 = vpop.f32.mrb[7].mxu1  ;;  %v8058_v12 = vld [vmem:[#allocation24_spill] sm:$0xff] }
  0xfd   : > { %v5696_v19 = vand.u32 1, %v8030_v1  ;;  %v964_v25 = vsel %vm927_vm1, %v961_v63, %v963_v51  ;;  %v8033_v60 = vcvt.s32.f32 %v8032_v39  ;;  %v5706_v9 = vand.u32 1, %v8034_v32 }
  0xfe   : > { %8024 = vst [vmem:[#allocation4_spill] sm:$0xff] %v5685_v44  ;;  %2329 = vperm.xlu1 %4769, %v8029_v33   ;;  %v5699_v29 = vmax.f32 %v5642_v43, %v1203_v36  ;;  %v8036_v20 = vshra.s32 %v5427_v22, 5  ;;  %v5712_v54 = vmax.f32 %v608_v4, %v1185_v38  ;;  %v5715_v33 = vmax.f32 %v5616_v41, %v1186_v27  ;;  %v5725_v32 = vpop.permute.xlu1 %1570  ;;  %v8041_v41 = vld [vmem:[#allocation22_spill] sm:$0xff]  ;;  %v8044_v27 = vld [vmem:[#allocation35_spill] sm:$0xff] }
  0xff   : > { %8031 = vst [vmem:[#allocation5_spill] sm:$0xff] %v5696_v19  ;;  %2324 = vperm.xlu0 %4768, %v8033_v60   ;;  %8035 = vst [vmem:[#allocation21_spill] sm:$0xff] %v5706_v9  ;;  %v8040_v39 = vrot.slane %v5634_v52, 7  ;;  %v505_v60 = vadd.f32 %v4730_v47, %v5583_v35  ;;  %v569_v22 = vadd.f32 %v4746_v10, %v5583_v35  ;;  %v5731_v51 = vpop.permute.xlu0 %1565  ;;  %v8042_v36 = vld [vmem:[#allocation34_spill] sm:$0xff]  ;;  %v8045_v6 = vcvt.s32.f32 %v8044_v27  ;;  %v8050_v27 = vld [vmem:[#allocation19_spill] sm:$0xff] }
 0x100   : > { %v5710_v30 = vand.u32 1, %v8036_v20  ;;  %8038 = vst [vmem:[#allocation3_spill] sm:$0xff] %v5712_v54  ;;  %8039 = vst [vmem:[#allocation32_spill] sm:$0xff] %v5715_v33  ;;  %v1378_v38 = vrot.slane %v5712_v54, 6  ;;  %v1202_v4 = vmul.f32 %v8041_v41, %v964_v25  ;;  %v497_v20 = vadd.f32 %v5583_v35, %v496_v34  ;;  %v5745_v25 = vpop.f32.mrb[8].mxu1 }
 0x101   : > { %v962_v61 = vsel %vm927_vm1, %v8040_v39, %v961_v63  ;;  %v8043_v1 = vcvt.s32.f32 %v8042_v36  ;;  %v5735_v63 = vpop.f32.mrb[8].mxu0  ;;  %v5737_v47 = vmax.f32 %v505_v60, 0.0  ;;  %v5739_v10 = vmax.f32 %v569_v22, 0.0  ;;  %v5759_v41 = vpop.f32.mrb[9].mxu1 }
 0x102   : > { %8037 = vst [vmem:[#allocation6_spill] sm:$0xff] %v5710_v30  ;;  %v561_v39 = vadd.f32 %v5583_v35, %v560_v15  ;;  %v508_v30 = vadd.f32 %v4731_v58, %v5583_v35  ;;  %v5747_v34 = vpop.f32.mrb[9].mxu0  ;;  %v8046_v36 = vrot.slane %v5676_v40, 6  ;;  %v8048_v60 = vrot.slane %v5715_v33, 6  ;;  %v5766_v52 = vpop.permute.xlu1 %1580 }
 0x103   : > { %2339 = vperm.xlu1 %4769, %v8043_v1   ;;  %2334 = vperm.xlu0 %4768, %v8045_v6   ;;  %v611_v15 = vmax.f32 %v497_v20, 0.0  ;;  %v5761_v58 = vpop.f32.mrb[10].mxu0  ;;  %v1201_v0 = vmul.f32 %v8050_v27, %v962_v61  ;;  %v572_v20 = vadd.f32 %v4747_v2, %v5583_v35  ;;  %v5775_v54 = vpop.permute.xlu0 %1575  ;;  %v8051_v6 = vld [vmem:[#allocation36_spill] sm:$0xff]  ;;  %v564_v33 = vadd.f32 %v5583_v35, %v563_v28 }
 0x104   : > { %v5752_v1 = vsel %vm1376_vm2, %v8046_v36, %v1378_v38  ;;  %v5757_v22 = vsel %vm1376_vm2, %v1378_v38, %v8048_v60  ;;  %v627_v13 = vmax.f32 %v561_v39, 0.0  ;;  %v5768_v36 = vpop.f32.mrb[10].mxu1  ;;  %v5771_v60 = vmax.f32 %v508_v30, 0.0  ;;  %v5779_v27 = vpop.f32.mrb[11].mxu0  ;;  %v8056_v28 = vld [vmem:[#allocation8_spill] sm:$0xff] }
 0x105   : > { %8047 = vst [vmem:[#allocation33_spill] sm:$0xff] %v5752_v1  ;;  %8049 = vst [vmem:[#allocation22_spill] sm:$0xff] %v5757_v22  ;;  %v935_v38 = vrot.slane %v611_v15, 7  ;;  %v500_v22 = vadd.f32 %v5583_v35, %v499_v14  ;;  %v8052_v61 = vcvt.s32.f32 %v8051_v6  ;;  %v971_v39 = vrot.slane %v5739_v10, 7  ;;  %v5788_v14 = vpop.f32.mrb[11].mxu1 }
 0x106   : > { %v967_v42 = vrot.slane %v627_v13, 7  ;;  %v5784_v30 = vmax.f32 %v5624_v5, %v1202_v4  ;;  %v8054_v2 = vcvt.s32.f32 %v8053_v53  ;;  %v5796_v49 = vmax.f32 %v572_v20, 0.0  ;;  %v5804_v26 = vpop.permute.xlu1 %1590 }
 0x107   : > { %2349 = vperm.xlu1 %4769, %v8052_v61   ;;  %v936_v6 = vsel %vm927_vm1, %v8055_v21, %v935_v38  ;;  %v4533_v61 = vpack.c.bf16 %v5771_v60, %v5737_v47  ;;  %v8057_v5 = vrot.slane %v5642_v43, 7  ;;  %v5802_v4 = vmax.f32 %v500_v22, 0.0  ;;  %v8059_v43 = vld [vmem:[#allocation40_spill] sm:$0xff]  ;;  %v5816_v22 = vpop.f32.mrb[12].mxu0 }
 0x108   : > { %2344 = vperm.xlu0 %4768, %v8054_v2   ;;  %v1188_v48 = vmul.f32 %v8056_v28, %v936_v6  ;;  %v628_v2 = vmax.f32 %v564_v33, 0.0  ;;  %v4573_v20 = vpack.c.bf16 %v5796_v49, %v5739_v10  ;;  %v5812_v28 = vpop.permute.xlu0 %1585  ;;  %v5819_v33 = vmax.f32 %v5655_v55, %v1201_v0  ;;  %v5827_v6 = vpop.f32.mrb[12].mxu1 }
 0x109   : > { %v968_v53 = vsel %vm927_vm1, %v8057_v5, %v967_v42  ;;  %4677 = vst [vmem:[%s4916_s6 + $0x18] sm:$0xff] %v4533_v61   ;;  %v8060_v5 = vcvt.s32.f32 %v8059_v43  ;;  %v4528_v61 = vpack.c.bf16 %v5802_v4, %v611_v15  ;;  %v5829_v37 = vpop.f32.mrb[13].mxu0  ;;  %v8065_v55 = vrot.slane %v5796_v49, 7 }
 0x10a   : > { %v1204_v23 = vmul.f32 %v8058_v12, %v968_v53  ;;  %8061 = vst [vmem:[#allocation34_spill] sm:$0xff] %v5819_v33  ;;  %v5821_v21 = vmax.f32 %v611_v15, %v1188_v48  ;;  %v8063_v12 = vld [vmem:[#allocation41_spill] sm:$0xff]  ;;  %4685 = vst [vmem:[%s4916_s6 + $0x58] sm:$0xff] %v4573_v20   ;;  %v4568_v0 = vpack.c.bf16 %v628_v2, %v627_v13  ;;  %v5837_v15 = vpop.f32.mrb[13].mxu1  ;;  %v5839_v53 = vpop.f32.mrb[14].mxu0  ;;  %v8068_v16 = vrot.slane %v5737_v47, 7 }
 0x10b   : > { %2359 = vperm.xlu1 %4769, %v8060_v5   ;;  %v8064_v57 = vcvt.s32.f32 %v8063_v12  ;;  %v974_v48 = vsel %vm927_vm1, %v971_v39, %v8065_v55  ;;  %v969_v5 = vrot.slane %v628_v2, 7  ;;  %8066 = vst [vmem:[#allocation19_spill] sm:$0xff] %v5839_v53  ;;  %v8067_v12 = vrot.slane %v5771_v60, 7  ;;  %4676 = vst [vmem:[%s4916_s6 + $0x10] sm:$0xff] %v4528_v61   ;;  %v5852_v55 = vpop.permute.xlu1 %1600  ;;  %v5854_v17 = vpop.f32.mrb[14].mxu1  ;;  %v8071_v53 = vld [vmem:[#allocation7_spill] sm:$0xff] }
 0x10c   : > { %8062 = vst [vmem:[#allocation35_spill] sm:$0xff] %v5821_v21  ;;  %v5831_v43 = vmax.f32 %v627_v13, %v1204_v23  ;;  %v1207_v20 = vmul.f32 %v8069_v46, %v974_v48  ;;  %v8070_v7 = vrot.slane %v5802_v4, 7  ;;  %4684 = vst [vmem:[%s4916_s6 + $0x50] sm:$0xff] %v4568_v0   ;;  %v5860_v1 = vpop.permute.xlu0 %1595  ;;  %v8072_v46 = vcvt.s32.f32 %v5354_v50  ;;  %v5878_v0 = vpop.f32.mrb[15].mxu1 }
 0x10d   : > { %2354 = vperm.xlu0 %4768, %v8064_v57   ;;  %v1384_v57 = vrot.slane %v5821_v21, 6  ;;  %v942_v23 = vsel %vm927_vm1, %v8068_v16, %v8067_v12  ;;  %v970_v21 = vsel %vm927_vm1, %v967_v42, %v969_v5  ;;  %v972_v8 = vsel %vm927_vm1, %v969_v5, %v971_v39  ;;  %v5864_v16 = vpop.f32.mrb[15].mxu0  ;;  %v8074_v39 = vld [vmem:[#allocation43_spill] sm:$0xff]  ;;  %v8076_v5 = vld [vmem:[#allocation9_spill] sm:$0xff] }
 0x10e   : > { %v938_v13 = vsel %vm927_vm1, %v935_v38, %v8070_v7  ;;  %v8073_v38 = vrot.slane %v5685_v44, 6  ;;  %v1414_v42 = vrot.slane %v5699_v29, 6  ;;  %v8075_v48 = vcvt.s32.f32 %v8074_v39  ;;  %v8079_v7 = vld [vmem:[#allocation44_spill] sm:$0xff] }
 0x10f   : > { %v1189_v45 = vmul.f32 %v8071_v53, %v938_v13  ;;  %2369 = vperm.xlu1 %4769, %v8072_v46   ;;  %v5873_v53 = vmax.f32 %v5796_v49, %v1207_v20  ;;  %v1191_v12 = vmul.f32 %v8076_v5, %v942_v23  ;;  %v8078_v46 = vld [vmem:[#allocation23_spill] sm:$0xff]  ;;  %v1412_v20 = vrot.slane %v5784_v30, 6  ;;  %v5893_v50 = vpop.permute.xlu1 %1610 }
 0x110   : > { %v5870_v61 = vsel %vm1376_vm2, %v8073_v38, %v1384_v57  ;;  %v1205_v38 = vmul.f32 %v8078_v46, %v970_v21  ;;  %v521_v39 = vadd.f32 %v5735_v63, %v5583_v35  ;;  %v513_v21 = vadd.f32 %v5583_v35, %v5747_v34  ;;  %v5902_v46 = vpop.permute.xlu0 %1605 }
 0x111   : > { %2364 = vperm.xlu0 %4768, %v8075_v48   ;;  %v5883_v13 = vmax.f32 %v5802_v4, %v1189_v45  ;;  %v585_v48 = vadd.f32 %v5745_v25, %v5583_v35  ;;  %v577_v5 = vadd.f32 %v5583_v35, %v5759_v41  ;;  %v8080_v59 = vcvt.s32.f32 %v8079_v7 }
 0x112   : > { %v5896_v45 = vmax.f32 %v628_v2, %v1205_v38  ;;  %v1415_v63 = vsel %vm1376_vm2, %v1412_v20, %v1414_v42  ;;  %v8081_v25 = vrot.slane %v5819_v33, 6  ;;  %v5910_v23 = vmax.f32 %v521_v39, 0.0  ;;  %v8082_v38 = vld [vmem:[#allocation45_spill] sm:$0xff] }
 0x113   : > { %8077 = vst [vmem:[#allocation36_spill] sm:$0xff] %v5883_v13  ;;  %2379 = vperm.xlu1 %4769, %v8080_v59   ;;  %v5912_v2 = vmax.f32 %v585_v48, 0.0  ;;  %v8083_v34 = vcvt.s32.f32 %v8082_v38  ;;  %v8084_v41 = vrot.slane %v5883_v13, 6  ;;  %v1652_v59 = vmul.f32 %v5725_v32, %v1415_v63  ;;  %v5934_v33 = vpop.permute.xlu1 %1620 }
 0x114   : > { %v1413_v9 = vsel %vm1376_vm2, %v8081_v25, %v1412_v20  ;;  %v5923_v44 = vmax.f32 %v513_v21, 0.0  ;;  %v8085_v20 = vrot.slane %v5676_v40, 6  ;;  %v5929_v48 = vmax.f32 %v5771_v60, %v1191_v12  ;;  %v8087_v25 = vld [vmem:[#allocation26_spill] sm:$0xff]  ;;  %8088 = vst [vmem:[#allocation8_spill] sm:$0xff] %v5934_v33  ;;  %v5944_v21 = vpop.permute.xlu0 %1615  ;;  %v8089_v12 = vld [vmem:[#allocation47_spill] sm:$0xff] }
 0x115   : > { %2374 = vperm.xlu0 %4768, %v8083_v34   ;;  %v5919_v19 = vsel %vm1376_vm2, %v1384_v57, %v8084_v41  ;;  %v1651_v7 = vmul.f32 %v5731_v51, %v1413_v9  ;;  %v1206_v38 = vmul.f32 %v8087_v25, %v972_v8  ;;  %v5932_v34 = vmax.f32 %v577_v5, 0.0  ;;  %v8091_v41 = vld [vmem:[#allocation48_spill] sm:$0xff] }
 0x116   : > { %v1472_v39 = vsel %vm1376_vm2, 0.0, %v8085_v20  ;;  %8086 = vst [vmem:[#allocation37_spill] sm:$0xff] %v5929_v48  ;;  %v5937_v57 = vmax.f32 %v5699_v29, %v1652_v59  ;;  %v7817_v51 = vrot.slane %v5923_v44, 7  ;;  %v1416_v32 = vrot.slane %v5831_v43, 6  ;;  %v8094_v5 = vld [vmem:[#allocation12_spill] sm:$0xff] }
 0x117   : > { %v5940_v9 = vmax.f32 %v5784_v30, %v1651_v7  ;;  %v8090_v63 = vcvt.s32.f32 %v8089_v12  ;;  %v7818_v8 = vrot.slane %v5932_v34, 7  ;;  %v524_v29 = vadd.f32 %v5761_v58, %v5583_v35  ;;  %v5974_v33 = vpop.permute.xlu1 %1630 }
 0x118   : > { %v588_v30 = vadd.f32 %v5768_v36, %v5583_v35  ;;  %v8092_v59 = vcvt.s32.f32 %v8091_v41  ;;  %v947_v7 = vrot.slane %v5910_v23, 7  ;;  %v8093_v25 = vrot.slane %v5771_v60, 7  ;;  %v8097_v60 = vld [vmem:[#allocation31_spill] sm:$0xff] }
 0x119   : > { %2389 = vperm.xlu1 %4769, %v8090_v63   ;;  %v1417_v63 = vsel %vm1376_vm2, %v1414_v42, %v1416_v32  ;;  %v8095_v36 = vrot.slane %v5796_v49, 7  ;;  %v8098_v49 = vld [vmem:[#allocation49_spill] sm:$0xff] }
 0x11a   : > { %2384 = vperm.xlu0 %4768, %v8092_v59   ;;  %v944_v12 = vsel %vm927_vm1, %v8093_v25, %v7817_v51  ;;  %v8096_v59 = vrot.slane %v5896_v45, 6  ;;  %v1653_v13 = vmul.f32 %v5775_v54, %v1417_v63  ;;  %v5978_v51 = vmax.f32 %v524_v29, 0.0  ;;  %v8100_v29 = vld [vmem:[#allocation50_spill] sm:$0xff] }
 0x11b   : > { %v1192_v58 = vmul.f32 %v8094_v5, %v944_v12  ;;  %v976_v41 = vsel %vm927_vm1, %v8095_v36, %v7818_v8  ;;  %v5980_v5 = vmax.f32 %v588_v30, 0.0  ;;  %v5982_v12 = vpop.permute.xlu0 %1625  ;;  %v8099_v36 = vcvt.s32.f32 %v8098_v49 }
 0x11c   : > { %v1419_v20 = vsel %vm1376_vm2, %v1416_v32, %v8096_v59  ;;  %v1208_v25 = vmul.f32 %v8097_v60, %v976_v41  ;;  %v5990_v54 = vmax.f32 %v5831_v43, %v1653_v13  ;;  %v516_v63 = vadd.f32 %v5583_v35, %v5779_v27  ;;  %v6012_v60 = vpop.permute.xlu1 %1929 }
 0x11d   : > { %v1654_v42 = vmul.f32 %v5766_v52, %v1419_v20  ;;  %2399 = vperm.xlu1 %4769, %v8099_v36   ;;  %v5987_v32 = vmax.f32 %v5923_v44, %v1192_v58  ;;  %v580_v52 = vadd.f32 %v5583_v35, %v5788_v14  ;;  %v8101_v30 = vcvt.s32.f32 %v8100_v29  ;;  %8102 = vst [vmem:[#allocation24_spill] sm:$0xff] %v6012_v60  ;;  %v8106_v60 = vld [vmem:[#allocation13_spill] sm:$0xff] }
 0x11e   : > { %v5999_v20 = vmax.f32 %v5932_v34, %v1208_v25  ;;  %v4543_v58 = vpack.c.bf16 %v5978_v51, %v5910_v23  ;;  %v7819_v43 = vrot.slane %v5978_v51, 7  ;;  %v7820_v27 = vrot.slane %v5929_v48, 6  ;;  %v8103_v25 = vld [vmem:[#allocation54_spill] sm:$0xff] }
 0x11f   : > { %2394 = vperm.xlu0 %4768, %v8101_v30   ;;  %v6002_v41 = vmax.f32 %v5896_v45, %v1654_v42  ;;  %v7821_v13 = vrot.slane %v5987_v32, 6  ;;  %v4583_v14 = vpack.c.bf16 %v5980_v5, %v5912_v2  ;;  %v1633_v42 = vmul.f32 %v8103_v25, %v1472_v39  ;;  %v6019_v30 = vpop.permute.xlu0 %1924  ;;  %v8116_v48 = vld [vmem:[#allocation14_spill] sm:$0xff] }
 0x120   : > { %4679 = vst [vmem:[%s4916_s6 + $0x28] sm:$0xff] %v4543_v58   ;;  %v950_v49 = vsel %vm927_vm1, %v947_v7, %v7819_v43  ;;  %v616_v36 = vmax.f32 %v516_v63, 0.0  ;;  %v632_v29 = vmax.f32 %v580_v52, 0.0  ;;  %8104 = vst [vmem:[#allocation40_spill] sm:$0xff] %v6019_v30  ;;  %v8105_v8 = vcvt.s32.f32 %v5418_v24  ;;  %v8110_v43 = vld [vmem:[#allocation38_spill] sm:$0xff] }
 0x121   : > { %v1393_v59 = vsel %vm1376_vm2, %v7820_v27, %v7821_v13  ;;  %v1195_v39 = vmul.f32 %v8106_v60, %v950_v49  ;;  %4687 = vst [vmem:[%s4916_s6 + $0x68] sm:$0xff] %v4583_v14   ;;  %v8107_v58 = vrot.slane %v5980_v5, 7  ;;  %v8108_v63 = vrot.slane %v5912_v2, 7 }
 0x122   : > { %2569 = vperm.xlu1 %4769, %v8105_v8   ;;  %v1238_v25 = vmax.f32 %v5739_v10, %v1206_v38  ;;  %v8109_v24 = vcvt.s32.f32 %v5420_v31  ;;  %v1641_v8 = vmul.f32 %v5564_v3, %v1393_v59  ;;  %v4538_v27 = vpack.c.bf16 %v616_v36, %v5923_v44 }
 0x123   : > { %v982_v52 = vsel %vm927_vm1, %v8108_v63, %v8107_v58  ;;  %v945_v60 = vrot.slane %v616_v36, 7  ;;  %v6042_v14 = vmax.f32 %v5978_v51, %v1195_v39  ;;  %v4578_v49 = vpack.c.bf16 %v632_v29, %v5932_v34  ;;  %v6045_v63 = vpop.permute.xlu1 %1939  ;;  %v6058_v59 = vpop.permute.xlu0 %1934 }
 0x124   : > { %2564 = vperm.xlu0 %4768, %v8109_v24   ;;  %v1211_v30 = vmul.f32 %v8110_v43, %v982_v52  ;;  %v977_v13 = vrot.slane %v632_v29, 7  ;;  %v1420_v58 = vrot.slane %v1238_v25, 6  ;;  %v6048_v31 = vmax.f32 %v5987_v32, %v1641_v8  ;;  %4678 = vst [vmem:[%s4916_s6 + $0x20] sm:$0xff] %v4538_v27   ;;  %8113 = vst [vmem:[#allocation25_spill] sm:$0xff] %v6058_v59  ;;  %v8115_v24 = vld [vmem:[#allocation11_spill] sm:$0xff]  ;;  %v8199_v59 = vld [vmem:[#allocation62_spill] sm:$0xff] }
 0x125   : > { %v8112_v10 = vrot.slane %v5923_v44, 7  ;;  %v948_v43 = vsel %vm927_vm1, %v945_v60, %v947_v7  ;;  %v8114_v39 = vcvt.s32.f32 %v5430_v11  ;;  %v6063_v52 = vmax.f32 %v5676_v40, %v1633_v42  ;;  %4686 = vst [vmem:[%s4916_s6 + $0x60] sm:$0xff] %v4578_v49  }
 0x126   : > { %8111 = vst [vmem:[#allocation41_spill] sm:$0xff] %v6048_v31  ;;  %v6051_v3 = vmax.f32 %v5980_v5, %v1211_v30  ;;  %v1194_v30 = vmul.f32 %v8116_v48, %v948_v43  ;;  %v8117_v27 = vrot.slane %v5932_v34, 7  ;;  %v8119_v7 = vrot.slane %v5912_v2, 7 }
 0x127   : > { %v946_v38 = vsel %vm927_vm1, %v8112_v10, %v945_v60  ;;  %2579 = vperm.xlu1 %4769, %v8114_v39   ;;  %v8118_v10 = vcvt.s32.f32 %v5432_v56  ;;  %v8120_v60 = vld [vmem:[#allocation30_spill] sm:$0xff]  ;;  %v1422_v40 = vrot.slane %v5873_v53, 6  ;;  %v8121_v42 = vrot.slane %v5896_v45, 6 }
 0x128   : > { %v1193_v8 = vmul.f32 %v8115_v24, %v946_v38  ;;  %v978_v44 = vsel %vm927_vm1, %v8117_v27, %v977_v13  ;;  %v980_v11 = vsel %vm927_vm1, %v977_v13, %v8119_v7  ;;  %v8122_v49 = vrot.slane %v5737_v47, 7  ;;  %v6092_v24 = vpop.permute.xlu1 %1949  ;;  %v8128_v7 = vld [vmem:[#allocation33_spill] sm:$0xff] }
 0x129   : > { %2574 = vperm.xlu0 %4768, %v8118_v10   ;;  %v1209_v39 = vmul.f32 %v8120_v60, %v978_v44  ;;  %v1421_v48 = vsel %vm1376_vm2, %v8121_v42, %v1420_v58  ;;  %v8123_v34 = vrot.slane %v5802_v4, 7  ;;  %v6089_v43 = vmax.f32 %v5910_v23, %v1194_v30  ;;  %v6101_v10 = vpop.permute.xlu0 %1944  ;;  %v8129_v60 = vld [vmem:[#allocation53_spill] sm:$0xff] }
 0x12a   : > { %v6086_v56 = vmax.f32 %v616_v36, %v1193_v8  ;;  %v1655_v13 = vmul.f32 %v5812_v28, %v1421_v48  ;;  %v1423_v45 = vsel %vm1376_vm2, %v1420_v58, %v1422_v40  ;;  %v537_v44 = vadd.f32 %v5816_v22, %v5583_v35  ;;  %8124 = vst [vmem:[#allocation7_spill] sm:$0xff] %v6101_v10 }
 0x12b   : > { %v940_v38 = vsel %vm927_vm1, %v8123_v34, %v8122_v49  ;;  %v6094_v27 = vmax.f32 %v632_v29, %v1209_v39  ;;  %v601_v4 = vadd.f32 %v5827_v6, %v5583_v35  ;;  %v8125_v36 = vcvt.s32.f32 %v5434_v62  ;;  %v8132_v49 = vld [vmem:[#allocation39_spill] sm:$0xff] }
 0x12c   : > { %v1394_v23 = vrot.slane %v6086_v56, 6  ;;  %v7824_v28 = vrot.slane %v6089_v43, 6  ;;  %v1656_v29 = vmul.f32 %v5804_v26, %v1423_v45  ;;  %v6108_v8 = vmax.f32 %v1238_v25, %v1655_v13 }
 0x12d   : > { %2589 = vperm.xlu1 %4769, %v8125_v36   ;;  %v8127_v58 = vcvt.s32.f32 %v5436_v18  ;;  %v6112_v22 = vmax.f32 %v537_v44, 0.0  ;;  %v6114_v30 = vmax.f32 %v601_v4, 0.0  ;;  %v529_v6 = vadd.f32 %v5583_v35, %v5829_v37  ;;  %v6137_v37 = vpop.permute.xlu1 %1959  ;;  %v6146_v45 = vpop.permute.xlu0 %1954  ;;  %v8134_v44 = vld [vmem:[#allocation55_spill] sm:$0xff] }
 0x12e   : > { %8126 = vst [vmem:[#allocation43_spill] sm:$0xff] %v6108_v8  ;;  %v593_v62 = vadd.f32 %v5583_v35, %v5837_v15  ;;  %v6122_v39 = vmul.f32 %v8129_v60, %v8128_v7  ;;  %v8130_v26 = vrot.slane %v5987_v32, 6  ;;  %v6132_v18 = vsel %vm1376_vm2, %v1394_v23, %v7824_v28  ;;  %v8131_v15 = vld [vmem:[#allocation10_spill] sm:$0xff]  ;;  %8133 = vst [vmem:[#allocation9_spill] sm:$0xff] %v6146_v45  ;;  %v8200_v8 = vld [vmem:[#allocation57_spill] sm:$0xff] }
 0x12f   : > { %2584 = vperm.xlu0 %4768, %v8127_v58   ;;  %v6135_v42 = vmax.f32 %v5873_v53, %v1656_v29  ;;  %v6140_v48 = vmul.f32 %v8131_v15, %v940_v38  ;;  %v1210_v34 = vmul.f32 %v8132_v49, %v980_v11  ;;  %v7828_v32 = vrot.slane %v6112_v22, 7  ;;  %v8136_v29 = vld [vmem:[#allocation56_spill] sm:$0xff] }
 0x130   : > { %v6127_v25 = vsel %vm1376_vm2, %v8130_v26, %v1394_v23  ;;  %v6144_v13 = vmax.f32 %v529_v6, 0.0  ;;  %v8135_v4 = vcvt.s32.f32 %v8134_v44  ;;  %v6151_v53 = vmax.f32 %v593_v62, 0.0  ;;  %v8138_v6 = vld [vmem:[#allocation19_spill] sm:$0xff] }
 0x131   : > { %v1424_v23 = vrot.slane %v5999_v20, 6  ;;  %v7825_v38 = vrot.slane %v6094_v27, 6  ;;  %v8137_v58 = vcvt.s32.f32 %v8136_v29  ;;  %v540_v7 = vadd.f32 %v8138_v6, %v5583_v35  ;;  %v6180_v28 = vpop.permute.xlu0 %1964 }
 0x132   : > { %2599 = vperm.xlu1 %4769, %v8135_v4   ;;  %v951_v11 = vrot.slane %v6144_v13, 7  ;;  %v604_v60 = vadd.f32 %v5854_v17, %v5583_v35  ;;  %v532_v26 = vadd.f32 %v5583_v35, %v5864_v16  ;;  %v7826_v62 = vrot.slane %v6151_v53, 7  ;;  %v6171_v4 = vpop.permute.xlu1 %1969  ;;  %8140 = vst [vmem:[#allocation23_spill] sm:$0xff] %v6180_v28 }
 0x133   : > { %2594 = vperm.xlu0 %4768, %v8137_v58   ;;  %v1427_v15 = vsel %vm1376_vm2, %v1424_v23, %v7825_v38  ;;  %v1425_v49 = vsel %vm1376_vm2, %v1422_v40, %v1424_v23  ;;  %v596_v44 = vadd.f32 %v5583_v35, %v5878_v0  ;;  %v8139_v29 = vrot.slane %v5978_v51, 7  ;;  %v8141_v38 = vld [vmem:[#allocation58_spill] sm:$0xff]  ;;  %v8143_v40 = vld [vmem:[#allocation16_spill] sm:$0xff] }
 0x134   : > { %v1658_v58 = vmul.f32 %v5852_v55, %v1427_v15  ;;  %v1657_v16 = vmul.f32 %v5860_v1, %v1425_v49  ;;  %v6178_v6 = vmax.f32 %v540_v7, 0.0  ;;  %v8142_v36 = vcvt.s32.f32 %v8141_v38  ;;  %v8145_v15 = vld [vmem:[#allocation59_spill] sm:$0xff]  ;;  %v8147_v7 = vld [vmem:[#allocation46_spill] sm:$0xff] }
 0x135   : > { %v952_v17 = vsel %vm927_vm1, %v8139_v29, %v951_v11  ;;  %v8144_v35 = vrot.slane %v5980_v5, 7  ;;  %v638_v51 = vmax.f32 %v604_v60, 0.0  ;;  %v620_v55 = vmax.f32 %v532_v26, 0.0 }
 0x136   : > { %2609 = vperm.xlu1 %4769, %v8142_v36   ;;  %v1196_v23 = vmul.f32 %v8143_v40, %v952_v17  ;;  %v8146_v1 = vcvt.s32.f32 %v8145_v15  ;;  %v6194_v29 = vmax.f32 %v6094_v27, %v1658_v58  ;;  %v6197_v36 = vmax.f32 %v5999_v20, %v1657_v16  ;;  %v6206_v40 = vpop.permute.xlu1 %1979  ;;  %v8148_v58 = vld [vmem:[#allocation68_spill] sm:$0xff]  ;;  %v8149_v20 = vld [vmem:[#allocation67_spill] sm:$0xff]  ;;  %v6221_v15 = vpop.permute.xlu0 %1974 }
 0x137   : > { %v984_v0 = vsel %vm927_vm1, %v8144_v35, %v7826_v62  ;;  %v4553_v38 = vpack.c.bf16 %v6178_v6, %v6112_v22  ;;  %v7827_v60 = vrot.slane %v6178_v6, 7  ;;  %v4593_v26 = vpack.c.bf16 %v638_v51, %v6114_v30  ;;  %8150 = vst [vmem:[#allocation44_spill] sm:$0xff] %v6221_v15  ;;  %v8157_v62 = vld [vmem:[#allocation51_spill] sm:$0xff] }
 0x138   : > { %2604 = vperm.xlu0 %4768, %v8146_v1   ;;  %v1212_v49 = vmul.f32 %v8147_v7, %v984_v0  ;;  %v6202_v5 = vmax.f32 %v6144_v13, %v1196_v23  ;;  %v989_v17 = vrot.slane %v638_v51, 7  ;;  %v6210_v35 = vmul.f32 %v8148_v58, %v5870_v61  ;;  %v8151_v1 = vld [vmem:[#allocation60_spill] sm:$0xff] }
 0x139   : > { %v6214_v16 = vmul.f32 %v8149_v20, %v5919_v19  ;;  %4681 = vst [vmem:[%s4916_s6 + $0x38] sm:$0xff] %v4553_v38   ;;  %v4548_v23 = vpack.c.bf16 %v620_v55, %v6144_v13  ;;  %v8152_v7 = vcvt.s32.f32 %v8151_v1  ;;  %v958_v19 = vsel %vm927_vm1, %v7828_v32, %v7827_v60  ;;  %4689 = vst [vmem:[%s4916_s6 + $0x78] sm:$0xff] %v4593_v26   ;;  %v8154_v38 = vld [vmem:[#allocation61_spill] sm:$0xff] }
 0x13a   : > { %v6217_v0 = vmax.f32 %v6151_v53, %v1212_v49  ;;  %v8153_v49 = vrot.slane %v6114_v30, 7  ;;  %v8155_v58 = vcvt.s32.f32 %v8154_v38  ;;  %v8156_v1 = vld [vmem:[#allocation17_spill] sm:$0xff]  ;;  %v953_v15 = vrot.slane %v620_v55, 7  ;;  %v6249_v38 = vpop.permute.xlu1 %1989 }
 0x13b   : > { %2619 = vperm.xlu1 %4769, %v8152_v7   ;;  %v1199_v7 = vmul.f32 %v8156_v1, %v958_v19  ;;  %4680 = vst [vmem:[%s4916_s6 + $0x30] sm:$0xff] %v4548_v23   ;;  %v8158_v28 = vrot.slane %v6202_v5, 6  ;;  %v8159_v60 = vrot.slane %v6042_v14, 6  ;;  %v636_v32 = vmax.f32 %v596_v44, 0.0 }
 0x13c   : > { %v990_v13 = vsel %vm927_vm1, %v8153_v49, %v989_v17  ;;  %2614 = vperm.xlu0 %4768, %v8155_v58   ;;  %v1242_v17 = vmax.f32 %v5912_v2, %v1210_v34  ;;  %v1430_v49 = vrot.slane %v6051_v3, 6  ;;  %v8160_v58 = vld [vmem:[#allocation95_spill] sm:$0xff]  ;;  %v954_v23 = vsel %vm927_vm1, %v951_v11, %v953_v15 }
 0x13d   : > { %v1215_v61 = vmul.f32 %v8157_v62, %v990_v13  ;;  %v1401_v26 = vsel %vm1376_vm2, %v8159_v60, %v8158_v28  ;;  %v6253_v19 = vmax.f32 %v6178_v6, %v1199_v7  ;;  %v6258_v13 = vpop.permute.xlu0 %1984  ;;  %v8162_v28 = vld [vmem:[#allocation63_spill] sm:$0xff]  ;;  %v8164_v2 = vrot.slane %v6112_v22, 7 }
 0x13e   : > { %v1645_v20 = vmul.f32 %v8160_v58, %v1401_v26  ;;  %8161 = vst [vmem:[#allocation45_spill] sm:$0xff] %v6258_v13  ;;  %v8163_v44 = vcvt.s32.f32 %v8162_v28  ;;  %v8165_v60 = vld [vmem:[#allocation15_spill] sm:$0xff]  ;;  %v4588_v26 = vpack.c.bf16 %v636_v32, %v6151_v53  ;;  %v985_v7 = vrot.slane %v636_v32, 7  ;;  %v8166_v58 = vld [vmem:[#allocation64_spill] sm:$0xff] }
 0x13f   : > { %v6255_v62 = vmax.f32 %v638_v51, %v1215_v61  ;;  %v956_v34 = vsel %vm927_vm1, %v953_v15, %v8164_v2  ;;  %v1197_v1 = vmul.f32 %v8165_v60, %v954_v23  ;;  %v8167_v45 = vcvt.s32.f32 %v8166_v58  ;;  %v8168_v61 = vld [vmem:[#allocation18_spill] sm:$0xff]  ;;  %v6284_v58 = vpop.permute.xlu1 %1999 }
 0x140   : > { %2629 = vperm.xlu1 %4769, %v8163_v44   ;;  %v6271_v11 = vmax.f32 %v6202_v5, %v1645_v20  ;;  %v1198_v28 = vmul.f32 %v8168_v61, %v956_v34  ;;  %v1428_v44 = vrot.slane %v1242_v17, 6  ;;  %4688 = vst [vmem:[%s4916_s6 + $0x70] sm:$0xff] %v4588_v26   ;;  %v8169_v15 = vrot.slane %v6151_v53, 7  ;;  %8171 = vst [vmem:[#allocation26_spill] sm:$0xff] %v6284_v58  ;;  %v8172_v34 = vld [vmem:[#allocation42_spill] sm:$0xff] }
 0x141   : > { %2624 = vperm.xlu0 %4768, %v8167_v45   ;;  %v6274_v13 = vmax.f32 %v620_v55, %v1197_v1  ;;  %v8170_v2 = vrot.slane %v6114_v30, 7  ;;  %v1432_v60 = vrot.slane %v6217_v0, 6  ;;  %v8173_v55 = vld [vmem:[#allocation52_spill] sm:$0xff]  ;;  %v6292_v53 = vpop.permute.xlu0 %1994  ;;  %v8177_v10 = vrot.slane %v6094_v27, 6 }
 0x142   : > { %v986_v23 = vsel %vm927_vm1, %v8169_v15, %v985_v7  ;;  %v6287_v20 = vmax.f32 %v6112_v22, %v1198_v28  ;;  %v1431_v26 = vsel %vm1376_vm2, %v1428_v44, %v1430_v49  ;;  %8174 = vst [vmem:[#allocation47_spill] sm:$0xff] %v6292_v53  ;;  %v8175_v15 = vld [vmem:[#allocation65_spill] sm:$0xff]  ;;  %v1438_v27 = vrot.slane %v6255_v62, 6 }
 0x143   : > { %v988_v45 = vsel %vm927_vm1, %v985_v7, %v8170_v2  ;;  %v1213_v61 = vmul.f32 %v8172_v34, %v986_v23  ;;  %v8176_v51 = vcvt.s32.f32 %v8175_v15  ;;  %v7830_v7 = vrot.slane %v6274_v13, 6  ;;  %v8178_v23 = vld [vmem:[#allocation66_spill] sm:$0xff] }
 0x144   : > { %v1214_v1 = vmul.f32 %v8173_v55, %v988_v45  ;;  %v1660_v2 = vmul.f32 %v5893_v50, %v1431_v26  ;;  %v1429_v22 = vsel %vm1376_vm2, %v8177_v10, %v1428_v44  ;;  %v1433_v28 = vsel %vm1376_vm2, %v1430_v49, %v1432_v60  ;;  %v8180_v10 = vld [vmem:[#allocation3_spill] sm:$0xff]  ;;  %v6314_v44 = vpop.permute.xlu1 %2009 }
 0x145   : > { %2639 = vperm.xlu1 %4769, %v8176_v51   ;;  %v8179_v34 = vcvt.s32.f32 %v8178_v23  ;;  %v7829_v45 = vrot.slane %v6287_v20, 6  ;;  %v1245_v55 = vmax.f32 %v636_v32, %v1213_v61  ;;  %v1659_v53 = vmul.f32 %v5902_v46, %v1429_v22  ;;  %8181 = vst [vmem:[#allocation48_spill] sm:$0xff] %v6314_v44  ;;  %v8183_v61 = vld [vmem:[#allocation69_spill] sm:$0xff] }
 0x146   : > { %v1661_v51 = vmul.f32 %v5944_v21, %v1433_v28  ;;  %v6308_v15 = vmax.f32 %v6051_v3, %v1660_v2  ;;  %v1246_v50 = vmax.f32 %v6114_v30, %v1214_v1  ;;  %v1666_v49 = vmax.f32 %v8180_v10, %v6122_v39  ;;  %v6328_v30 = vpop.permute.xlu0 %2004  ;;  %v8185_v28 = vld [vmem:[#allocation70_spill] sm:$0xff]  ;;  %v8189_v10 = vld [vmem:[#allocation32_spill] sm:$0xff] }
 0x147   : > { %2634 = vperm.xlu0 %4768, %v8179_v34   ;;  %v6321_v46 = vsel %vm1376_vm2, %v7830_v7, %v7829_v45  ;;  %v6323_v21 = vmax.f32 %v1242_v17, %v1659_v53  ;;  %v1434_v3 = vrot.slane %v1245_v55, 6  ;;  %8182 = vst [vmem:[#allocation12_spill] sm:$0xff] %v6328_v30  ;;  %v8184_v1 = vcvt.s32.f32 %v8183_v61  ;;  %v8187_v34 = vld [vmem:[#allocation4_spill] sm:$0xff] }
 0x148   : > { %v6326_v32 = vmax.f32 %v6217_v0, %v1661_v51  ;;  %v1436_v26 = vrot.slane %v1246_v50, 6  ;;  %v1827_v22 = vrot.slane %v1666_v49, 4  ;;  %v8186_v23 = vcvt.s32.f32 %v8185_v28  ;;  %v8191_v39 = vld [vmem:[#allocation8_spill] sm:$0xff]  ;;  %v6350_v17 = vpop.permute.xlu1 %2019 }
 0x149   : > { %2649 = vperm.xlu1 %4769, %v8184_v1   ;;  %v1435_v0 = vsel %vm1376_vm2, %v1432_v60, %v1434_v3  ;;  %v8188_v51 = vrot.slane %v8187_v34, 6  ;;  %v8190_v61 = vrot.slane %v8189_v10, 6  ;;  %v8192_v28 = vrot.slane %v6063_v52, 4  ;;  %v8193_v60 = vld [vmem:[#allocation82_spill] sm:$0xff] }
 0x14a   : > { %v1662_v45 = vmul.f32 %v8191_v39, %v1435_v0  ;;  %v1439_v7 = vsel %vm1376_vm2, %v1436_v26, %v1438_v27  ;;  %v1437_v2 = vsel %vm1376_vm2, %v1434_v3, %v1436_v26  ;;  %v1642_v53 = vmul.f32 %v8193_v60, %v6127_v25  ;;  %v6357_v39 = vpop.permute.xlu0 %2014  ;;  %v8196_v27 = vld [vmem:[#allocation71_spill] sm:$0xff]  ;;  %v8201_v60 = vld [vmem:[#allocation72_spill] sm:$0xff] }
 0x14b   : > { %2644 = vperm.xlu0 %4768, %v8186_v23   ;;  %v1383_v1 = vsel %vm1376_vm2, %v8190_v61, %v8188_v51  ;;  %v1828_v23 = vsel %vm1825_vm3, %v8192_v28, %v1827_v22  ;;  %v1664_v30 = vmul.f32 %v5974_v33, %v1439_v7  ;;  %v1663_v44 = vmul.f32 %v5982_v12, %v1437_v2  ;;  %v8194_v51 = vld [vmem:[#allocation24_spill] sm:$0xff]  ;;  %v8198_v28 = vld [vmem:[#allocation22_spill] sm:$0xff] }
 0x14c   : > { %v2083_v61 = vmul.f32 %v8194_v51, %v1828_v23  ;;  %8195 = vst [vmem:[#allocation31_spill] sm:$0xff] %v6357_v39  ;;  %v8197_v0 = vcvt.s32.f32 %v8196_v27  ;;  %v6362_v26 = vmax.f32 %v1245_v55, %v1662_v45  ;;  %v1635_v58 = vmul.f32 %v8199_v59, %v8198_v28  ;;  %v8204_v23 = vld [vmem:[#allocation35_spill] sm:$0xff]  ;;  %v8205_v45 = vld [vmem:[#allocation97_spill] sm:$0xff] }
 0x14d   : > { %v1636_v25 = vmul.f32 %v8200_v8, %v1383_v1  ;;  %v8202_v33 = vcvt.s32.f32 %v8201_v60  ;;  %v6370_v12 = vmax.f32 %v6255_v62, %v1664_v30  ;;  %v6372_v7 = vmax.f32 %v1246_v50, %v1663_v44  ;;  %v8208_v50 = vld [vmem:[#allocation36_spill] sm:$0xff] }
 0x14e   : > { %2659 = vperm.xlu1 %4769, %v8197_v0   ;;  %v6374_v2 = vmax.f32 %v1666_v49, %v2083_v61  ;;  %v6378_v51 = vmax.f32 %v8204_v23, %v6210_v35  ;;  %v8206_v55 = vrot.slane %v8205_v45, 7  ;;  %v8207_v59 = vrot.slane %v6178_v6, 7  ;;  %v6393_v49 = vpop.permute.xlu1 %2029  ;;  %v6400_v27 = vpop.permute.xlu0 %2024 }
 0x14f   : > { %2654 = vperm.xlu0 %4768, %v8202_v33   ;;  %8203 = vst [vmem:[#allocation49_spill] sm:$0xff] %v6372_v7  ;;  %v6386_v1 = vmax.f32 %v8189_v10, %v1635_v58  ;;  %v1668_v62 = vmax.f32 %v8187_v34, %v1636_v25  ;;  %v6391_v44 = vmax.f32 %v8208_v50, %v6214_v16  ;;  %8209 = vst [vmem:[#allocation50_spill] sm:$0xff] %v6400_v27  ;;  %v8210_v58 = vld [vmem:[#allocation73_spill] sm:$0xff]  ;;  %v8212_v25 = vld [vmem:[#allocation74_spill] sm:$0xff] }
 0x150   : > { %v960_v8 = vsel %vm927_vm1, %v8207_v59, %v8206_v55  ;;  %v1833_v61 = vrot.slane %v6378_v51, 4  ;;  %v1222_v6 = vmax.f32 %v5737_v47, %v6140_v48  ;;  %v8211_v10 = vcvt.s32.f32 %v8210_v58  ;;  %v8214_v33 = vld [vmem:[#allocation20_spill] sm:$0xff]  ;;  %v8217_v58 = vld [vmem:[#allocation89_spill] sm:$0xff] }
 0x151   : > { %v1829_v34 = vrot.slane %v6386_v1, 4  ;;  %v1831_v16 = vrot.slane %v1668_v62, 4  ;;  %v1835_v0 = vrot.slane %v6391_v44, 4  ;;  %v1674_v28 = vmax.f32 %v6086_v56, %v1642_v53  ;;  %v8224_v27 = vld [vmem:[#allocation88_spill] sm:$0xff] }
 0x152   : > { %2669 = vperm.xlu1 %4769, %v8211_v10   ;;  %v8213_v60 = vcvt.s32.f32 %v8212_v25  ;;  %v6410_v23 = vmul.f32 %v8214_v33, %v960_v8  ;;  %v1388_v55 = vrot.slane %v1222_v6, 6  ;;  %v8215_v47 = vrot.slane %v6042_v14, 6  ;;  %v6427_v25 = vpop.permute.xlu1 %2039 }
 0x153   : > { %v8216_v48 = vrot.slane %v6089_v43, 6  ;;  %v1643_v10 = vmul.f32 %v8217_v58, %v6132_v18  ;;  %v1832_v30 = vsel %vm1825_vm3, %v1829_v34, %v1831_v16  ;;  %v6421_v56 = vsel %vm1825_vm3, %v1827_v22, %v1829_v34  ;;  %v8219_v58 = vld [vmem:[#allocation77_spill] sm:$0xff] }
 0x154   : > { %2664 = vperm.xlu0 %4768, %v8213_v60   ;;  %v1836_v53 = vsel %vm1825_vm3, %v1833_v61, %v1835_v0  ;;  %v6425_v8 = vsel %vm1825_vm3, %v1831_v16, %v1833_v61  ;;  %v2085_v33 = vmul.f32 %v6045_v63, %v1832_v30  ;;  %v1841_v18 = vrot.slane %v6048_v31, 4  ;;  %v8222_v16 = vld [vmem:[#allocation37_spill] sm:$0xff]  ;;  %v8225_v30 = vld [vmem:[#allocation78_spill] sm:$0xff] }
 0x155   : > { %v1399_v59 = vsel %vm1376_vm2, %v8216_v48, %v8215_v47  ;;  %v2087_v47 = vmul.f32 %v6092_v24, %v1836_v53  ;;  %v6433_v48 = vpop.permute.xlu0 %2034  ;;  %v8220_v22 = vcvt.s32.f32 %v8219_v58  ;;  %v8221_v34 = vrot.slane %v8208_v50, 6  ;;  %v8227_v58 = vld [vmem:[#allocation76_spill] sm:$0xff]  ;;  %v8228_v50 = vld [vmem:[#allocation75_spill] sm:$0xff] }
 0x156   : > { %8218 = vst [vmem:[#allocation54_spill] sm:$0xff] %v6433_v48  ;;  %v8223_v35 = vrot.slane %v8222_v16, 6  ;;  %v1843_v60 = vrot.slane %v1674_v28, 4  ;;  %v1644_v63 = vmul.f32 %v8224_v27, %v1399_v59  ;;  %v8226_v24 = vcvt.s32.f32 %v8225_v30  ;;  %v6463_v59 = vpop.permute.xlu1 %2049 }
 0x157   : > { %2679 = vperm.xlu1 %4769, %v8220_v22   ;;  %v1389_v61 = vsel %vm1376_vm2, %v8221_v34, %v1388_v55  ;;  %v6446_v53 = vmax.f32 %v1668_v62, %v2085_v33  ;;  %v6449_v48 = vmax.f32 %v6391_v44, %v2087_v47  ;;  %v6455_v31 = vmax.f32 %v6089_v43, %v1643_v10  ;;  %v8231_v47 = vld [vmem:[#allocation93_spill] sm:$0xff]  ;;  %v8232_v10 = vld [vmem:[#allocation79_spill] sm:$0xff] }
 0x158   : > { %v1391_v3 = vsel %vm1376_vm2, %v1388_v55, %v8223_v35  ;;  %2674 = vperm.xlu0 %4768, %v8226_v24   ;;  %v1639_v22 = vmul.f32 %v8227_v58, %v1389_v61  ;;  %v1844_v34 = vsel %vm1825_vm3, %v1841_v18, %v1843_v60  ;;  %v1676_v35 = vmax.f32 %v6042_v14, %v1644_v63 }
 0x159   : > { %v1640_v39 = vmul.f32 %v8228_v50, %v1391_v3  ;;  %v8229_v27 = vrot.slane %v6274_v13, 6  ;;  %v8230_v55 = vrot.slane %v6202_v5, 6  ;;  %v2091_v3 = vmul.f32 %v6171_v4, %v1844_v34  ;;  %v6470_v43 = vpop.permute.xlu0 %2044 }
 0x15a   : > { %v6465_v44 = vmax.f32 %v1222_v6, %v1639_v22  ;;  %v8233_v14 = vcvt.s32.f32 %v8232_v10  ;;  %v1845_v63 = vrot.slane %v6455_v31, 4  ;;  %v1847_v5 = vrot.slane %v1676_v35, 4 }
 0x15b   : > { %v1403_v62 = vsel %vm1376_vm2, %v8230_v55, %v8229_v27  ;;  %v1672_v33 = vmax.f32 %v8222_v16, %v1640_v39  ;;  %v1849_v30 = vrot.slane %v6271_v11, 4  ;;  %v8234_v24 = vrot.slane %v6253_v19, 6  ;;  %v8236_v16 = vld [vmem:[#allocation80_spill] sm:$0xff] }
 0x15c   : > { %v1646_v61 = vmul.f32 %v8231_v47, %v1403_v62  ;;  %2689 = vperm.xlu1 %4769, %v8233_v14   ;;  %v8235_v6 = vrot.slane %v6287_v20, 6  ;;  %v8237_v4 = vcvt.s32.f32 %v8236_v16  ;;  %v1837_v58 = vrot.slane %v6465_v44, 4  ;;  %v8238_v47 = vld [vmem:[#allocation98_spill] sm:$0xff]  ;;  %v6496_v14 = vpop.permute.xlu1 %2059 }
 0x15d   : > { %v1839_v22 = vrot.slane %v1672_v33, 4  ;;  %v6484_v50 = vmax.f32 %v1674_v28, %v2091_v3  ;;  %v1848_v27 = vsel %vm1825_vm3, %v1845_v63, %v1847_v5  ;;  %v6489_v55 = vsel %vm1825_vm3, %v1843_v60, %v1845_v63  ;;  %8239 = vst [vmem:[#allocation13_spill] sm:$0xff] %v6496_v14  ;;  %v6506_v60 = vpop.permute.xlu0 %2054 }
 0x15e   : > { %v1407_v39 = vsel %vm1376_vm2, %v8235_v6, %v8234_v24  ;;  %2684 = vperm.xlu0 %4768, %v8237_v4   ;;  %v1678_v34 = vmax.f32 %v6274_v13, %v1646_v61  ;;  %v6492_v62 = vsel %vm1825_vm3, %v1847_v5, %v1849_v30  ;;  %v1647_v10 = vmul.f32 %v8238_v47, %v6321_v46  ;;  %v8241_v61 = vld [vmem:[#allocation81_spill] sm:$0xff]  ;;  %v8264_v46 = vld [vmem:[#allocation34_spill] sm:$0xff] }
 0x15f   : > { %v1840_v24 = vsel %vm1825_vm3, %v1837_v58, %v1839_v22  ;;  %v6500_v28 = vsel %vm1825_vm3, %v1835_v0, %v1837_v58  ;;  %v6503_v13 = vsel %vm1825_vm3, %v1839_v22, %v1841_v18  ;;  %v2093_v3 = vmul.f32 %v6206_v40, %v1848_v27  ;;  %8240 = vst [vmem:[#allocation38_spill] sm:$0xff] %v6506_v60  ;;  %v8243_v0 = vld [vmem:[#allocation83_spill] sm:$0xff] }
 0x160   : > { %v8242_v63 = vcvt.s32.f32 %v8241_v61  ;;  %v2089_v16 = vmul.f32 %v6137_v37, %v1840_v24  ;;  %v8244_v4 = vcvt.s32.f32 %v8243_v0  ;;  %v8245_v18 = vrot.slane %v6063_v52, 4  ;;  %v8246_v27 = vld [vmem:[#allocation27_spill] sm:$0xff] }
 0x161   : > { %v6519_v58 = vmax.f32 %v1676_v35, %v2093_v3  ;;  %v1851_v22 = vrot.slane %v1678_v34, 4  ;;  %v1648_v47 = vmul.f32 %v8246_v27, %v1407_v39  ;;  %v1232_v37 = vmax.f32 %v8205_v45, %v6410_v23  ;;  %v6542_v45 = vpop.permute.xlu0 %2064  ;;  %v8252_v23 = vld [vmem:[#allocation84_spill] sm:$0xff]  ;;  %v8272_v60 = vld [vmem:[#allocation87_spill] sm:$0xff] }
 0x162   : > { %2699 = vperm.xlu1 %4769, %v8242_v63   ;;  %2694 = vperm.xlu0 %4768, %v8244_v4   ;;  %v1921_v40 = vsel %vm1825_vm3, 0.0, %v8245_v18  ;;  %v6522_v61 = vmax.f32 %v1672_v33, %v2089_v16  ;;  %v6525_v63 = vmax.f32 %v6287_v20, %v1647_v10  ;;  %v8247_v24 = vrot.slane %v5937_v57, 4  ;;  %v2070_v18 = vpop.permute.xlu1 %2069  ;;  %8251 = vst [vmem:[#allocation11_spill] sm:$0xff] %v6542_v45  ;;  %v8266_v45 = vld [vmem:[#allocation29_spill] sm:$0xff] }
 0x163   : > { %v8248_v0 = vrot.slane %v5940_v9, 4  ;;  %v1852_v35 = vsel %vm1825_vm3, %v1849_v30, %v1851_v22  ;;  %v1680_v3 = vmax.f32 %v6253_v19, %v1648_v47  ;;  %v8249_v39 = vrot.slane %v6002_v41, 4 }
 0x164   : > { %v8250_v20 = vrot.slane %v5990_v54, 4  ;;  %v8253_v16 = vcvt.s32.f32 %v8252_v23  ;;  %v2095_v27 = vmul.f32 %v6249_v38, %v1852_v35  ;;  %v1408_v30 = vrot.slane %v1232_v37, 6  ;;  %v8260_v35 = vld [vmem:[#allocation43_spill] sm:$0xff] }
 0x165   : > { %v1864_v4 = vsel %vm1825_vm3, %v8248_v0, %v8247_v24  ;;  %v1853_v24 = vrot.slane %v6525_v63, 4  ;;  %v8254_v0 = vld [vmem:[#allocation85_spill] sm:$0xff]  ;;  %v8259_v38 = vrot.slane %v6135_v42, 4  ;;  %v8265_v5 = vrot.slane %v8264_v46, 6 }
 0x166   : > { %v2101_v33 = vmul.f32 %v6350_v17, %v1864_v4  ;;  %v1868_v10 = vsel %vm1825_vm3, %v8250_v20, %v8249_v39  ;;  %2709 = vperm.xlu1 %4769, %v8253_v16   ;;  %v8255_v17 = vcvt.s32.f32 %v8254_v0  ;;  %v1855_v4 = vrot.slane %v1680_v3, 4 }
 0x167   : > { %v2103_v47 = vmul.f32 %v6393_v49, %v1868_v10  ;;  %v8257_v39 = vmov %v8250_v20  ;;  %v8258_v20 = vrot.slane %v5937_v57, 4  ;;  %v8261_v16 = vrot.slane %v8260_v35, 4 }
 0x168   : > { %2704 = vperm.xlu0 %4768, %v8255_v17   ;;  %v6552_v6 = vmax.f32 %v5937_v57, %v2101_v33  ;;  %v6566_v10 = vmax.f32 %v1678_v34, %v2095_v27  ;;  %v1854_v0 = vsel %vm1825_vm3, %v1851_v22, %v1853_v24  ;;  %v8263_v33 = vrot.slane %v6253_v19, 6  ;;  %v6579_v27 = vpop.permute.xlu0 %2074  ;;  %v8268_v22 = vld [vmem:[#allocation86_spill] sm:$0xff] }
 0x169   : > { %v6559_v23 = vsel %vm1825_vm3, %v8258_v20, %v8257_v39  ;;  %v1872_v49 = vsel %vm1825_vm3, %v8261_v16, %v8259_v38  ;;  %v1411_v57 = vsel %vm1376_vm2, %v1408_v30, %v8265_v5  ;;  %v2080_v39 = vpop.permute.xlu1 %2079  ;;  %v1883_v20 = vrot.slane %v6362_v26, 4  ;;  %v8267_v38 = vld [vmem:[#allocation28_spill] sm:$0xff] }
 0x16a   : > { %8256 = vst [vmem:[#allocation14_spill] sm:$0xff] %v6552_v6  ;;  %8262 = vst [vmem:[#allocation30_spill] sm:$0xff] %v6566_v10  ;;  %v1409_v17 = vsel %vm1376_vm2, %v8263_v33, %v1408_v30  ;;  %v1856_v6 = vsel %vm1825_vm3, %v1853_v24, %v1855_v4  ;;  %v1650_v34 = vmul.f32 %v8267_v38, %v1411_v57  ;;  %v8269_v16 = vcvt.s32.f32 %v8268_v22  ;;  %v8270_v33 = vld [vmem:[#allocation26_spill] sm:$0xff] }
 0x16b   : > { %v1649_v14 = vmul.f32 %v8266_v45, %v1409_v17  ;;  %v1887_v19 = vrot.slane %v6370_v12, 4  ;;  %v2097_v10 = vmul.f32 %v8270_v33, %v1856_v6  ;;  %v6586_v5 = vmax.f32 %v6002_v41, %v2103_v47 }
 0x16c   : > { %2719 = vperm.xlu1 %4769, %v8269_v16   ;;  %v2105_v30 = vmul.f32 %v6427_v25, %v1872_v49  ;;  %v8273_v24 = vcvt.s32.f32 %v8272_v60  ;;  %v1682_v17 = vmax.f32 %v8264_v46, %v1650_v34  ;;  %v8274_v57 = vrot.slane %v8260_v35, 4 }
 0x16d   : > { %8271 = vst [vmem:[#allocation33_spill] sm:$0xff] %v6586_v5  ;;  %v6591_v45 = vmax.f32 %v1232_v37, %v1649_v14  ;;  %v8275_v38 = vrot.slane %v6002_v41, 4  ;;  %v8276_v6 = vrot.slane %v6194_v29, 4  ;;  %v8277_v47 = vrot.slane %v6197_v36, 4  ;;  %v2250_v37 = vpop.permute.xlu1 %2249 }
 0x16e   : > { %2714 = vperm.xlu0 %4768, %v8273_v24   ;;  %v1885_v60 = vrot.slane %v6372_v7, 4  ;;  %v6607_v49 = vmax.f32 %v1680_v3, %v2097_v10  ;;  %v6610_v14 = vmax.f32 %v6135_v42, %v2105_v30  ;;  %v1859_v34 = vrot.slane %v1682_v17, 4  ;;  %v6628_v30 = vpop.permute.xlu0 %2244 }
 0x16f   : > { %v6599_v22 = vsel %vm1825_vm3, %v8275_v38, %v8274_v57  ;;  %v1876_v25 = vsel %vm1825_vm3, %v8277_v47, %v8276_v6  ;;  %v1857_v41 = vrot.slane %v6591_v45, 4  ;;  %v8279_v16 = vmov %v8277_v47  ;;  %8283 = vst [vmem:[#allocation10_spill] sm:$0xff] %v6628_v30  ;;  %v8286_v6 = vld [vmem:[#allocation40_spill] sm:$0xff] }
 0x170   : > { %8278 = vst [vmem:[#allocation53_spill] sm:$0xff] %v6610_v14  ;;  %v2107_v46 = vmul.f32 %v6463_v59, %v1876_v25  ;;  %v8280_v33 = vrot.slane %v6135_v42, 4  ;;  %v8281_v57 = vrot.slane %v6308_v15, 4  ;;  %v8282_v3 = vrot.slane %v6323_v21, 4  ;;  %v8284_v59 = vld [vmem:[#allocation90_spill] sm:$0xff]  ;;  %v8287_v25 = vld [vmem:[#allocation25_spill] sm:$0xff] }
 0x171   : > { %v8285_v38 = vcvt.s32.f32 %v8284_v59  ;;  %v2082_v47 = vmul.f32 %v8286_v6, %v1921_v40  ;;  %v2084_v42 = vmul.f32 %v8287_v25, %v6421_v56  ;;  %v8290_v14 = vrot.slane %v6194_v29, 4  ;;  %v8293_v59 = vld [vmem:[#allocation7_spill] sm:$0xff] }
 0x172   : > { %v6619_v24 = vsel %vm1825_vm3, %v8280_v33, %v8279_v16  ;;  %v6626_v10 = vsel %vm1825_vm3, %v8282_v3, %v8281_v57  ;;  %v6636_v16 = vmax.f32 %v6194_v29, %v2107_v46  ;;  %v8289_v33 = vmov %v8282_v3  ;;  %v8291_v3 = vld [vmem:[#allocation91_spill] sm:$0xff]  ;;  %v8295_v29 = vld [vmem:[#allocation9_spill] sm:$0xff] }
 0x173   : > { %2889 = vperm.xlu1 %4769, %v8285_v38   ;;  %v6643_v57 = vsel %vm1825_vm3, %v8290_v14, %v8289_v33  ;;  %v8292_v30 = vcvt.s32.f32 %v8291_v3  ;;  %v2086_v38 = vmul.f32 %v8293_v59, %v6425_v8  ;;  %v1860_v40 = vsel %vm1825_vm3, %v1857_v41, %v1859_v34  ;;  %v8296_v14 = vld [vmem:[#allocation23_spill] sm:$0xff]  ;;  %v8297_v3 = vld [vmem:[#allocation48_spill] sm:$0xff]  ;;  %v2260_v59 = vpop.permute.xlu1 %2259 }
 0x174   : > { %8288 = vst [vmem:[#allocation39_spill] sm:$0xff] %v6636_v16  ;;  %v1858_v56 = vsel %vm1825_vm3, %v1855_v4, %v1857_v41  ;;  %v8294_v46 = vrot.slane %v5940_v9, 4  ;;  %v2088_v25 = vmul.f32 %v8295_v29, %v6500_v28  ;;  %v2090_v33 = vmul.f32 %v8296_v14, %v6503_v13  ;;  %v2255_v13 = vpop.permute.xlu0 %2254 }
 0x175   : > { %2884 = vperm.xlu0 %4768, %v8292_v30   ;;  %v2099_v30 = vmul.f32 %v8297_v3, %v1860_v40  ;;  %v8298_v16 = vrot.slane %v6326_v32, 4  ;;  %v8300_v41 = vrot.slane %v6308_v15, 4  ;;  %v1888_v28 = vsel %vm1825_vm3, %v1885_v60, %v1887_v19  ;;  %v8301_v40 = vld [vmem:[#allocation92_spill] sm:$0xff]  ;;  %v8307_v19 = vld [vmem:[#allocation47_spill] sm:$0xff] }
 0x176   : > { %v6654_v6 = vsel %vm1825_vm3, %v1859_v34, %v8294_v46  ;;  %v6673_v46 = vsel %vm1825_vm3, %v1883_v20, %v1885_v60  ;;  %v8302_v29 = vcvt.s32.f32 %v8301_v40  ;;  %v6683_v7 = vmul.f32 %v2080_v39, %v1888_v28 }
 0x177   : > { %v1884_v8 = vsel %vm1825_vm3, %v8298_v16, %v1883_v20  ;;  %v8299_v4 = vmov %v8298_v16  ;;  %v8303_v16 = vld [vmem:[#allocation44_spill] sm:$0xff]  ;;  %v2096_v20 = vmul.f32 %v8307_v19, %v1854_v0  ;;  %v6692_v40 = vmax.f32 %v6063_v52, %v2082_v47  ;;  %v2270_v39 = vpop.permute.xlu1 %2269  ;;  %v6722_v19 = vld [vmem:[%s4911_s28 + $0x40] sm:$0xff] }
 0x178   : > { %v2111_v5 = vmul.f32 %v2070_v18, %v1884_v8  ;;  %v6669_v34 = vsel %vm1825_vm3, %v8300_v41, %v8299_v4  ;;  %2899 = vperm.xlu1 %4769, %v8302_v29   ;;  %v2092_v14 = vmul.f32 %v8303_v16, %v6489_v55  ;;  %v8304_v18 = vld [vmem:[#allocation45_spill] sm:$0xff]  ;;  %v6681_v8 = vmax.f32 %v1682_v17, %v2099_v30  ;;  %v8305_v4 = vld [vmem:[#allocation94_spill] sm:$0xff]  ;;  %v8308_v0 = vld [vmem:[#allocation12_spill] sm:$0xff]  ;;  %v2265_v47 = vpop.permute.xlu0 %2264 }
 0x179   : > { %v2094_v3 = vmul.f32 %v8304_v18, %v6492_v62  ;;  %v8306_v41 = vcvt.s32.f32 %v8305_v4  ;;  %v2116_v55 = vmax.f32 %v6386_v1, %v2084_v42  ;;  %v2404_v17 = vmul.f32 %v2255_v13, %v6374_v2  ;;  %v8309_v29 = vld [vmem:[#allocation96_spill] sm:$0xff]  ;;  %v8311_v42 = vld [vmem:[#allocation6_spill] sm:$0xff] }
 0x17a   : > { %v6689_v60 = vmax.f32 %v6362_v26, %v2111_v5  ;;  %v2118_v30 = vmax.f32 %v6378_v51, %v2086_v38  ;;  %v2120_v28 = vmax.f32 %v6465_v44, %v2088_v25  ;;  %v2098_v26 = vmul.f32 %v8308_v0, %v1858_v56  ;;  %v8312_v38 = vld [vmem:[#allocation5_spill] sm:$0xff]  ;;  %v6718_v4 = vld [vmem:[%s4911_s28 + $0x48] sm:$0xff] }
 0x17b   : > { %2894 = vperm.xlu0 %4768, %v8306_v41   ;;  %v2403_v5 = vmul.f32 %v2250_v37, %v6692_v40  ;;  %v2405_v52 = vmul.f32 %v2260_v59, %v2116_v55  ;;  %v8310_v1 = vcvt.s32.f32 %v8309_v29  ;;  %v2856_v16 = vcvt.s32.f32 %v8311_v42  ;;  %v8314_v25 = vld [vmem:[#allocation41_spill] sm:$0xff] }
 0x17c   : > { %v6705_v13 = vmax.f32 %v2116_v55, %v2404_v17  ;;  %v2407_v18 = vmul.f32 %v2270_v39, %v2118_v30  ;;  %v2406_v51 = vmul.f32 %v2265_v47, %v6446_v53  ;;  %v8313_v44 = vcvt.s32.f32 %v8312_v38  ;;  %v8315_v47 = vld [vmem:[#allocation21_spill] sm:$0xff] }
 0x17d   : > { %2909 = vperm.xlu1 %4769, %v8310_v1   ;;  %v2122_v56 = vmax.f32 %v8314_v25, %v2090_v33  ;;  %v6712_v37 = vmax.f32 %v6374_v2, %v2403_v5  ;;  %v6715_v59 = vmax.f32 %v6446_v53, %v2405_v52  ;;  %v2795_v41 = vshra.s32 %v6718_v4, 5  ;;  %v2280_v2 = vpop.permute.xlu1 %2279  ;;  %v6732_v53 = vld [vmem:[%s4911_s28 + $0x58] sm:$0xff]  ;;  %v2275_v52 = vpop.permute.xlu0 %2274  ;;  %v6738_v38 = vld [vmem:[%s4911_s28 + $0x50] sm:$0xff] }
 0x17e   : > { %v2794_v55 = vshra.s32 %v6722_v19, 5  ;;  %v6726_v17 = vmax.f32 %v6449_v48, %v2407_v18  ;;  %v6728_v39 = vmax.f32 %v2118_v30, %v2406_v51  ;;  %v2124_v33 = vmax.f32 %v6455_v31, %v2092_v14  ;;  %v6746_v51 = vld [vmem:[%s4911_s28 + $0x68] sm:$0xff] }
 0x17f   : > { %2904 = vperm.xlu0 %4768, %v8313_v44   ;;  %v2797_v0 = vshra.s32 %v6732_v53, 5  ;;  %v2409_v5 = vmul.f32 %v2280_v2, %v2120_v28  ;;  %v8316_v29 = vcvt.s32.f32 %v8315_v47  ;;  %v2827_v1 = vand.u32 1, %v2795_v41  ;;  %8317 = vst [vmem:[#allocation55_spill] sm:$0xff] %v6746_v51  ;;  %v8318_v47 = vld [vmem:[#allocation31_spill] sm:$0xff] }
 0x180   : > { %v2826_v42 = vand.u32 1, %v2794_v55  ;;  %v2796_v30 = vshra.s32 %v6738_v38, 5  ;;  %v2408_v18 = vmul.f32 %v2275_v52, %v6449_v48  ;;  %v6743_v14 = vmax.f32 %v6271_v11, %v2094_v3  ;;  %v6757_v3 = vld [vmem:[%s4911_s28 + $0x60] sm:$0xff] }
 0x181   : > { %2919 = vperm.xlu1 %4769, %v8316_v29   ;;  %v2829_v31 = vand.u32 1, %v2797_v0  ;;  %v2799_v44 = vshra.s32 %v6746_v51, 5  ;;  %v6750_v25 = vmax.f32 %v6522_v61, %v2409_v5  ;;  %v2859_v41 = vcvt.s32.f32 %v2827_v1  ;;  %v2285_v62 = vpop.permute.xlu0 %2284 }
 0x182   : > { %v2858_v55 = vcvt.s32.f32 %v2826_v42  ;;  %v2828_v2 = vand.u32 1, %v2796_v30  ;;  %v2100_v29 = vmul.f32 %v8318_v47, %v6654_v6  ;;  %v6754_v48 = vmax.f32 %v2120_v28, %v2408_v18  ;;  %v6764_v42 = vld [vmem:[%s4911_s28 + $0x78] sm:$0xff] }
 0x183   : > { %2914 = vperm.xlu0 %4768, %v2856_v16   ;;  %v2290_v16 = vpop.permute.xlu1 %2289  ;;  %v2831_v11 = vand.u32 1, %v2799_v44  ;;  %v2798_v0 = vshra.s32 %v6757_v3, 5  ;;  %v2861_v5 = vcvt.s32.f32 %v2829_v31  ;;  %v6761_v1 = vmax.f32 %v6525_v63, %v2096_v20  ;;  %8320 = vst [vmem:[#allocation19_spill] sm:$0xff] %v6764_v42  ;;  %v6769_v44 = vld [vmem:[%s4911_s28 + $0x70] sm:$0xff]  ;;  %v8322_v31 = vld [vmem:[#allocation50_spill] sm:$0xff] }
 0x184   : > { %8319 = vst [vmem:[#allocation56_spill] sm:$0xff] %v6754_v48  ;;  %v2411_v52 = vmul.f32 %v2290_v16, %v2122_v56  ;;  %v2801_v6 = vshra.s32 %v6764_v42, 5  ;;  %v2410_v28 = vmul.f32 %v2285_v62, %v6522_v61  ;;  %v2860_v30 = vcvt.s32.f32 %v2828_v2  ;;  %8321 = vst [vmem:[#allocation58_spill] sm:$0xff] %v6769_v44  ;;  %v8323_v61 = vld [vmem:[#allocation54_spill] sm:$0xff] }
 0x185   : > { %2929 = vperm.xlu1 %4769, %v2859_v41   ;;  %v2830_v18 = vand.u32 1, %v2798_v0  ;;  %v2800_v47 = vshra.s32 %v6769_v44, 5  ;;  %v2102_v41 = vmul.f32 %v8322_v31, %v6559_v23  ;;  %v6778_v20 = vmax.f32 %v6591_v45, %v2098_v26  ;;  %v2295_v48 = vpop.permute.xlu0 %2294  ;;  %v6785_v44 = vld [vmem:[%s4911_s28 + $0x88] sm:$0xff] }
 0x186   : > { %v6775_v63 = vmax.f32 %v6484_v50, %v2411_v52  ;;  %v2104_v62 = vmul.f32 %v8323_v61, %v6599_v22  ;;  %v2863_v16 = vcvt.s32.f32 %v2831_v11  ;;  %v2833_v0 = vand.u32 1, %v2801_v6  ;;  %v6789_v52 = vld [vmem:[%s4911_s28 + $0x80] sm:$0xff] }
 0x187   : > { %2924 = vperm.xlu0 %4768, %v2858_v55   ;;  %v6782_v55 = vmax.f32 %v2122_v56, %v2410_v28  ;;  %v2300_v2 = vpop.permute.xlu1 %2299  ;;  %v2803_v23 = vshra.s32 %v6785_v44, 5  ;;  %v2802_v45 = vshra.s32 %v6789_v52, 5  ;;  %v6793_v26 = vmax.f32 %v5940_v9, %v2100_v29  ;;  %v6807_v29 = vld [vmem:[%s4911_s28 + $0x98] sm:$0xff] }
 0x188   : > { %v2413_v42 = vmul.f32 %v2300_v2, %v2124_v33  ;;  %v2412_v22 = vmul.f32 %v2295_v48, %v6484_v50  ;;  %v2862_v56 = vcvt.s32.f32 %v2830_v18  ;;  %v2832_v11 = vand.u32 1, %v2800_v47 }
 0x189   : > { %2939 = vperm.xlu1 %4769, %v2861_v5   ;;  %v6800_v5 = vmax.f32 %v5990_v54, %v2102_v41  ;;  %v2106_v28 = vmul.f32 %v6470_v43, %v6619_v24  ;;  %v2865_v9 = vcvt.s32.f32 %v2833_v0  ;;  %v2805_v50 = vshra.s32 %v6807_v29, 5  ;;  %v8324_v43 = vld [vmem:[#allocation38_spill] sm:$0xff]  ;;  %v6818_v41 = vld [vmem:[%s4911_s28 + $0x90] sm:$0xff] }
 0x18a   : > { %v6797_v6 = vmax.f32 %v6519_v58, %v2413_v42  ;;  %v6804_v31 = vmax.f32 %v2124_v33, %v2412_v22  ;;  %v2835_v42 = vand.u32 1, %v2803_v23  ;;  %v2834_v18 = vand.u32 1, %v2802_v45  ;;  %v8325_v0 = vld [vmem:[#allocation13_spill] sm:$0xff]  ;;  %v8326_v23 = vld [vmem:[#allocation30_spill] sm:$0xff] }
 0x18b   : > { %2934 = vperm.xlu0 %4768, %v2860_v30   ;;  %v2310_v61 = vpop.permute.xlu1 %2309  ;;  %v2305_v30 = vpop.permute.xlu0 %2304  ;;  %v6812_v54 = vmax.f32 %v8260_v35, %v2104_v62  ;;  %v2108_v24 = vmul.f32 %v8324_v43, %v6643_v57  ;;  %v2864_v47 = vcvt.s32.f32 %v2832_v11  ;;  %v2804_v2 = vshra.s32 %v6818_v41, 5  ;;  %v8327_v35 = vld [vmem:[#allocation11_spill] sm:$0xff] }
 0x18c   : > { %v2415_v48 = vmul.f32 %v2310_v61, %v6743_v14  ;;  %v2414_v33 = vmul.f32 %v2305_v30, %v6519_v58  ;;  %v2110_v62 = vmul.f32 %v8327_v35, %v6669_v34  ;;  %v2837_v22 = vand.u32 1, %v2805_v50 }
 0x18d   : > { %2949 = vperm.xlu1 %4769, %v2863_v16   ;;  %v2109_v16 = vmul.f32 %v8325_v0, %v6626_v10  ;;  %v2867_v10 = vcvt.s32.f32 %v2835_v42  ;;  %v2866_v30 = vcvt.s32.f32 %v2834_v18 }
 0x18e   : > { %v6824_v45 = vmax.f32 %v8326_v23, %v2415_v48  ;;  %v6829_v57 = vmax.f32 %v6743_v14, %v2414_v33  ;;  %v6836_v48 = vld [vmem:[%s4911_s28 + $0xa8] sm:$0xff]  ;;  %v2836_v14 = vand.u32 1, %v2804_v2  ;;  %v6841_v33 = vld [vmem:[%s4911_s28 + $0xa0] sm:$0xff]  ;;  %v6856_v2 = vmax.f32 %v6326_v32, %v2110_v62  ;;  %v6868_v32 = vld [vmem:[%s4911_s28 + $0xb0] sm:$0xff] }
 0x18f   : > { %2944 = vperm.xlu0 %4768, %v2862_v56   ;;  %v2320_v58 = vpop.permute.xlu1 %2319  ;;  %v6832_v56 = vmax.f32 %v6197_v36, %v2106_v28  ;;  %v2315_v61 = vpop.permute.xlu0 %2314  ;;  %v2807_v43 = vshra.s32 %v6836_v48, 5  ;;  %v2806_v36 = vshra.s32 %v6841_v33, 5  ;;  %v6845_v28 = vmax.f32 %v6323_v21, %v2108_v24  ;;  %v6860_v24 = vld [vmem:[%s4911_s28 + $0xb8] sm:$0xff] }
 0x190   : > { %v2417_v11 = vmul.f32 %v2320_v58, %v6761_v1  ;;  %v2416_v34 = vmul.f32 %v2315_v61, %v8326_v23  ;;  %v2868_v35 = vcvt.s32.f32 %v2836_v14  ;;  %v2808_v62 = vshra.s32 %v6868_v32, 5 }
 0x191   : > { %2959 = vperm.xlu1 %4769, %v2865_v9   ;;  %v2112_v9 = vmul.f32 %v6579_v27, %v6673_v46  ;;  %v2839_v21 = vand.u32 1, %v2807_v43  ;;  %v2809_v27 = vshra.s32 %v6860_v24, 5  ;;  %v6864_v46 = vmax.f32 %v6308_v15, %v2109_v16 }
 0x192   : > { %v6850_v50 = vmax.f32 %v6607_v49, %v2417_v11  ;;  %v6853_v42 = vmax.f32 %v6761_v1, %v2416_v34  ;;  %v2838_v58 = vand.u32 1, %v2806_v36  ;;  %v8328_v11 = vld [vmem:[#allocation49_spill] sm:$0xff]  ;;  %v6882_v34 = vld [vmem:[%s4911_s28 + $0xc8] sm:$0xff] }
 0x193   : > { %2954 = vperm.xlu0 %4768, %v2864_v47   ;;  %v2330_v18 = vpop.permute.xlu1 %2329  ;;  %v2869_v47 = vcvt.s32.f32 %v2837_v22  ;;  %v2325_v23 = vpop.permute.xlu0 %2324  ;;  %v6875_v61 = vmax.f32 %v8328_v11, %v2112_v9  ;;  %v2841_v43 = vand.u32 1, %v2809_v27  ;;  %8329 = vst [vmem:[#allocation16_spill] sm:$0xff] %v6882_v34  ;;  %v2811_v14 = vshra.s32 %v6882_v34, 5 }
 0x194   : > { %v2419_v0 = vmul.f32 %v2330_v18, %v6778_v20  ;;  %v2418_v1 = vmul.f32 %v2325_v23, %v6607_v49  ;;  %v2870_v9 = vcvt.s32.f32 %v2838_v58  ;;  %v2840_v18 = vand.u32 1, %v2808_v62  ;;  %v8331_v23 = vld [vmem:[#allocation14_spill] sm:$0xff] }
 0x195   : > { %2969 = vperm.xlu1 %4769, %v2867_v10   ;;  %v6898_v58 = vld [vmem:[%s4911_s28 + $0xd8] sm:$0xff] }
 0x196   : > { %v6872_v22 = vmax.f32 %v6681_v8, %v2419_v0  ;;  %v6878_v15 = vmax.f32 %v6778_v20, %v2418_v1  ;;  %v6887_v0 = vld [vmem:[%s4911_s28 + $0xc0] sm:$0xff]  ;;  %8333 = vst [vmem:[#allocation68_spill] sm:$0xff] %v6898_v58  ;;  %v2813_v62 = vshra.s32 %v6898_v58, 5 }
 0x197   : > { %2964 = vperm.xlu0 %4768, %v2866_v30   ;;  %v2340_v16 = vpop.permute.xlu1 %2339  ;;  %v2335_v10 = vpop.permute.xlu0 %2334  ;;  %v2871_v30 = vcvt.s32.f32 %v2839_v21  ;;  %8330 = vst [vmem:[#allocation59_spill] sm:$0xff] %v6887_v0  ;;  %v2810_v20 = vshra.s32 %v6887_v0, 5 }
 0x198   : > { %v2421_v49 = vmul.f32 %v2340_v16, %v6793_v26  ;;  %v2420_v36 = vmul.f32 %v2335_v10, %v6681_v8  ;;  %v2873_v8 = vcvt.s32.f32 %v2841_v43 }
 0x199   : > { %2979 = vperm.xlu1 %4769, %v2869_v47   ;;  %v2842_v10 = vand.u32 1, %v2810_v20 }
 0x19a   : > { %v6891_v1 = vmax.f32 %v8331_v23, %v2421_v49  ;;  %v6894_v47 = vmax.f32 %v6793_v26, %v2420_v36  ;;  %v2872_v49 = vcvt.s32.f32 %v2840_v18  ;;  %v8335_v36 = vld [vmem:[#allocation33_spill] sm:$0xff]  ;;  %v6914_v18 = vld [vmem:[%s4911_s28 + $0xe8] sm:$0xff] }
 0x19b   : > { %2974 = vperm.xlu0 %4768, %v2868_v35   ;;  %v2350_v21 = vpop.permute.xlu1 %2349  ;;  %v2345_v11 = vpop.permute.xlu0 %2344  ;;  %v2843_v35 = vand.u32 1, %v2811_v14  ;;  %8338 = vst [vmem:[#allocation17_spill] sm:$0xff] %v6914_v18  ;;  %v2815_v20 = vshra.s32 %v6914_v18, 5 }
 0x19c   : > { %8332 = vst [vmem:[#allocation46_spill] sm:$0xff] %v6891_v1  ;;  %v2423_v27 = vmul.f32 %v2350_v21, %v6800_v5  ;;  %v2422_v16 = vmul.f32 %v2345_v11, %v8331_v23  ;;  %v6903_v1 = vld [vmem:[%s4911_s28 + $0xd0] sm:$0xff] }
 0x19d   : > { %2989 = vperm.xlu1 %4769, %v2871_v30   ;;  %8334 = vst [vmem:[#allocation67_spill] sm:$0xff] %v6903_v1  ;;  %v2812_v26 = vshra.s32 %v6903_v1, 5  ;;  %v2875_v23 = vcvt.s32.f32 %v2843_v35  ;;  %v6919_v1 = vld [vmem:[%s4911_s28 + $0xe0] sm:$0xff] }
 0x19e   : > { %v6907_v21 = vmax.f32 %v8335_v36, %v2423_v27  ;;  %v6910_v30 = vmax.f32 %v6800_v5, %v2422_v16  ;;  %v2874_v27 = vcvt.s32.f32 %v2842_v10  ;;  %8339 = vst [vmem:[#allocation51_spill] sm:$0xff] %v6919_v1  ;;  %v2814_v5 = vshra.s32 %v6919_v1, 5  ;;  %v8340_v16 = vld [vmem:[#allocation53_spill] sm:$0xff] }
 0x19f   : > { %2984 = vperm.xlu0 %4768, %v2870_v9   ;;  %v2360_v43 = vpop.permute.xlu1 %2359  ;;  %v2355_v58 = vpop.permute.xlu0 %2354  ;;  %v2845_v9 = vand.u32 1, %v2813_v62  ;;  %v6930_v10 = vld [vmem:[%s4911_s28 + $0xf8] sm:$0xff] }
 0x1a0   : > { %8336 = vst [vmem:[#allocation60_spill] sm:$0xff] %v6907_v21  ;;  %8337 = vst [vmem:[#allocation61_spill] sm:$0xff] %v6910_v30  ;;  %v2425_v14 = vmul.f32 %v2360_v43, %v6812_v54  ;;  %v2424_v11 = vmul.f32 %v2355_v58, %v8335_v36  ;;  %v2844_v21 = vand.u32 1, %v2812_v26  ;;  %v2817_v26 = vshra.s32 %v6930_v10, 5  ;;  %v6954_v30 = vld [vmem:[%s4911_s28 + $0x18] sm:$0xff] }
 0x1a1   : > { %2999 = vperm.xlu1 %4769, %v2873_v8   ;;  %v2877_v58 = vcvt.s32.f32 %v2845_v9  ;;  %8343 = vst [vmem:[#allocation15_spill] sm:$0xff] %v6930_v10  ;;  %8349 = vst [vmem:[#allocation65_spill] sm:$0xff] %v6954_v30 }
 0x1a2   : > { %v6923_v43 = vmax.f32 %v8340_v16, %v2425_v14  ;;  %v6926_v8 = vmax.f32 %v6812_v54, %v2424_v11  ;;  %v2876_v14 = vcvt.s32.f32 %v2844_v21  ;;  %v6935_v54 = vld [vmem:[%s4911_s28 + $0xf0] sm:$0xff] }
 0x1a3   : > { %2994 = vperm.xlu0 %4768, %v2872_v49   ;;  %v2370_v35 = vpop.permute.xlu1 %2369  ;;  %v2365_v18 = vpop.permute.xlu0 %2364  ;;  %v2847_v49 = vand.u32 1, %v2815_v20  ;;  %8344 = vst [vmem:[#allocation64_spill] sm:$0xff] %v6935_v54  ;;  %v2816_v11 = vshra.s32 %v6935_v54, 5  ;;  %v6945_v20 = vld [vmem:[%s4911_s28 + $0x8] sm:$0xff] }
 0x1a4   : > { %8341 = vst [vmem:[#allocation95_spill] sm:$0xff] %v6923_v43  ;;  %8342 = vst [vmem:[#allocation63_spill] sm:$0xff] %v6926_v8  ;;  %v2427_v62 = vmul.f32 %v2370_v35, %v6832_v56  ;;  %v2426_v36 = vmul.f32 %v2365_v18, %v8340_v16  ;;  %v2846_v43 = vand.u32 1, %v2814_v5  ;;  %v8345_v35 = vld [vmem:[#allocation39_spill] sm:$0xff]  ;;  %v3107_v10 = vshra.s32 %v6945_v20, 6 }
 0x1a5   : > { %3009 = vperm.xlu1 %4769, %v2875_v23   ;;  %8348 = vst [vmem:[#allocation52_spill] sm:$0xff] %v6945_v20  ;;  %v2879_v21 = vcvt.s32.f32 %v2847_v49  ;;  %v2849_v18 = vand.u32 1, %v2817_v26 }
 0x1a6   : > { %v6939_v8 = vmax.f32 %v8345_v35, %v2427_v62  ;;  %v6942_v23 = vmax.f32 %v6832_v56, %v2426_v36  ;;  %v2878_v16 = vcvt.s32.f32 %v2846_v43  ;;  %v2848_v62 = vand.u32 1, %v2816_v11 }
 0x1a7   : > { %3004 = vperm.xlu0 %4768, %v2874_v27   ;;  %v2380_v9 = vpop.permute.xlu1 %2379  ;;  %v2375_v1 = vpop.permute.xlu0 %2374  ;;  %v6949_v27 = vld [vmem:[%s4911_s28] sm:$0xff]  ;;  %v3139_v36 = vand.u32 1, %v3107_v10  ;;  %v2881_v20 = vcvt.s32.f32 %v2849_v18 }
 0x1a8   : > { %8346 = vst [vmem:[#allocation18_spill] sm:$0xff] %v6939_v8  ;;  %8347 = vst [vmem:[#allocation42_spill] sm:$0xff] %v6942_v23  ;;  %v3106_v5 = vshra.s32 %v6949_v27, 6  ;;  %v2880_v26 = vcvt.s32.f32 %v2848_v62  ;;  %v6970_v62 = vld [vmem:[%s4911_s28 + $0x28] sm:$0xff] }
 0x1a9   : > { %3019 = vperm.xlu1 %4769, %v2877_v58   ;;  %v3109_v58 = vshra.s32 %v6954_v30, 6  ;;  %v3171_v18 = vcvt.s32.f32 %v3139_v36  ;;  %8351 = vst [vmem:[#allocation3_spill] sm:$0xff] %v6970_v62  ;;  %v3111_v30 = vshra.s32 %v6970_v62, 6 }
 0x1aa   : > { %v3138_v54 = vand.u32 1, %v3106_v5 }
 0x1ab   : > { %3014 = vperm.xlu0 %4768, %v2876_v14   ;;  %v2390_v56 = vpop.permute.xlu1 %2389  ;;  %v2385_v8 = vpop.permute.xlu0 %2384  ;;  %v6959_v14 = vld [vmem:[%s4911_s28 + $0x10] sm:$0xff] }
 0x1ac   : > { %v2431_v23 = vmul.f32 %v2390_v56, %v6856_v2  ;;  %v2430_v49 = vmul.f32 %v2385_v8, %v6864_v46  ;;  %8350 = vst [vmem:[#allocation66_spill] sm:$0xff] %v6959_v14  ;;  %v3108_v43 = vshra.s32 %v6959_v14, 6  ;;  %v3170_v8 = vcvt.s32.f32 %v3138_v54 }
 0x1ad   : > { %3029 = vperm.xlu1 %4769, %v2879_v21   ;;  %v2429_v14 = vmul.f32 %v2380_v9, %v6845_v28  ;;  %v2428_v54 = vmul.f32 %v2375_v1, %v8345_v35  ;;  %v6999_v35 = vld [vmem:[%s4911_s28 + $0x30] sm:$0xff] }
 0x1ae   : > { %v6963_v10 = vmax.f32 %v6689_v60, %v2431_v23  ;;  %v6966_v11 = vmax.f32 %v6856_v2, %v2430_v49  ;;  %v3140_v2 = vand.u32 1, %v3108_v43  ;;  %v6978_v49 = vld [vmem:[%s4911_s28 + $0x20] sm:$0xff]  ;;  %8356 = vst [vmem:[#allocation4_spill] sm:$0xff] %v6999_v35 }
 0x1af   : > { %3024 = vperm.xlu0 %4768, %v2878_v16   ;;  %v2400_v21 = vpop.permute.xlu1 %2399  ;;  %v2395_v56 = vpop.permute.xlu0 %2394  ;;  %v3141_v16 = vand.u32 1, %v3109_v58  ;;  %8352 = vst [vmem:[#allocation69_spill] sm:$0xff] %v6978_v49  ;;  %v3110_v36 = vshra.s32 %v6978_v49, 6  ;;  %v6995_v49 = vld [vmem:[%s4911_s28 + $0x38] sm:$0xff] }
 0x1b0   : > { %v2433_v5 = vmul.f32 %v2400_v21, %v6875_v61  ;;  %v6975_v23 = vmul.f32 %v2395_v56, %v6689_v60  ;;  %v8354_v21 = vld [vmem:[#allocation10_spill] sm:$0xff]  ;;  %v3143_v56 = vand.u32 1, %v3111_v30  ;;  %v3113_v1 = vshra.s32 %v6995_v49, 6 }
 0x1b1   : > { %3039 = vperm.xlu1 %4769, %v2881_v20   ;;  %v8353_v20 = vmax.f32 %v6370_v12, %v6683_v7  ;;  %v2402_v62 = vmul.f32 0.0, %v8354_v21  ;;  %v3173_v43 = vcvt.s32.f32 %v3141_v16  ;;  %v3172_v12 = vcvt.s32.f32 %v3140_v2 }
 0x1b2   : > { %v3142_v7 = vand.u32 1, %v3110_v36  ;;  %v7006_v21 = vmax.f32 %v6845_v28, %v2428_v54  ;;  %v3145_v2 = vand.u32 1, %v3113_v1  ;;  %v3115_v36 = vshra.s32 %v6718_v4, 6 }
 0x1b3   : > { %3034 = vperm.xlu0 %4768, %v2880_v26   ;;  %v6985_v58 = vmax.f32 %v8353_v20, %v2433_v5  ;;  %v6990_v9 = vpop.permute.xlu1 %2569  ;;  %v6992_v26 = vpop.permute.xlu0 %2564  ;;  %v3112_v5 = vshra.s32 %v6999_v35, 6  ;;  %v7003_v20 = vmax.f32 %v6864_v46, %v2429_v14  ;;  %v3114_v28 = vshra.s32 %v6722_v19, 6 }
 0x1b4   : > { %8355 = vst [vmem:[#allocation70_spill] sm:$0xff] %v6992_v26  ;;  %v3174_v46 = vcvt.s32.f32 %v3142_v7  ;;  %v3177_v1 = vcvt.s32.f32 %v3145_v2 }
 0x1b5   : > { %3209 = vperm.xlu1 %4769, %v3171_v18   ;;  %v7009_v18 = vmax.f32 %v6692_v40, %v2402_v62  ;;  %v3144_v14 = vand.u32 1, %v3112_v5  ;;  %v3146_v5 = vand.u32 1, %v3114_v28 }
 0x1b7   : > { %3204 = vperm.xlu0 %4768, %v3170_v8   ;;  %v2580_v30 = vpop.permute.xlu1 %2579  ;;  %v2575_v60 = vpop.permute.xlu0 %2574  ;;  %v3175_v8 = vcvt.s32.f32 %v3143_v56  ;;  %v3176_v7 = vcvt.s32.f32 %v3144_v14  ;;  %v3178_v14 = vcvt.s32.f32 %v3146_v5 }
 0x1b8   : > { %v2725_v16 = vmul.f32 %v2580_v30, %v6712_v37  ;;  %v2724_v26 = vmul.f32 %v2575_v60, %v7009_v18  ;;  %v3147_v30 = vand.u32 1, %v3115_v36  ;;  %v3117_v60 = vshra.s32 %v6732_v53, 6 }
 0x1b9   : > { %3219 = vperm.xlu1 %4769, %v3173_v43  }
 0x1ba   : > { %v7016_v54 = vmax.f32 %v6715_v59, %v2725_v16  ;;  %v7019_v40 = vmax.f32 %v6705_v13, %v2724_v26  ;;  %v3116_v16 = vshra.s32 %v6738_v38, 6  ;;  %v3179_v36 = vcvt.s32.f32 %v3147_v30 }
 0x1bb   : > { %3214 = vperm.xlu0 %4768, %v3172_v12   ;;  %v2590_v62 = vpop.permute.xlu1 %2589  ;;  %v2585_v56 = vpop.permute.xlu0 %2584 }
 0x1bc   : > { %8357 = vst [vmem:[#allocation32_spill] sm:$0xff] %v7016_v54  ;;  %8358 = vst [vmem:[#allocation8_spill] sm:$0xff] %v7019_v40  ;;  %v2727_v43 = vmul.f32 %v2590_v62, %v6715_v59  ;;  %v2726_v12 = vmul.f32 %v2585_v56, %v6705_v13  ;;  %v3149_v62 = vand.u32 1, %v3117_v60  ;;  %v3119_v13 = vshra.s32 %v6746_v51, 6  ;;  %v8361_v51 = vld [vmem:[#allocation19_spill] sm:$0xff] }
 0x1bd   : > { %3229 = vperm.xlu1 %4769, %v3175_v8   ;;  %v3148_v28 = vand.u32 1, %v3116_v16 }
 0x1be   : > { %v7026_v54 = vmax.f32 %v6726_v17, %v2727_v43  ;;  %v7029_v26 = vmax.f32 %v6728_v39, %v2726_v12  ;;  %v3118_v43 = vshra.s32 %v6757_v3, 6  ;;  %v8360_v12 = vld [vmem:[#allocation56_spill] sm:$0xff]  ;;  %v3181_v60 = vcvt.s32.f32 %v3149_v62 }
 0x1bf   : > { %3224 = vperm.xlu0 %4768, %v3174_v46   ;;  %v2600_v59 = vpop.permute.xlu1 %2599  ;;  %v2595_v2 = vpop.permute.xlu0 %2594  ;;  %v3180_v5 = vcvt.s32.f32 %v3148_v28 }
 0x1c0   : > { %v2729_v8 = vmul.f32 %v2600_v59, %v6726_v17  ;;  %v2728_v46 = vmul.f32 %v2595_v2, %v6728_v39  ;;  %v3151_v59 = vand.u32 1, %v3119_v13  ;;  %v3121_v39 = vshra.s32 %v8361_v51, 6  ;;  %v8362_v2 = vld [vmem:[#allocation58_spill] sm:$0xff] }
 0x1c1   : > { %3239 = vperm.xlu1 %4769, %v3177_v1   ;;  %v3150_v16 = vand.u32 1, %v3118_v43 }
 0x1c2   : > { %v7036_v56 = vmax.f32 %v6750_v25, %v2729_v8  ;;  %v7039_v40 = vmax.f32 %v8360_v12, %v2728_v46  ;;  %v3120_v8 = vshra.s32 %v8362_v2, 6  ;;  %v3183_v13 = vcvt.s32.f32 %v3151_v59 }
 0x1c3   : > { %3234 = vperm.xlu0 %4768, %v3176_v7   ;;  %v2610_v17 = vpop.permute.xlu1 %2609  ;;  %v2605_v30 = vpop.permute.xlu0 %2604  ;;  %v3182_v28 = vcvt.s32.f32 %v3150_v16 }
 0x1c4   : > { %8359 = vst [vmem:[#allocation82_spill] sm:$0xff] %v7036_v56  ;;  %v2731_v1 = vmul.f32 %v2610_v17, %v6750_v25  ;;  %v2730_v7 = vmul.f32 %v2605_v30, %v8360_v12  ;;  %v3153_v17 = vand.u32 1, %v3121_v39  ;;  %v3123_v12 = vshra.s32 %v6785_v44, 6 }
 0x1c5   : > { %3249 = vperm.xlu1 %4769, %v3179_v36   ;;  %v3152_v43 = vand.u32 1, %v3120_v8 }
 0x1c6   : > { %v7046_v56 = vmax.f32 %v6775_v63, %v2731_v1  ;;  %v7049_v46 = vmax.f32 %v6782_v55, %v2730_v7  ;;  %v3122_v1 = vshra.s32 %v6789_v52, 6  ;;  %v3185_v39 = vcvt.s32.f32 %v3153_v17 }
 0x1c7   : > { %3244 = vperm.xlu0 %4768, %v3178_v14   ;;  %v2620_v25 = vpop.permute.xlu1 %2619  ;;  %v2615_v62 = vpop.permute.xlu0 %2614  ;;  %v3184_v16 = vcvt.s32.f32 %v3152_v43 }
 0x1c8   : > { %v2733_v36 = vmul.f32 %v2620_v25, %v6775_v63  ;;  %v2732_v14 = vmul.f32 %v2615_v62, %v6782_v55  ;;  %v3155_v25 = vand.u32 1, %v3123_v12  ;;  %v3125_v55 = vshra.s32 %v6807_v29, 6 }
 0x1c9   : > { %3259 = vperm.xlu1 %4769, %v3181_v60   ;;  %v3154_v8 = vand.u32 1, %v3122_v1 }
 0x1ca   : > { %v7056_v30 = vmax.f32 %v6797_v6, %v2733_v36  ;;  %v7059_v7 = vmax.f32 %v6804_v31, %v2732_v14  ;;  %v3124_v36 = vshra.s32 %v6818_v41, 6  ;;  %v3187_v12 = vcvt.s32.f32 %v3155_v25 }
 0x1cb   : > { %3254 = vperm.xlu0 %4768, %v3180_v5   ;;  %v2630_v63 = vpop.permute.xlu1 %2629  ;;  %v2625_v59 = vpop.permute.xlu0 %2624  ;;  %v3186_v43 = vcvt.s32.f32 %v3154_v8 }
 0x1cc   : > { %v2735_v60 = vmul.f32 %v2630_v63, %v6797_v6  ;;  %v2734_v5 = vmul.f32 %v2625_v59, %v6804_v31  ;;  %v3157_v63 = vand.u32 1, %v3125_v55  ;;  %v3127_v31 = vshra.s32 %v6836_v48, 6 }
 0x1cd   : > { %3269 = vperm.xlu1 %4769, %v3183_v13   ;;  %v3156_v1 = vand.u32 1, %v3124_v36 }
 0x1ce   : > { %v7066_v62 = vmax.f32 %v6824_v45, %v2735_v60  ;;  %v7069_v14 = vmax.f32 %v6829_v57, %v2734_v5  ;;  %v3126_v60 = vshra.s32 %v6841_v33, 6  ;;  %v3189_v55 = vcvt.s32.f32 %v3157_v63 }
 0x1cf   : > { %3264 = vperm.xlu0 %4768, %v3182_v28   ;;  %v2640_v6 = vpop.permute.xlu1 %2639  ;;  %v2635_v17 = vpop.permute.xlu0 %2634  ;;  %v3188_v8 = vcvt.s32.f32 %v3156_v1 }
 0x1d0   : > { %v2737_v13 = vmul.f32 %v2640_v6, %v6824_v45  ;;  %v2736_v28 = vmul.f32 %v2635_v17, %v6829_v57  ;;  %v3159_v6 = vand.u32 1, %v3127_v31  ;;  %v3129_v57 = vshra.s32 %v6860_v24, 6 }
 0x1d1   : > { %3279 = vperm.xlu1 %4769, %v3185_v39   ;;  %v3158_v36 = vand.u32 1, %v3126_v60 }
 0x1d2   : > { %v7076_v59 = vmax.f32 %v6850_v50, %v2737_v13  ;;  %v7079_v5 = vmax.f32 %v6853_v42, %v2736_v28  ;;  %v3128_v13 = vshra.s32 %v6868_v32, 6  ;;  %v3191_v31 = vcvt.s32.f32 %v3159_v6 }
 0x1d3   : > { %3274 = vperm.xlu0 %4768, %v3184_v16   ;;  %v2650_v45 = vpop.permute.xlu1 %2649  ;;  %v2645_v25 = vpop.permute.xlu0 %2644  ;;  %v3190_v1 = vcvt.s32.f32 %v3158_v36 }
 0x1d4   : > { %v2739_v39 = vmul.f32 %v2650_v45, %v6850_v50  ;;  %v2738_v16 = vmul.f32 %v2645_v25, %v6853_v42  ;;  %v3161_v45 = vand.u32 1, %v3129_v57  ;;  %v3131_v42 = vshra.s32 %v6882_v34, 6  ;;  %v8364_v25 = vld [vmem:[#allocation46_spill] sm:$0xff]  ;;  %v8367_v34 = vld [vmem:[#allocation68_spill] sm:$0xff] }
 0x1d5   : > { %3289 = vperm.xlu1 %4769, %v3187_v12   ;;  %v3160_v60 = vand.u32 1, %v3128_v13 }
 0x1d6   : > { %v7086_v17 = vmax.f32 %v6872_v22, %v2739_v39  ;;  %v7089_v28 = vmax.f32 %v6878_v15, %v2738_v16  ;;  %v3130_v39 = vshra.s32 %v6887_v0, 6  ;;  %v3193_v57 = vcvt.s32.f32 %v3161_v45 }
 0x1d7   : > { %3284 = vperm.xlu0 %4768, %v3186_v43   ;;  %v2660_v50 = vpop.permute.xlu1 %2659  ;;  %v2655_v63 = vpop.permute.xlu0 %2654  ;;  %v3192_v36 = vcvt.s32.f32 %v3160_v60 }
 0x1d8   : > { %8363 = vst [vmem:[#allocation24_spill] sm:$0xff] %v7086_v17  ;;  %v2741_v12 = vmul.f32 %v2660_v50, %v6872_v22  ;;  %v2740_v43 = vmul.f32 %v2655_v63, %v6878_v15  ;;  %v3163_v50 = vand.u32 1, %v3131_v42  ;;  %v3133_v15 = vshra.s32 %v8367_v34, 6  ;;  %v8368_v63 = vld [vmem:[#allocation67_spill] sm:$0xff]  ;;  %v8373_v34 = vld [vmem:[#allocation17_spill] sm:$0xff] }
 0x1d9   : > { %3299 = vperm.xlu1 %4769, %v3189_v55   ;;  %v3162_v13 = vand.u32 1, %v3130_v39 }
 0x1da   : > { %v7096_v17 = vmax.f32 %v8364_v25, %v2741_v12  ;;  %v7099_v16 = vmax.f32 %v6894_v47, %v2740_v43  ;;  %v3132_v12 = vshra.s32 %v8368_v63, 6  ;;  %v8371_v43 = vld [vmem:[#allocation61_spill] sm:$0xff]  ;;  %v3195_v42 = vcvt.s32.f32 %v3163_v50 }
 0x1db   : > { %3294 = vperm.xlu0 %4768, %v3188_v8   ;;  %v2670_v22 = vpop.permute.xlu1 %2669  ;;  %v2665_v6 = vpop.permute.xlu0 %2664  ;;  %v3194_v60 = vcvt.s32.f32 %v3162_v13 }
 0x1dc   : > { %8365 = vst [vmem:[#allocation71_spill] sm:$0xff] %v7096_v17  ;;  %8366 = vst [vmem:[#allocation22_spill] sm:$0xff] %v7099_v16  ;;  %v2743_v55 = vmul.f32 %v2670_v22, %v8364_v25  ;;  %v2742_v8 = vmul.f32 %v2665_v6, %v6894_v47  ;;  %v8369_v17 = vld [vmem:[#allocation60_spill] sm:$0xff]  ;;  %v3165_v22 = vand.u32 1, %v3133_v15  ;;  %v3135_v47 = vshra.s32 %v8373_v34, 6  ;;  %v8374_v6 = vld [vmem:[#allocation51_spill] sm:$0xff] }
 0x1dd   : > { %3309 = vperm.xlu1 %4769, %v3191_v31   ;;  %v3164_v39 = vand.u32 1, %v3132_v12  ;;  %v8379_v34 = vld [vmem:[#allocation15_spill] sm:$0xff] }
 0x1de   : > { %v7106_v0 = vmax.f32 %v8369_v17, %v2743_v55  ;;  %v7109_v16 = vmax.f32 %v8371_v43, %v2742_v8  ;;  %v3134_v55 = vshra.s32 %v8374_v6, 6  ;;  %v8377_v8 = vld [vmem:[#allocation63_spill] sm:$0xff]  ;;  %v3197_v15 = vcvt.s32.f32 %v3165_v22 }
 0x1df   : > { %3304 = vperm.xlu0 %4768, %v3190_v1   ;;  %v2680_v25 = vpop.permute.xlu1 %2679  ;;  %v2675_v45 = vpop.permute.xlu0 %2674  ;;  %v3196_v13 = vcvt.s32.f32 %v3164_v39 }
 0x1e0   : > { %8370 = vst [vmem:[#allocation62_spill] sm:$0xff] %v7106_v0  ;;  %8372 = vst [vmem:[#allocation57_spill] sm:$0xff] %v7109_v16  ;;  %v2745_v31 = vmul.f32 %v2680_v25, %v8369_v17  ;;  %v2744_v1 = vmul.f32 %v2675_v45, %v8371_v43  ;;  %v8375_v0 = vld [vmem:[#allocation95_spill] sm:$0xff]  ;;  %v3167_v25 = vand.u32 1, %v3135_v47  ;;  %v3137_v43 = vshra.s32 %v8379_v34, 6  ;;  %v8380_v45 = vld [vmem:[#allocation64_spill] sm:$0xff] }
 0x1e1   : > { %3319 = vperm.xlu1 %4769, %v3193_v57   ;;  %v3166_v12 = vand.u32 1, %v3134_v55  ;;  %v8384_v34 = vld [vmem:[#allocation52_spill] sm:$0xff] }
 0x1e2   : > { %v7116_v63 = vmax.f32 %v8375_v0, %v2745_v31  ;;  %v7119_v16 = vmax.f32 %v8377_v8, %v2744_v1  ;;  %v3136_v31 = vshra.s32 %v8380_v45, 6  ;;  %v8382_v1 = vld [vmem:[#allocation42_spill] sm:$0xff]  ;;  %v3199_v47 = vcvt.s32.f32 %v3167_v25 }
 0x1e3   : > { %3314 = vperm.xlu0 %4768, %v3192_v36   ;;  %v2690_v17 = vpop.permute.xlu1 %2689  ;;  %v2685_v50 = vpop.permute.xlu0 %2684  ;;  %v3198_v39 = vcvt.s32.f32 %v3166_v12 }
 0x1e4   : > { %8376 = vst [vmem:[#allocation72_spill] sm:$0xff] %v7116_v63  ;;  %8378 = vst [vmem:[#allocation35_spill] sm:$0xff] %v7119_v16  ;;  %v2747_v57 = vmul.f32 %v2690_v17, %v8375_v0  ;;  %v2746_v36 = vmul.f32 %v2685_v50, %v8377_v8  ;;  %v8381_v63 = vld [vmem:[#allocation18_spill] sm:$0xff]  ;;  %v3169_v17 = vand.u32 1, %v3137_v43  ;;  %v3427_v8 = vshra.s32 %v8384_v34, 7 }
 0x1e5   : > { %3329 = vperm.xlu1 %4769, %v3195_v42   ;;  %v3168_v55 = vand.u32 1, %v3136_v31 }
 0x1e6   : > { %v7126_v6 = vmax.f32 %v8381_v63, %v2747_v57  ;;  %v7129_v16 = vmax.f32 %v8382_v1, %v2746_v36  ;;  %v3426_v57 = vshra.s32 %v6949_v27, 7  ;;  %v3201_v25 = vcvt.s32.f32 %v3169_v17 }
 0x1e7   : > { %3324 = vperm.xlu0 %4768, %v3194_v60   ;;  %v2700_v0 = vpop.permute.xlu1 %2699  ;;  %v2695_v22 = vpop.permute.xlu0 %2694  ;;  %v3459_v43 = vand.u32 1, %v3427_v8  ;;  %v3200_v31 = vcvt.s32.f32 %v3168_v55 }
 0x1e8   : > { %8383 = vst [vmem:[#allocation97_spill] sm:$0xff] %v7129_v16  ;;  %v2749_v42 = vmul.f32 %v2700_v0, %v8381_v63  ;;  %v2748_v60 = vmul.f32 %v2695_v22, %v8382_v1  ;;  %v8386_v1 = vld [vmem:[#allocation65_spill] sm:$0xff]  ;;  %v3458_v0 = vand.u32 1, %v3426_v57 }
 0x1e9   : > { %3339 = vperm.xlu1 %4769, %v3197_v15   ;;  %v3491_v8 = vcvt.s32.f32 %v3459_v43 }
 0x1ea   : > { %v7136_v50 = vmax.f32 %v7003_v20, %v2749_v42  ;;  %v7139_v16 = vmax.f32 %v7006_v21, %v2748_v60  ;;  %v8388_v42 = vld [vmem:[#allocation66_spill] sm:$0xff]  ;;  %v3490_v57 = vcvt.s32.f32 %v3458_v0 }
 0x1eb   : > { %3334 = vperm.xlu0 %4768, %v3196_v13   ;;  %v2710_v36 = vpop.permute.xlu1 %2709  ;;  %v2705_v15 = vpop.permute.xlu0 %2704  ;;  %v3429_v13 = vshra.s32 %v8386_v1, 7  ;;  %v3428_v22 = vshra.s32 %v8388_v42, 7  ;;  %v8391_v42 = vld [vmem:[#allocation69_spill] sm:$0xff] }
 0x1ec   : > { %8385 = vst [vmem:[#allocation36_spill] sm:$0xff] %v7139_v16  ;;  %v7142_v63 = vmul.f32 %v2710_v36, %v7003_v20  ;;  %v7146_v12 = vmul.f32 %v2705_v15, %v7006_v21  ;;  %v8390_v15 = vld [vmem:[#allocation3_spill] sm:$0xff]  ;;  %v3430_v60 = vshra.s32 %v8391_v42, 7  ;;  %v3432_v42 = vshra.s32 %v6999_v35, 7 }
 0x1ed   : > { %3349 = vperm.xlu1 %4769, %v3199_v47   ;;  %v3461_v21 = vand.u32 1, %v3429_v13  ;;  %v3460_v16 = vand.u32 1, %v3428_v22  ;;  %v2723_v20 = vmul.f32 0.0, %v6990_v9 }
 0x1ee   : > { %8387 = vst [vmem:[#allocation73_spill] sm:$0xff] %v7146_v12  ;;  %v3462_v22 = vand.u32 1, %v3430_v60 }
 0x1ef   : > { %3344 = vperm.xlu0 %4768, %v3198_v39   ;;  %v2720_v36 = vpop.permute.xlu1 %2719  ;;  %v2715_v17 = vpop.permute.xlu0 %2714  ;;  %v3431_v39 = vshra.s32 %v8390_v15, 7  ;;  %v3493_v13 = vcvt.s32.f32 %v3461_v21  ;;  %v3492_v0 = vcvt.s32.f32 %v3460_v16  ;;  %v3435_v21 = vshra.s32 %v6718_v4, 7 }
 0x1f0   : > { %v7154_v47 = vmul.f32 %v2720_v36, %v6963_v10  ;;  %v2752_v55 = vmul.f32 %v2715_v17, %v6966_v11  ;;  %v8392_v36 = vmax.f32 %v6875_v61, %v6975_v23  ;;  %v3434_v16 = vshra.s32 %v6722_v19, 7 }
 0x1f1   : > { %3359 = vperm.xlu1 %4769, %v3201_v25   ;;  %v3463_v17 = vand.u32 1, %v3431_v39  ;;  %v3494_v39 = vcvt.s32.f32 %v3462_v22  ;;  %v7181_v60 = vmax.f32 %v6712_v37, %v2723_v20  ;;  %v3437_v4 = vshra.s32 %v6732_v53, 7  ;;  %v8396_v22 = vld [vmem:[#allocation32_spill] sm:$0xff] }
 0x1f2   : > { %8389 = vst [vmem:[#allocation74_spill] sm:$0xff] %v7154_v47  ;;  %v7164_v12 = vmax.f32 %v8392_v36, %v2752_v55  ;;  %v8393_v47 = vld [vmem:[#allocation70_spill] sm:$0xff]  ;;  %v3466_v19 = vand.u32 1, %v3434_v16  ;;  %v3436_v37 = vshra.s32 %v6738_v38, 7 }
 0x1f3   : > { %3354 = vperm.xlu0 %4768, %v3200_v31   ;;  %v7166_v25 = vpop.permute.xlu1 %2889  ;;  %v3433_v31 = vshra.s32 %v6995_v49, 7  ;;  %v2722_v61 = vmul.f32 0.0, %v8393_v47  ;;  %v3495_v36 = vcvt.s32.f32 %v3463_v17  ;;  %v3467_v17 = vand.u32 1, %v3435_v21  ;;  %v8397_v21 = vld [vmem:[#allocation55_spill] sm:$0xff] }
 0x1f4   : > { %v7168_v43 = vpop.permute.xlu0 %2884  ;;  %v3469_v53 = vand.u32 1, %v3437_v4  ;;  %v3498_v16 = vcvt.s32.f32 %v3466_v19  ;;  %v3468_v38 = vand.u32 1, %v3436_v37  ;;  %v3440_v37 = vshra.s32 %v8362_v2, 7 }
 0x1f5   : > { %3529 = vperm.xlu1 %4769, %v3491_v8   ;;  %v3465_v8 = vand.u32 1, %v3433_v31  ;;  %v7184_v9 = vmax.f32 %v7009_v18, %v2722_v61 }
 0x1f6   : > { %v3501_v4 = vcvt.s32.f32 %v3469_v53  ;;  %v3500_v19 = vcvt.s32.f32 %v3468_v38  ;;  %v3472_v2 = vand.u32 1, %v3440_v37 }
 0x1f7   : > { %3524 = vperm.xlu0 %4768, %v3490_v57   ;;  %v7174_v23 = vpop.permute.xlu1 %2899  ;;  %v3464_v57 = vand.u32 1, %v3432_v42 }
 0x1f9   : > { %3539 = vperm.xlu1 %4769, %v3493_v13   ;;  %v3497_v13 = vcvt.s32.f32 %v3465_v8  ;;  %v3496_v42 = vcvt.s32.f32 %v3464_v57  ;;  %v3499_v8 = vcvt.s32.f32 %v3467_v17 }
 0x1fa   : > { %v7176_v55 = vpop.permute.xlu0 %2894 }
 0x1fb   : > { %8394 = vst [vmem:[#allocation20_spill] sm:$0xff] %v7176_v55  ;;  %3534 = vperm.xlu0 %4768, %v3492_v0  }
 0x1fc   : > { %v2910_v47 = vpop.permute.xlu1 %2909 }
 0x1fd   : > { %v3047_v35 = vmul.f32 %v2910_v47, %v7181_v60  ;;  %3549 = vperm.xlu1 %4769, %v3495_v36   ;;  %v8399_v47 = vld [vmem:[#allocation82_spill] sm:$0xff] }
 0x1fe   : > { %v2905_v55 = vpop.permute.xlu0 %2904 }
 0x1ff   : > { %v3046_v31 = vmul.f32 %v2905_v55, %v7184_v9  ;;  %3544 = vperm.xlu0 %4768, %v3494_v39   ;;  %v7191_v20 = vmax.f32 %v7026_v54, %v3047_v35  ;;  %v3439_v55 = vshra.s32 %v8397_v21, 7  ;;  %v8398_v39 = vld [vmem:[#allocation8_spill] sm:$0xff]  ;;  %v3438_v35 = vshra.s32 %v6757_v3, 7 }
 0x200   : > { %v2920_v0 = vpop.permute.xlu1 %2919 }
 0x201   : > { %8395 = vst [vmem:[#allocation89_spill] sm:$0xff] %v7191_v20  ;;  %v7194_v18 = vmax.f32 %v7029_v26, %v3046_v31  ;;  %v3049_v61 = vmul.f32 %v2920_v0, %v8396_v22  ;;  %3559 = vperm.xlu1 %4769, %v3497_v13   ;;  %v3471_v21 = vand.u32 1, %v3439_v55  ;;  %v3470_v3 = vand.u32 1, %v3438_v35 }
 0x202   : > { %v2915_v36 = vpop.permute.xlu0 %2914  ;;  %v3442_v35 = vshra.s32 %v6789_v52, 7 }
 0x203   : > { %v3048_v57 = vmul.f32 %v2915_v36, %v8398_v39  ;;  %3554 = vperm.xlu0 %4768, %v3496_v42   ;;  %v7201_v20 = vmax.f32 %v8399_v47, %v3049_v61  ;;  %v3441_v36 = vshra.s32 %v8361_v51, 7  ;;  %v3503_v55 = vcvt.s32.f32 %v3471_v21 }
 0x204   : > { %v2930_v0 = vpop.permute.xlu1 %2929  ;;  %v3502_v38 = vcvt.s32.f32 %v3470_v3  ;;  %v3474_v52 = vand.u32 1, %v3442_v35 }
 0x205   : > { %v7204_v31 = vmax.f32 %v7039_v40, %v3048_v57  ;;  %v3051_v13 = vmul.f32 %v2930_v0, %v7026_v54  ;;  %3569 = vperm.xlu1 %4769, %v3499_v8   ;;  %v3473_v51 = vand.u32 1, %v3441_v36 }
 0x206   : > { %v2925_v17 = vpop.permute.xlu0 %2924 }
 0x207   : > { %v3050_v42 = vmul.f32 %v2925_v17, %v7029_v26  ;;  %3564 = vperm.xlu0 %4768, %v3498_v16   ;;  %v7211_v61 = vmax.f32 %v7046_v56, %v3051_v13  ;;  %v3443_v26 = vshra.s32 %v6785_v44, 7  ;;  %v3505_v21 = vcvt.s32.f32 %v3473_v51 }
 0x208   : > { %v2940_v54 = vpop.permute.xlu1 %2939  ;;  %v3506_v51 = vcvt.s32.f32 %v3474_v52 }
 0x209   : > { %v7214_v57 = vmax.f32 %v7049_v46, %v3050_v42  ;;  %v3053_v8 = vmul.f32 %v2940_v54, %v8399_v47  ;;  %3579 = vperm.xlu1 %4769, %v3501_v4   ;;  %v3475_v44 = vand.u32 1, %v3443_v26  ;;  %v3504_v42 = vcvt.s32.f32 %v3472_v2 }
 0x20a   : > { %v2935_v53 = vpop.permute.xlu0 %2934  ;;  %v3446_v26 = vshra.s32 %v6841_v33, 7 }
 0x20b   : > { %v3052_v16 = vmul.f32 %v2935_v53, %v7039_v40  ;;  %3574 = vperm.xlu0 %4768, %v3500_v19   ;;  %v7221_v0 = vmax.f32 %v7056_v30, %v3053_v8  ;;  %v3445_v40 = vshra.s32 %v6807_v29, 7  ;;  %v3444_v19 = vshra.s32 %v6818_v41, 7 }
 0x20c   : > { %v2950_v47 = vpop.permute.xlu1 %2949  ;;  %v3507_v53 = vcvt.s32.f32 %v3475_v44  ;;  %v3478_v33 = vand.u32 1, %v3446_v26  ;;  %v8400_v44 = vld [vmem:[#allocation24_spill] sm:$0xff] }
 0x20d   : > { %v7224_v13 = vmax.f32 %v7059_v7, %v3052_v16  ;;  %v3055_v17 = vmul.f32 %v2950_v47, %v7046_v56  ;;  %3589 = vperm.xlu1 %4769, %v3503_v55   ;;  %v3477_v29 = vand.u32 1, %v3445_v40  ;;  %v3476_v41 = vand.u32 1, %v3444_v19 }
 0x20e   : > { %v2945_v4 = vpop.permute.xlu0 %2944 }
 0x20f   : > { %v3054_v36 = vmul.f32 %v2945_v4, %v7049_v46  ;;  %3584 = vperm.xlu0 %4768, %v3502_v38   ;;  %v7231_v3 = vmax.f32 %v7066_v62, %v3055_v17  ;;  %v3447_v46 = vshra.s32 %v6836_v48, 7  ;;  %v3509_v47 = vcvt.s32.f32 %v3477_v29 }
 0x210   : > { %v2960_v56 = vpop.permute.xlu1 %2959  ;;  %v3508_v4 = vcvt.s32.f32 %v3476_v41 }
 0x211   : > { %v7234_v37 = vmax.f32 %v7069_v14, %v3054_v36  ;;  %v3057_v54 = vmul.f32 %v2960_v56, %v7056_v30  ;;  %3599 = vperm.xlu1 %4769, %v3505_v21   ;;  %v3479_v48 = vand.u32 1, %v3447_v46  ;;  %v3448_v21 = vshra.s32 %v6868_v32, 7  ;;  %v8401_v56 = vld [vmem:[#allocation16_spill] sm:$0xff]  ;;  %v8403_v46 = vld [vmem:[#allocation71_spill] sm:$0xff] }
 0x212   : > { %v2955_v8 = vpop.permute.xlu0 %2954 }
 0x213   : > { %v3056_v55 = vmul.f32 %v2955_v8, %v7059_v7  ;;  %3594 = vperm.xlu0 %4768, %v3504_v42   ;;  %v7241_v16 = vmax.f32 %v7076_v59, %v3057_v54  ;;  %v3449_v7 = vshra.s32 %v6860_v24, 7  ;;  %v3511_v19 = vcvt.s32.f32 %v3479_v48 }
 0x214   : > { %v2970_v30 = vpop.permute.xlu1 %2969  ;;  %v3510_v8 = vcvt.s32.f32 %v3478_v33  ;;  %v3480_v32 = vand.u32 1, %v3448_v21  ;;  %v8407_v21 = vld [vmem:[#allocation62_spill] sm:$0xff] }
 0x215   : > { %v7244_v38 = vmax.f32 %v7079_v5, %v3056_v55  ;;  %v3059_v2 = vmul.f32 %v2970_v30, %v7066_v62  ;;  %3609 = vperm.xlu1 %4769, %v3507_v53   ;;  %v3481_v24 = vand.u32 1, %v3449_v7  ;;  %v8402_v53 = vld [vmem:[#allocation59_spill] sm:$0xff] }
 0x216   : > { %v2965_v35 = vpop.permute.xlu0 %2964  ;;  %v3450_v29 = vshra.s32 %v8402_v53, 7  ;;  %v3512_v7 = vcvt.s32.f32 %v3480_v32 }
 0x217   : > { %v3058_v17 = vmul.f32 %v2965_v35, %v7069_v14  ;;  %3604 = vperm.xlu0 %4768, %v3506_v51   ;;  %v7251_v40 = vmax.f32 %v8400_v44, %v3059_v2  ;;  %v3451_v14 = vshra.s32 %v8401_v56, 7  ;;  %v8404_v51 = vld [vmem:[#allocation22_spill] sm:$0xff]  ;;  %v3513_v2 = vcvt.s32.f32 %v3481_v24 }
 0x218   : > { %v2980_v62 = vpop.permute.xlu1 %2979 }
 0x219   : > { %v7254_v36 = vmax.f32 %v7089_v28, %v3058_v17  ;;  %v3061_v42 = vmul.f32 %v2980_v62, %v7076_v59  ;;  %3619 = vperm.xlu1 %4769, %v3509_v47   ;;  %v3483_v35 = vand.u32 1, %v3451_v14  ;;  %v8405_v47 = vld [vmem:[#allocation68_spill] sm:$0xff]  ;;  %v3482_v17 = vand.u32 1, %v3450_v29  ;;  %v8410_v29 = vld [vmem:[#allocation51_spill] sm:$0xff] }
 0x21a   : > { %v2975_v52 = vpop.permute.xlu0 %2974 }
 0x21b   : > { %v3060_v54 = vmul.f32 %v2975_v52, %v7079_v5  ;;  %3614 = vperm.xlu0 %4768, %v3508_v4   ;;  %v7261_v55 = vmax.f32 %v8403_v46, %v3061_v42  ;;  %v3453_v5 = vshra.s32 %v8405_v47, 7  ;;  %v8406_v4 = vld [vmem:[#allocation67_spill] sm:$0xff]  ;;  %v8408_v42 = vld [vmem:[#allocation57_spill] sm:$0xff]  ;;  %v3515_v56 = vcvt.s32.f32 %v3483_v35 }
 0x21c   : > { %v2990_v59 = vpop.permute.xlu1 %2989  ;;  %v3452_v33 = vshra.s32 %v8406_v4, 7  ;;  %v3514_v32 = vcvt.s32.f32 %v3482_v17  ;;  %v8412_v47 = vld [vmem:[#allocation35_spill] sm:$0xff] }
 0x21d   : > { %v7264_v41 = vmax.f32 %v8404_v51, %v3060_v54  ;;  %v3063_v26 = vmul.f32 %v2990_v59, %v8400_v44  ;;  %3629 = vperm.xlu1 %4769, %v3511_v19   ;;  %v3485_v14 = vand.u32 1, %v3453_v5  ;;  %v8409_v54 = vld [vmem:[#allocation17_spill] sm:$0xff]  ;;  %v3454_v59 = vshra.s32 %v8410_v29, 7 }
 0x21e   : > { %v2985_v30 = vpop.permute.xlu0 %2984  ;;  %v3484_v53 = vand.u32 1, %v3452_v33 }
 0x21f   : > { %v3062_v48 = vmul.f32 %v2985_v30, %v7089_v28  ;;  %3624 = vperm.xlu0 %4768, %v3510_v8   ;;  %v7271_v62 = vmax.f32 %v8407_v21, %v3063_v26  ;;  %v3455_v28 = vshra.s32 %v8409_v54, 7  ;;  %v8411_v26 = vld [vmem:[#allocation72_spill] sm:$0xff]  ;;  %v3517_v5 = vcvt.s32.f32 %v3485_v14  ;;  %v8420_v54 = vld [vmem:[#allocation69_spill] sm:$0xff] }
 0x220   : > { %v3000_v44 = vpop.permute.xlu1 %2999  ;;  %v3516_v33 = vcvt.s32.f32 %v3484_v53 }
 0x221   : > { %v7274_v52 = vmax.f32 %v8408_v42, %v3062_v48  ;;  %v3065_v19 = vmul.f32 %v3000_v44, %v8403_v46  ;;  %3639 = vperm.xlu1 %4769, %v3513_v2   ;;  %v3487_v4 = vand.u32 1, %v3455_v28  ;;  %v3486_v44 = vand.u32 1, %v3454_v59 }
 0x222   : > { %v2995_v24 = vpop.permute.xlu0 %2994  ;;  %v3746_v59 = vshra.s32 %v6949_v27, 8 }
 0x223   : > { %v3064_v8 = vmul.f32 %v2995_v24, %v8404_v51  ;;  %3634 = vperm.xlu0 %4768, %v3512_v7   ;;  %v7281_v30 = vmax.f32 %v8411_v26, %v3065_v19  ;;  %v8413_v51 = vld [vmem:[#allocation15_spill] sm:$0xff]  ;;  %v3456_v19 = vshra.s32 %v8380_v45, 7  ;;  %v3519_v28 = vcvt.s32.f32 %v3487_v4  ;;  %v8416_v4 = vld [vmem:[#allocation36_spill] sm:$0xff] }
 0x224   : > { %v3010_v46 = vpop.permute.xlu1 %3009  ;;  %v3457_v7 = vshra.s32 %v8413_v51, 7  ;;  %v3518_v45 = vcvt.s32.f32 %v3486_v44  ;;  %v8415_v51 = vld [vmem:[#allocation66_spill] sm:$0xff] }
 0x225   : > { %v7284_v48 = vmax.f32 %v8412_v47, %v3064_v8  ;;  %v7287_v2 = vmul.f32 %v3010_v46, %v8407_v21  ;;  %3649 = vperm.xlu1 %4769, %v3515_v56   ;;  %v8414_v21 = vld [vmem:[#allocation97_spill] sm:$0xff]  ;;  %v3488_v29 = vand.u32 1, %v3456_v19 }
 0x226   : > { %v3005_v35 = vpop.permute.xlu0 %3004 }
 0x227   : > { %v7291_v17 = vmul.f32 %v3005_v35, %v8408_v42  ;;  %3644 = vperm.xlu0 %4768, %v3514_v32   ;;  %v3489_v42 = vand.u32 1, %v3457_v7  ;;  %v3747_v32 = vshra.s32 %v8384_v34, 8  ;;  %v3520_v27 = vcvt.s32.f32 %v3488_v29  ;;  %v8418_v7 = vld [vmem:[#allocation73_spill] sm:$0xff] }
 0x228   : > { %v3020_v8 = vpop.permute.xlu1 %3019  ;;  %v8419_v46 = vmax.f32 %v6966_v11, %v8418_v7 }
 0x229   : > { %v7299_v56 = vmul.f32 %v3020_v8, %v8411_v26  ;;  %3659 = vperm.xlu1 %4769, %v3517_v5   ;;  %v3749_v26 = vshra.s32 %v8386_v1, 8  ;;  %v3748_v5 = vshra.s32 %v8415_v51, 8  ;;  %v3779_v44 = vand.u32 1, %v3747_v32 }
 0x22a   : > { %v3015_v14 = vpop.permute.xlu0 %3014  ;;  %v3778_v8 = vand.u32 1, %v3746_v59  ;;  %v3751_v51 = vshra.s32 %v8390_v15, 8 }
 0x22b   : > { %v7303_v53 = vmul.f32 %v3015_v14, %v8412_v47  ;;  %3654 = vperm.xlu0 %4768, %v3516_v33   ;;  %v3521_v33 = vcvt.s32.f32 %v3489_v42  ;;  %v8417_v14 = vmax.f32 %v6963_v10, %v7142_v63  ;;  %v3781_v42 = vand.u32 1, %v3749_v26 }
 0x22c   : > { %v3030_v35 = vpop.permute.xlu1 %3029  ;;  %v3780_v32 = vand.u32 1, %v3748_v5  ;;  %v3811_v10 = vcvt.s32.f32 %v3779_v44  ;;  %v3042_v63 = vmul.f32 0.0, %v7168_v43  ;;  %v3810_v11 = vcvt.s32.f32 %v3778_v8 }
 0x22d   : > { %v3071_v34 = vmul.f32 %v3030_v35, %v7126_v6  ;;  %3669 = vperm.xlu1 %4769, %v3519_v28  }
 0x22e   : > { %v3025_v47 = vpop.permute.xlu0 %3024 }
 0x22f   : > { %v3070_v19 = vmul.f32 %v3025_v47, %v8414_v21  ;;  %3664 = vperm.xlu0 %4768, %v3518_v45   ;;  %v7317_v1 = vmax.f32 %v8417_v14, %v3071_v34  ;;  %v3750_v47 = vshra.s32 %v8420_v54, 8  ;;  %v3043_v45 = vmul.f32 0.0, %v7166_v25 }
 0x230   : > { %v3040_v28 = vpop.permute.xlu1 %3039  ;;  %v3783_v54 = vand.u32 1, %v3751_v51  ;;  %v3813_v34 = vcvt.s32.f32 %v3781_v42  ;;  %v7345_v14 = vmax.f32 %v7184_v9, %v3042_v63  ;;  %v8423_v51 = vld [vmem:[#allocation20_spill] sm:$0xff] }
 0x231   : > { %v7323_v35 = vmax.f32 %v8419_v46, %v3070_v19  ;;  %v3073_v29 = vmul.f32 %v3040_v28, %v7136_v50  ;;  %3679 = vperm.xlu1 %4769, %v3521_v33   ;;  %v8421_v46 = vld [vmem:[#allocation74_spill] sm:$0xff]  ;;  %v3812_v33 = vcvt.s32.f32 %v3780_v32  ;;  %v3782_v44 = vand.u32 1, %v3750_v47  ;;  %v8424_v42 = vld [vmem:[#allocation4_spill] sm:$0xff] }
 0x232   : > { %v3035_v59 = vpop.permute.xlu0 %3034  ;;  %v8422_v26 = vmax.f32 %v6985_v58, %v8421_v46  ;;  %v7340_v43 = vmax.f32 %v7181_v60, %v3043_v45  ;;  %v3045_v19 = vmul.f32 0.0, %v7174_v23  ;;  %v3753_v58 = vshra.s32 %v6995_v49, 8 }
 0x233   : > { %v7330_v15 = vmul.f32 %v3035_v59, %v8416_v4  ;;  %3674 = vperm.xlu0 %4768, %v3520_v27   ;;  %v3044_v28 = vmul.f32 0.0, %v8423_v51  ;;  %v3752_v32 = vshra.s32 %v8424_v42, 8  ;;  %v3815_v45 = vcvt.s32.f32 %v3783_v54 }
 0x234   : > { %v7335_v5 = vmax.f32 %v8422_v26, %v3073_v29  ;;  %v3210_v7 = vpop.permute.xlu1 %3209  ;;  %v3814_v49 = vcvt.s32.f32 %v3782_v44  ;;  %v7356_v59 = vmax.f32 %v8396_v22, %v3045_v19  ;;  %v3785_v63 = vand.u32 1, %v3753_v58 }
 0x235   : > { %v3363_v27 = vmul.f32 0.0, %v3210_v7  ;;  %3856 = vperm.xlu1 %4769, %v3811_v10   ;;  %v7360_v26 = vmax.f32 %v8398_v39, %v3044_v28  ;;  %v4833_v39 = vld [vmem:[%s4911_s28 + $0x58] sm:$0xff] }
 0x236   : > { %v3205_v8 = vpop.permute.xlu0 %3204  ;;  %v3817_v51 = vcvt.s32.f32 %v3785_v63  ;;  %v3757_v28 = vshra.s32 %v4833_v39, 8  ;;  %v4835_v39 = vld [vmem:[%s4911_s28 + $0x68] sm:$0xff] }
 0x237   : > { %v3362_v29 = vmul.f32 0.0, %v3205_v8  ;;  %3851 = vperm.xlu0 %4768, %v3810_v11   ;;  %v7350_v60 = vmax.f32 %v7340_v43, %v3363_v27  ;;  %v4831_v11 = vld [vmem:[%s4911_s28 + $0x48] sm:$0xff]  ;;  %v3784_v27 = vand.u32 1, %v3752_v32  ;;  %v4832_v8 = vld [vmem:[%s4911_s28 + $0x40] sm:$0xff] }
 0x238   : > { %v3220_v47 = vpop.permute.xlu1 %3219  ;;  %v3755_v46 = vshra.s32 %v4831_v11, 8  ;;  %v3754_v54 = vshra.s32 %v4832_v8, 8 }
 0x239   : > { %v7353_v23 = vmax.f32 %v7345_v14, %v3362_v29  ;;  %v3365_v9 = vmul.f32 0.0, %v3220_v47  ;;  %3866 = vperm.xlu1 %4769, %v3813_v34   ;;  %v3816_v42 = vcvt.s32.f32 %v3784_v27  ;;  %v4834_v47 = vld [vmem:[%s4911_s28 + $0x50] sm:$0xff] }
 0x23a   : > { %v3215_v10 = vpop.permute.xlu0 %3214  ;;  %v3787_v29 = vand.u32 1, %v3755_v46  ;;  %v3786_v32 = vand.u32 1, %v3754_v54 }
 0x23b   : > { %v3364_v7 = vmul.f32 0.0, %v3215_v10  ;;  %3861 = vperm.xlu0 %4768, %v3812_v33   ;;  %v7364_v44 = vmax.f32 %v7356_v59, %v3365_v9  ;;  %v3756_v9 = vshra.s32 %v4834_v47, 8  ;;  %v8425_v10 = vld [vmem:[#allocation89_spill] sm:$0xff]  ;;  %v4836_v47 = vld [vmem:[%s4911_s28 + $0x60] sm:$0xff] }
 0x23c   : > { %v3230_v34 = vpop.permute.xlu1 %3229  ;;  %v3819_v46 = vcvt.s32.f32 %v3787_v29  ;;  %v3818_v54 = vcvt.s32.f32 %v3786_v32 }
 0x23d   : > { %v7367_v22 = vmax.f32 %v7360_v26, %v3364_v7  ;;  %v3367_v19 = vmul.f32 0.0, %v3230_v34  ;;  %3876 = vperm.xlu1 %4769, %v3815_v45   ;;  %v3789_v34 = vand.u32 1, %v3757_v28 }
 0x23e   : > { %v3225_v58 = vpop.permute.xlu0 %3224 }
 0x23f   : > { %v3366_v33 = vmul.f32 0.0, %v3225_v58  ;;  %3871 = vperm.xlu0 %4768, %v3814_v49   ;;  %v7372_v11 = vmax.f32 %v8425_v10, %v3367_v19  ;;  %v3759_v49 = vshra.s32 %v4835_v39, 8  ;;  %v3788_v58 = vand.u32 1, %v3756_v9 }
 0x240   : > { %v3240_v8 = vpop.permute.xlu1 %3239  ;;  %v3758_v19 = vshra.s32 %v4836_v47, 8  ;;  %v3821_v28 = vcvt.s32.f32 %v3789_v34 }
 0x241   : > { %v7375_v7 = vmax.f32 %v7194_v18, %v3366_v33  ;;  %v3369_v45 = vmul.f32 0.0, %v3240_v8  ;;  %3886 = vperm.xlu1 %4769, %v3817_v51   ;;  %v3791_v39 = vand.u32 1, %v3759_v49  ;;  %v3820_v9 = vcvt.s32.f32 %v3788_v58 }
 0x242   : > { %v3235_v63 = vpop.permute.xlu0 %3234  ;;  %v3790_v47 = vand.u32 1, %v3758_v19 }
 0x243   : > { %v3368_v27 = vmul.f32 0.0, %v3235_v63  ;;  %3881 = vperm.xlu0 %4768, %v3816_v42   ;;  %v7380_v25 = vmax.f32 %v7201_v20, %v3369_v45  ;;  %v4837_v63 = vld [vmem:[%s4911_s28 + $0x78] sm:$0xff]  ;;  %v4838_v45 = vld [vmem:[%s4911_s28 + $0x70] sm:$0xff] }
 0x244   : > { %v3250_v8 = vpop.permute.xlu1 %3249  ;;  %v3761_v42 = vshra.s32 %v4837_v63, 8  ;;  %v3760_v24 = vshra.s32 %v4838_v45, 8  ;;  %v3822_v19 = vcvt.s32.f32 %v3790_v47 }
 0x245   : > { %v7383_v33 = vmax.f32 %v7204_v31, %v3368_v27  ;;  %v3371_v51 = vmul.f32 %v3250_v8, %v7340_v43  ;;  %3896 = vperm.xlu1 %4769, %v3819_v46   ;;  %v3823_v8 = vcvt.s32.f32 %v3791_v39 }
 0x246   : > { %v3245_v29 = vpop.permute.xlu0 %3244  ;;  %v3793_v63 = vand.u32 1, %v3761_v42 }
 0x247   : > { %v3370_v32 = vmul.f32 %v3245_v29, %v7345_v14  ;;  %3891 = vperm.xlu0 %4768, %v3818_v54   ;;  %v7390_v27 = vmax.f32 %v7211_v61, %v3371_v51  ;;  %v4839_v14 = vld [vmem:[%s4911_s28 + $0x88] sm:$0xff]  ;;  %v3792_v29 = vand.u32 1, %v3760_v24  ;;  %v4840_v51 = vld [vmem:[%s4911_s28 + $0x80] sm:$0xff] }
 0x248   : > { %v3260_v46 = vpop.permute.xlu1 %3259  ;;  %v3763_v54 = vshra.s32 %v4839_v14, 8  ;;  %v3762_v45 = vshra.s32 %v4840_v51, 8 }
 0x249   : > { %v7393_v43 = vmax.f32 %v7214_v57, %v3370_v32  ;;  %v3373_v34 = vmul.f32 %v3260_v46, %v7356_v59  ;;  %3906 = vperm.xlu1 %4769, %v3821_v28   ;;  %v3825_v46 = vcvt.s32.f32 %v3793_v63  ;;  %v3824_v47 = vcvt.s32.f32 %v3792_v29 }
 0x24a   : > { %v3255_v49 = vpop.permute.xlu0 %3254  ;;  %v3795_v14 = vand.u32 1, %v3763_v54 }
 0x24b   : > { %v3372_v58 = vmul.f32 %v3255_v49, %v7360_v26  ;;  %3901 = vperm.xlu0 %4768, %v3820_v9   ;;  %v7400_v32 = vmax.f32 %v7221_v0, %v3373_v34  ;;  %v4841_v26 = vld [vmem:[%s4911_s28 + $0x98] sm:$0xff]  ;;  %v3794_v49 = vand.u32 1, %v3762_v45  ;;  %v4842_v34 = vld [vmem:[%s4911_s28 + $0x90] sm:$0xff] }
 0x24c   : > { %v3270_v28 = vpop.permute.xlu1 %3269  ;;  %v3765_v9 = vshra.s32 %v4841_v26, 8  ;;  %v3764_v51 = vshra.s32 %v4842_v34, 8 }
 0x24d   : > { %v7403_v59 = vmax.f32 %v7224_v13, %v3372_v58  ;;  %v3375_v39 = vmul.f32 %v3270_v28, %v8425_v10  ;;  %3916 = vperm.xlu1 %4769, %v3823_v8   ;;  %v3827_v28 = vcvt.s32.f32 %v3795_v14  ;;  %v3826_v45 = vcvt.s32.f32 %v3794_v49 }
 0x24e   : > { %v3265_v42 = vpop.permute.xlu0 %3264  ;;  %v3797_v26 = vand.u32 1, %v3765_v9 }
 0x24f   : > { %v3374_v24 = vmul.f32 %v3265_v42, %v7194_v18  ;;  %3911 = vperm.xlu0 %4768, %v3822_v19   ;;  %v7410_v58 = vmax.f32 %v7231_v3, %v3375_v39  ;;  %v4843_v18 = vld [vmem:[%s4911_s28 + $0xa8] sm:$0xff]  ;;  %v3796_v42 = vand.u32 1, %v3764_v51  ;;  %v4844_v39 = vld [vmem:[%s4911_s28 + $0xa0] sm:$0xff] }
 0x250   : > { %v3280_v8 = vpop.permute.xlu1 %3279  ;;  %v3767_v19 = vshra.s32 %v4843_v18, 8  ;;  %v3766_v34 = vshra.s32 %v4844_v39, 8  ;;  %v4846_v18 = vld [vmem:[%s4911_s28 + $0xb0] sm:$0xff] }
 0x251   : > { %v7413_v10 = vmax.f32 %v7234_v37, %v3374_v24  ;;  %v3377_v63 = vmul.f32 %v3280_v8, %v7201_v20  ;;  %3926 = vperm.xlu1 %4769, %v3825_v46   ;;  %v3829_v8 = vcvt.s32.f32 %v3797_v26 }
 0x252   : > { %v3275_v54 = vpop.permute.xlu0 %3274 }
 0x253   : > { %v3376_v29 = vmul.f32 %v3275_v54, %v7204_v31  ;;  %3921 = vperm.xlu0 %4768, %v3824_v47   ;;  %v7420_v24 = vmax.f32 %v7241_v16, %v3377_v63  ;;  %v3799_v31 = vand.u32 1, %v3767_v19  ;;  %v4845_v47 = vld [vmem:[%s4911_s28 + $0xb8] sm:$0xff]  ;;  %v3828_v63 = vcvt.s32.f32 %v3796_v42 }
 0x254   : > { %v3290_v46 = vpop.permute.xlu1 %3289  ;;  %v3769_v49 = vshra.s32 %v4845_v47, 8  ;;  %v3798_v54 = vand.u32 1, %v3766_v34 }
 0x255   : > { %v7423_v20 = vmax.f32 %v7244_v38, %v3376_v29  ;;  %v7426_v14 = vmul.f32 %v3290_v46, %v7211_v61  ;;  %3936 = vperm.xlu1 %4769, %v3827_v28   ;;  %v3768_v29 = vshra.s32 %v4846_v18, 8  ;;  %v4848_v18 = vld [vmem:[%s4911_s28 + $0xc0] sm:$0xff]  ;;  %v4854_v61 = vld [vmem:[%s4911_s28 + $0xf0] sm:$0xff] }
 0x256   : > { %v3285_v9 = vpop.permute.xlu0 %3284  ;;  %v3801_v46 = vand.u32 1, %v3769_v49  ;;  %v3770_v28 = vshra.s32 %v4848_v18, 8 }
 0x257   : > { %8426 = vst [vmem:[#allocation77_spill] sm:$0xff] %v7423_v20  ;;  %v7430_v51 = vmul.f32 %v3285_v9, %v7214_v57  ;;  %3931 = vperm.xlu0 %4768, %v3826_v45   ;;  %v3831_v57 = vcvt.s32.f32 %v3799_v31  ;;  %v4847_v45 = vld [vmem:[%s4911_s28 + $0xc8] sm:$0xff]  ;;  %v3830_v9 = vcvt.s32.f32 %v3798_v54  ;;  %v3800_v47 = vand.u32 1, %v3768_v29 }
 0x258   : > { %v3300_v26 = vpop.permute.xlu1 %3299  ;;  %v3771_v42 = vshra.s32 %v4847_v45, 8  ;;  %v3802_v18 = vand.u32 1, %v3770_v28  ;;  %v3776_v20 = vshra.s32 %v4854_v61, 8 }
 0x259   : > { %v7438_v19 = vmul.f32 %v3300_v26, %v7221_v0  ;;  %3946 = vperm.xlu1 %4769, %v3829_v8   ;;  %v3832_v45 = vcvt.s32.f32 %v3800_v47  ;;  %v4850_v0 = vld [vmem:[%s4911_s28 + $0xd0] sm:$0xff] }
 0x25a   : > { %v3295_v39 = vpop.permute.xlu0 %3294  ;;  %v3772_v8 = vshra.s32 %v4850_v0, 8  ;;  %v3834_v0 = vcvt.s32.f32 %v3802_v18 }
 0x25b   : > { %v7442_v34 = vmul.f32 %v3295_v39, %v7224_v13  ;;  %3941 = vperm.xlu0 %4768, %v3828_v63   ;;  %v3833_v13 = vcvt.s32.f32 %v3801_v46  ;;  %v3803_v39 = vand.u32 1, %v3771_v42  ;;  %v4849_v63 = vld [vmem:[%s4911_s28 + $0xd8] sm:$0xff] }
 0x25c   : > { %v3310_v31 = vpop.permute.xlu1 %3309  ;;  %v3773_v54 = vshra.s32 %v4849_v63, 8  ;;  %v3804_v63 = vand.u32 1, %v3772_v8 }
 0x25d   : > { %v7450_v49 = vmul.f32 %v3310_v31, %v7231_v3  ;;  %3956 = vperm.xlu1 %4769, %v3831_v57   ;;  %v4852_v3 = vld [vmem:[%s4911_s28 + $0xe0] sm:$0xff] }
 0x25e   : > { %v3305_v26 = vpop.permute.xlu0 %3304  ;;  %v3774_v57 = vshra.s32 %v4852_v3, 8  ;;  %v3836_v18 = vcvt.s32.f32 %v3804_v63 }
 0x25f   : > { %v7454_v29 = vmul.f32 %v3305_v26, %v7234_v37  ;;  %3951 = vperm.xlu0 %4768, %v3830_v9   ;;  %v3835_v37 = vcvt.s32.f32 %v3803_v39  ;;  %v3805_v26 = vand.u32 1, %v3773_v54  ;;  %v4851_v9 = vld [vmem:[%s4911_s28 + $0xe8] sm:$0xff] }
 0x260   : > { %v3320_v46 = vpop.permute.xlu1 %3319  ;;  %v3775_v28 = vshra.s32 %v4851_v9, 8  ;;  %v3806_v3 = vand.u32 1, %v3774_v57 }
 0x261   : > { %v7462_v42 = vmul.f32 %v3320_v46, %v7241_v16  ;;  %3966 = vperm.xlu1 %4769, %v3833_v13   ;;  %v3837_v9 = vcvt.s32.f32 %v3805_v26  ;;  %v8427_v16 = vmax.f32 %v7126_v6, %v7287_v2  ;;  %v8429_v6 = vmax.f32 %v7136_v50, %v7299_v56 }
 0x262   : > { %v3315_v31 = vpop.permute.xlu0 %3314  ;;  %v3838_v61 = vcvt.s32.f32 %v3806_v3  ;;  %v8438_v56 = vmax.f32 %v7251_v40, %v7426_v14 }
 0x263   : > { %v7466_v47 = vmul.f32 %v3315_v31, %v7244_v38  ;;  %3961 = vperm.xlu0 %4768, %v3832_v45   ;;  %v3807_v38 = vand.u32 1, %v3775_v28  ;;  %v4853_v31 = vld [vmem:[%s4911_s28 + $0xf8] sm:$0xff] }
 0x264   : > { %v3330_v39 = vpop.permute.xlu1 %3329  ;;  %v3777_v45 = vshra.s32 %v4853_v31, 8 }
 0x265   : > { %v3387_v54 = vmul.f32 %v3330_v39, %v7251_v40  ;;  %3976 = vperm.xlu1 %4769, %v3835_v37   ;;  %v8428_v39 = vmax.f32 %v8414_v21, %v7291_v17  ;;  %v8430_v17 = vmax.f32 %v8416_v4, %v7303_v53  ;;  %v8441_v40 = vmax.f32 %v7264_v41, %v7442_v34 }
 0x266   : > { %v3325_v46 = vpop.permute.xlu0 %3324  ;;  %v3809_v63 = vand.u32 1, %v3777_v45 }
 0x267   : > { %v3386_v8 = vmul.f32 %v3325_v46, %v7254_v36  ;;  %3971 = vperm.xlu0 %4768, %v3834_v0   ;;  %v7480_v13 = vmax.f32 %v8427_v16, %v3387_v54  ;;  %v3839_v0 = vcvt.s32.f32 %v3807_v38  ;;  %v3808_v46 = vand.u32 1, %v3776_v20 }
 0x268   : > { %v3340_v26 = vpop.permute.xlu1 %3339  ;;  %v3841_v38 = vcvt.s32.f32 %v3809_v63 }
 0x269   : > { %v7485_v37 = vmax.f32 %v8428_v39, %v3386_v8  ;;  %v3389_v28 = vmul.f32 %v3340_v26, %v7261_v55  ;;  %3986 = vperm.xlu1 %4769, %v3837_v9   ;;  %v3840_v20 = vcvt.s32.f32 %v3808_v46  ;;  %v8431_v39 = vmax.f32 %v7164_v12, %v7330_v15 }
 0x26a   : > { %v3335_v31 = vpop.permute.xlu0 %3334 }
 0x26b   : > { %v3388_v57 = vmul.f32 %v3335_v31, %v7264_v41  ;;  %3981 = vperm.xlu0 %4768, %v3836_v18   ;;  %v7492_v2 = vmax.f32 %v8429_v6, %v3389_v28 }
 0x26c   : > { %v3350_v16 = vpop.permute.xlu1 %3349 }
 0x26d   : > { %v7497_v21 = vmax.f32 %v8430_v17, %v3388_v57  ;;  %v7500_v54 = vmul.f32 %v3350_v16, %v7271_v62  ;;  %3996 = vperm.xlu1 %4769, %v3839_v0  }
 0x26e   : > { %v3345_v9 = vpop.permute.xlu0 %3344 }
 0x26f   : > { %v7503_v45 = vmul.f32 %v3345_v9, %v7274_v52  ;;  %3991 = vperm.xlu0 %4768, %v3838_v61  }
 0x270   : > { %v3360_v53 = vpop.permute.xlu1 %3359 }
 0x271   : > { %v7510_v4 = vmul.f32 %v3360_v53, %v7281_v30  ;;  %4006 = vperm.xlu1 %4769, %v3841_v38  }
 0x272   : > { %v3355_v8 = vpop.permute.xlu0 %3354 }
 0x273   : > { %v3392_v18 = vmul.f32 %v3355_v8, %v7284_v48  ;;  %4001 = vperm.xlu0 %4768, %v3840_v20  }
 0x274   : > { %v3530_v28 = vpop.permute.xlu1 %3529 }
 0x275   : > { %v7518_v26 = vmax.f32 %v8431_v39, %v3392_v18 }
 0x276   : > { %v3525_v31 = vpop.permute.xlu0 %3524 }
 0x278   : > { %v7520_v0 = vpop.permute.xlu1 %3539 }
 0x27a   : > { %v7522_v63 = vpop.permute.xlu0 %3534 }
 0x27c   : > { %v7524_v57 = vpop.permute.xlu1 %3549 }
 0x27e   : > { %v7526_v61 = vpop.permute.xlu0 %3544 }
 0x280   : > { %v7528_v46 = vpop.permute.xlu1 %3559 }
 0x282   : > { %v7530_v6 = vpop.permute.xlu0 %3554 }
 0x284   : > { %v7532_v17 = vpop.permute.xlu1 %3569 }
 0x286   : > { %v7534_v16 = vpop.permute.xlu0 %3564 }
 0x288   : > { %v7536_v12 = vpop.permute.xlu1 %3579 }
 0x289   : > { %8432 = vst [vmem:[#allocation37_spill] sm:$0xff] %v7536_v12 }
 0x28a   : > { %v7538_v15 = vpop.permute.xlu0 %3574 }
 0x28b   : > { %8433 = vst [vmem:[#allocation88_spill] sm:$0xff] %v7538_v15 }
 0x28c   : > { %v7540_v9 = vpop.permute.xlu1 %3589 }
 0x28d   : > { %8434 = vst [vmem:[#allocation78_spill] sm:$0xff] %v7540_v9  ;;  %v8439_v9 = vmax.f32 %v7254_v36, %v7430_v51 }
 0x28e   : > { %v7542_v38 = vpop.permute.xlu0 %3584 }
 0x28f   : > { %8435 = vst [vmem:[#allocation76_spill] sm:$0xff] %v7542_v38 }
 0x290   : > { %v7544_v20 = vpop.permute.xlu1 %3599 }
 0x291   : > { %8436 = vst [vmem:[#allocation75_spill] sm:$0xff] %v7544_v20 }
 0x292   : > { %v7546_v53 = vpop.permute.xlu0 %3594 }
 0x293   : > { %8437 = vst [vmem:[#allocation93_spill] sm:$0xff] %v7546_v53 }
 0x294   : > { %v3610_v8 = vpop.permute.xlu1 %3609 }
 0x295   : > { %v3699_v18 = vmul.f32 %v3610_v8, %v7350_v60  ;;  %v8440_v8 = vmax.f32 %v7261_v55, %v7438_v19  ;;  %v8443_v55 = vmax.f32 %v7274_v52, %v7454_v29 }
 0x296   : > { %v3605_v39 = vpop.permute.xlu0 %3604 }
 0x297   : > { %v3698_v3 = vmul.f32 %v3605_v39, %v7353_v23  ;;  %v7553_v50 = vmax.f32 %v8438_v56, %v3699_v18 }
 0x298   : > { %v3620_v38 = vpop.permute.xlu1 %3619 }
 0x299   : > { %v7558_v15 = vmax.f32 %v8439_v9, %v3698_v3  ;;  %v3701_v20 = vmul.f32 %v3620_v38, %v7364_v44  ;;  %v8442_v9 = vmax.f32 %v7271_v62, %v7450_v49  ;;  %v8445_v62 = vmax.f32 %v7284_v48, %v7466_v47 }
 0x29a   : > { %v3615_v53 = vpop.permute.xlu0 %3614 }
 0x29b   : > { %v3700_v12 = vmul.f32 %v3615_v53, %v7367_v22  ;;  %v7565_v39 = vmax.f32 %v8440_v8, %v3701_v20  ;;  %v8444_v53 = vmax.f32 %v7281_v30, %v7462_v42 }
 0x29c   : > { %v3630_v56 = vpop.permute.xlu1 %3629 }
 0x29d   : > { %v7570_v14 = vmax.f32 %v8441_v40, %v3700_v12  ;;  %v3703_v36 = vmul.f32 %v3630_v56, %v7372_v11 }
 0x29e   : > { %v3625_v51 = vpop.permute.xlu0 %3624 }
 0x29f   : > { %v3702_v3 = vmul.f32 %v3625_v51, %v7375_v7  ;;  %v7577_v38 = vmax.f32 %v8442_v9, %v3703_v36 }
 0x2a0   : > { %v3640_v20 = vpop.permute.xlu1 %3639 }
 0x2a1   : > { %v7582_v19 = vmax.f32 %v8443_v55, %v3702_v3  ;;  %v3705_v41 = vmul.f32 %v3640_v20, %v7380_v25  ;;  %v3682_v3 = vmul.f32 0.0, %v3525_v31 }
 0x2a2   : > { %v3635_v34 = vpop.permute.xlu0 %3634 }
 0x2a3   : > { %v3704_v12 = vmul.f32 %v3635_v34, %v7383_v33  ;;  %v7589_v18 = vmax.f32 %v8444_v53, %v3705_v41  ;;  %v8446_v34 = vmax.f32 %v7317_v1, %v7500_v54  ;;  %v8447_v53 = vmax.f32 %v7323_v35, %v7503_v45 }
 0x2a4   : > { %v3650_v8 = vpop.permute.xlu1 %3649  ;;  %v8449_v1 = vmax.f32 %v7335_v5, %v7510_v4 }
 0x2a5   : > { %v7594_v49 = vmax.f32 %v8445_v62, %v3704_v12  ;;  %v7597_v52 = vmul.f32 %v3650_v8, %v7390_v27 }
 0x2a6   : > { %v3645_v29 = vpop.permute.xlu0 %3644 }
 0x2a7   : > { %v7600_v40 = vmul.f32 %v3645_v29, %v7393_v43  ;;  %v3739_v56 = vmax.f32 %v7480_v13, %v7597_v52  ;;  %v3683_v29 = vmul.f32 0.0, %v3530_v28 }
 0x2a8   : > { %v3660_v42 = vpop.permute.xlu1 %3659 }
 0x2a9   : > { %v3738_v30 = vmax.f32 %v7485_v37, %v7600_v40  ;;  %v7607_v36 = vmul.f32 %v3660_v42, %v7400_v32  ;;  %v3715_v28 = vmax.f32 %v7350_v60, %v3683_v29 }
 0x2aa   : > { %v3655_v48 = vpop.permute.xlu0 %3654 }
 0x2ab   : > { %v7610_v47 = vmul.f32 %v3655_v48, %v7403_v59 }
 0x2ac   : > { %v3670_v9 = vpop.permute.xlu1 %3669 }
 0x2ad   : > { %v3711_v55 = vmul.f32 %v3670_v9, %v7410_v58  ;;  %v8448_v9 = vld [vmem:[#allocation77_spill] sm:$0xff]  ;;  %v8457_v13 = vmax.f32 %v7497_v21, %v7610_v47 }
 0x2ae   : > { %v3665_v20 = vpop.permute.xlu0 %3664 }
 0x2af   : > { %v3710_v41 = vmul.f32 %v3665_v20, %v7413_v10  ;;  %v7621_v12 = vmax.f32 %v8446_v34, %v3711_v55  ;;  %v7632_v20 = vld [vmem:[#allocation2] ss:$0 sm:$0xff]  ;;  %v3685_v55 = vmul.f32 0.0, %v7520_v0  ;;  %v3714_v34 = vmax.f32 %v7353_v23, %v3682_v3 }
 0x2b0   : > { %v3680_v8 = vpop.permute.xlu1 %3679 }
 0x2b1   : > { %v7626_v62 = vmax.f32 %v8447_v53, %v3710_v41  ;;  %v3713_v42 = vmul.f32 %v3680_v8, %v7420_v24  ;;  %v3684_v53 = vmul.f32 0.0, %v7522_v63 }
 0x2b2   : > { %v3675_v48 = vpop.permute.xlu0 %3674 }
 0x2b3   : > { %v7630_v51 = vmul.f32 %v3675_v48, %v8448_v9  ;;  %v7637_v54 = vmax.f32 %v8449_v1, %v3713_v42  ;;  %v3717_v48 = vmax.f32 %v7364_v44, %v3685_v55  ;;  %v3687_v1 = vmul.f32 0.0, %v7524_v57 }
 0x2b4   : > { %v3857_v45 = vpop.permute.xlu1 %3856  ;;  %v3716_v29 = vmax.f32 %v7367_v22, %v3684_v53  ;;  %v3689_v44 = vmul.f32 0.0, %v7528_v46  ;;  %v3688_v22 = vmul.f32 0.0, %v7530_v6 }
 0x2b5   : > { %v3744_v35 = vmax.f32 %v7518_v26, %v7630_v51  ;;  %v4010_v31 = vmul.f32 %v7632_v20, %v3857_v45  ;;  %v3686_v45 = vmul.f32 0.0, %v7526_v61 }
 0x2b6   : > { %v3852_v41 = vpop.permute.xlu0 %3851 }
 0x2b7   : > { %v4009_v5 = vmul.f32 %v7632_v20, %v3852_v41  ;;  %v4042_v4 = vmax.f32 %v3715_v28, %v4010_v31  ;;  %v3719_v41 = vmax.f32 %v7372_v11, %v3687_v1  ;;  %v3691_v11 = vmul.f32 0.0, %v7532_v17 }
 0x2b8   : > { %v3867_v42 = vpop.permute.xlu1 %3866  ;;  %v3720_v1 = vmax.f32 %v7383_v33, %v3688_v22  ;;  %v8451_v33 = vld [vmem:[#allocation88_spill] sm:$0xff] }
 0x2b9   : > { %v4041_v8 = vmax.f32 %v3714_v34, %v4009_v5  ;;  %v4012_v60 = vmul.f32 %v7632_v20, %v3867_v42  ;;  %v3718_v34 = vmax.f32 %v7375_v7, %v3686_v45  ;;  %v3721_v42 = vmax.f32 %v7380_v25, %v3689_v44  ;;  %v8450_v25 = vld [vmem:[#allocation37_spill] sm:$0xff] }
 0x2ba   : > { %v3862_v0 = vpop.permute.xlu0 %3861  ;;  %v3690_v7 = vmul.f32 0.0, %v7534_v16 }
 0x2bb   : > { %v4598_v23 = vpack.c.bf16 %v4042_v4, %v4041_v8  ;;  %v4011_v63 = vmul.f32 %v7632_v20, %v3862_v0  ;;  %v4044_v3 = vmax.f32 %v3717_v48, %v4012_v60 }
 0x2bc   : > { %v3877_v31 = vpop.permute.xlu1 %3876 }
 0x2bd   : > { %4599 = vst [vmem:[%s4921_s9] sm:$0xff] %v4598_v23   ;;  %v4043_v28 = vmax.f32 %v3716_v29, %v4011_v63  ;;  %v4014_v57 = vmul.f32 %v7632_v20, %v3877_v31  ;;  %v3723_v23 = vmax.f32 %v7390_v27, %v3691_v11  ;;  %v3693_v63 = vmul.f32 0.0, %v8450_v25  ;;  %v8452_v27 = vld [vmem:[#allocation78_spill] sm:$0xff] }
 0x2be   : > { %v3872_v55 = vpop.permute.xlu0 %3871  ;;  %v3692_v31 = vmul.f32 0.0, %v8451_v33  ;;  %v3695_v22 = vmul.f32 0.0, %v8452_v27 }
 0x2bf   : > { %v4603_v61 = vpack.c.bf16 %v4044_v3, %v4043_v28  ;;  %v4013_v53 = vmul.f32 %v7632_v20, %v3872_v55  ;;  %v4046_v5 = vmax.f32 %v3719_v41, %v4014_v57  ;;  %v3722_v28 = vmax.f32 %v7393_v43, %v3690_v7  ;;  %v8453_v43 = vld [vmem:[#allocation76_spill] sm:$0xff] }
 0x2c0   : > { %v3887_v8 = vpop.permute.xlu1 %3886 }
 0x2c1   : > { %4690 = vst [vmem:[%s4921_s9 + $0x8] sm:$0xff] %v4603_v61   ;;  %v4045_v4 = vmax.f32 %v3718_v34, %v4013_v53  ;;  %v4016_v46 = vmul.f32 %v7632_v20, %v3887_v8  ;;  %v3725_v34 = vmax.f32 %v7400_v32, %v3693_v63  ;;  %v8454_v32 = vld [vmem:[#allocation75_spill] sm:$0xff] }
 0x2c2   : > { %v3882_v48 = vpop.permute.xlu0 %3881  ;;  %v3697_v7 = vmul.f32 0.0, %v8454_v32 }
 0x2c3   : > { %v4608_v6 = vpack.c.bf16 %v4046_v5, %v4045_v4  ;;  %v4015_v60 = vmul.f32 %v7632_v20, %v3882_v48  ;;  %v4048_v0 = vmax.f32 %v3721_v42, %v4016_v46  ;;  %v3724_v5 = vmax.f32 %v7403_v59, %v3692_v31 }
 0x2c4   : > { %v3897_v45 = vpop.permute.xlu1 %3896  ;;  %v3694_v4 = vmul.f32 0.0, %v8453_v43 }
 0x2c5   : > { %4691 = vst [vmem:[%s4921_s9 + $0x10] sm:$0xff] %v4608_v6   ;;  %v4047_v29 = vmax.f32 %v3720_v1, %v4015_v60  ;;  %v4018_v17 = vmul.f32 %v7632_v20, %v3897_v45  ;;  %v3727_v1 = vmax.f32 %v7410_v58, %v3695_v22  ;;  %v3729_v58 = vmax.f32 %v7420_v24, %v3697_v7 }
 0x2c6   : > { %v3892_v3 = vpop.permute.xlu0 %3891  ;;  %v3726_v59 = vmax.f32 %v7413_v10, %v3694_v4 }
 0x2c7   : > { %v4613_v16 = vpack.c.bf16 %v4048_v0, %v4047_v29  ;;  %v4017_v41 = vmul.f32 %v7632_v20, %v3892_v3  ;;  %v4050_v44 = vmax.f32 %v3723_v23, %v4018_v17  ;;  %v8455_v0 = vld [vmem:[#allocation93_spill] sm:$0xff] }
 0x2c8   : > { %v3907_v55 = vpop.permute.xlu1 %3906  ;;  %v3696_v29 = vmul.f32 0.0, %v8455_v0 }
 0x2c9   : > { %4692 = vst [vmem:[%s4921_s9 + $0x18] sm:$0xff] %v4613_v16   ;;  %v4049_v57 = vmax.f32 %v3722_v28, %v4017_v41  ;;  %v4020_v61 = vmul.f32 %v7632_v20, %v3907_v55 }
 0x2ca   : > { %v3902_v53 = vpop.permute.xlu0 %3901  ;;  %v3728_v33 = vmax.f32 %v8448_v9, %v3696_v29 }
 0x2cb   : > { %v4618_v8 = vpack.c.bf16 %v4050_v44, %v4049_v57  ;;  %v4019_v42 = vmul.f32 %v7632_v20, %v3902_v53  ;;  %v4052_v11 = vmax.f32 %v3725_v34, %v4020_v61 }
 0x2cc   : > { %v3917_v48 = vpop.permute.xlu1 %3916 }
 0x2cd   : > { %4693 = vst [vmem:[%s4921_s9 + $0x20] sm:$0xff] %v4618_v8   ;;  %v4051_v46 = vmax.f32 %v3724_v5, %v4019_v42  ;;  %v4022_v6 = vmul.f32 %v7632_v20, %v3917_v48 }
 0x2ce   : > { %v3912_v60 = vpop.permute.xlu0 %3911 }
 0x2cf   : > { %v4623_v45 = vpack.c.bf16 %v4052_v11, %v4051_v46  ;;  %v4021_v23 = vmul.f32 %v7632_v20, %v3912_v60  ;;  %v4054_v25 = vmax.f32 %v3727_v1, %v4022_v6 }
 0x2d0   : > { %v3927_v17 = vpop.permute.xlu1 %3926 }
 0x2d1   : > { %4694 = vst [vmem:[%s4921_s9 + $0x28] sm:$0xff] %v4623_v45   ;;  %v4053_v63 = vmax.f32 %v3726_v59, %v4021_v23  ;;  %v4024_v3 = vmul.f32 %v7632_v20, %v3927_v17 }
 0x2d2   : > { %v3922_v28 = vpop.permute.xlu0 %3921 }
 0x2d3   : > { %v4628_v31 = vpack.c.bf16 %v4054_v25, %v4053_v63  ;;  %v4023_v10 = vmul.f32 %v7632_v20, %v3922_v28  ;;  %v4056_v16 = vmax.f32 %v3729_v58, %v4024_v3  ;;  %v8456_v3 = vmax.f32 %v7492_v2, %v7607_v36 }
 0x2d4   : > { %v3937_v44 = vpop.permute.xlu1 %3936 }
 0x2d5   : > { %4695 = vst [vmem:[%s4921_s9 + $0x30] sm:$0xff] %v4628_v31   ;;  %v4055_v41 = vmax.f32 %v3728_v33, %v4023_v10  ;;  %v4026_v57 = vmul.f32 %v7632_v20, %v3937_v44 }
 0x2d6   : > { %v3932_v55 = vpop.permute.xlu0 %3931 }
 0x2d7   : > { %v4633_v34 = vpack.c.bf16 %v4056_v16, %v4055_v41  ;;  %v4025_v27 = vmul.f32 %v7632_v20, %v3932_v55  ;;  %v4058_v24 = vmax.f32 %v7553_v50, %v4026_v57 }
 0x2d8   : > { %v3947_v22 = vpop.permute.xlu1 %3946 }
 0x2d9   : > { %4696 = vst [vmem:[%s4921_s9 + $0x38] sm:$0xff] %v4633_v34   ;;  %v4057_v9 = vmax.f32 %v7558_v15, %v4025_v27  ;;  %v4028_v61 = vmul.f32 %v7632_v20, %v3947_v22 }
 0x2da   : > { %v3942_v53 = vpop.permute.xlu0 %3941 }
 0x2db   : > { %v4638_v5 = vpack.c.bf16 %v4058_v24, %v4057_v9  ;;  %v4027_v43 = vmul.f32 %v7632_v20, %v3942_v53  ;;  %v4060_v4 = vmax.f32 %v7565_v39, %v4028_v61 }
 0x2dc   : > { %v3957_v42 = vpop.permute.xlu1 %3956 }
 0x2dd   : > { %4697 = vst [vmem:[%s4921_s9 + $0x40] sm:$0xff] %v4638_v5   ;;  %v4059_v8 = vmax.f32 %v7570_v14, %v4027_v43  ;;  %v4030_v50 = vmul.f32 %v7632_v20, %v3957_v42 }
 0x2de   : > { %v3952_v11 = vpop.permute.xlu0 %3951 }
 0x2df   : > { %v4643_v46 = vpack.c.bf16 %v4060_v4, %v4059_v8  ;;  %v4029_v15 = vmul.f32 %v7632_v20, %v3952_v11  ;;  %v4062_v48 = vmax.f32 %v7577_v38, %v4030_v50 }
 0x2e0   : > { %v3967_v32 = vpop.permute.xlu1 %3966 }
 0x2e1   : > { %4698 = vst [vmem:[%s4921_s9 + $0x48] sm:$0xff] %v4643_v46   ;;  %v4061_v1 = vmax.f32 %v7582_v19, %v4029_v15  ;;  %v4032_v39 = vmul.f32 %v7632_v20, %v3967_v32 }
 0x2e2   : > { %v3962_v7 = vpop.permute.xlu0 %3961 }
 0x2e3   : > { %v4648_v6 = vpack.c.bf16 %v4062_v48, %v4061_v1  ;;  %v4031_v14 = vmul.f32 %v7632_v20, %v3962_v7  ;;  %v4064_v60 = vmax.f32 %v7589_v18, %v4032_v39 }
 0x2e4   : > { %v3977_v0 = vpop.permute.xlu1 %3976 }
 0x2e5   : > { %4699 = vst [vmem:[%s4921_s9 + $0x50] sm:$0xff] %v4648_v6   ;;  %v4063_v59 = vmax.f32 %v7594_v49, %v4031_v14  ;;  %v4034_v38 = vmul.f32 %v7632_v20, %v3977_v0 }
 0x2e6   : > { %v3972_v29 = vpop.permute.xlu0 %3971 }
 0x2e7   : > { %v4653_v45 = vpack.c.bf16 %v4064_v60, %v4063_v59  ;;  %v4033_v19 = vmul.f32 %v7632_v20, %v3972_v29  ;;  %v4066_v23 = vmax.f32 %v3739_v56, %v4034_v38 }
 0x2e8   : > { %v3987_v25 = vpop.permute.xlu1 %3986 }
 0x2e9   : > { %4700 = vst [vmem:[%s4921_s9 + $0x58] sm:$0xff] %v4653_v45   ;;  %v4065_v18 = vmax.f32 %v3738_v30, %v4033_v19  ;;  %v4036_v49 = vmul.f32 %v7632_v20, %v3987_v25 }
 0x2ea   : > { %v3982_v63 = vpop.permute.xlu0 %3981 }
 0x2eb   : > { %v4658_v17 = vpack.c.bf16 %v4066_v23, %v4065_v18  ;;  %v4035_v58 = vmul.f32 %v7632_v20, %v3982_v63  ;;  %v4068_v28 = vmax.f32 %v8456_v3, %v4036_v49 }
 0x2ec   : > { %v3997_v37 = vpop.permute.xlu1 %3996 }
 0x2ed   : > { %4701 = vst [vmem:[%s4921_s9 + $0x60] sm:$0xff] %v4658_v17   ;;  %v4067_v52 = vmax.f32 %v8457_v13, %v4035_v58  ;;  %v4038_v40 = vmul.f32 %v7632_v20, %v3997_v37 }
 0x2ee   : > { %v3992_v56 = vpop.permute.xlu0 %3991 }
 0x2ef   : > { %v4663_v30 = vpack.c.bf16 %v4068_v28, %v4067_v52  ;;  %v4037_v33 = vmul.f32 %v7632_v20, %v3992_v56  ;;  %v4070_v31 = vmax.f32 %v7621_v12, %v4038_v40 }
 0x2f0   : > { %v4007_v36 = vpop.permute.xlu1 %4006 }
 0x2f1   : > { %4702 = vst [vmem:[%s4921_s9 + $0x68] sm:$0xff] %v4663_v30   ;;  %v4069_v2 = vmax.f32 %v7626_v62, %v4037_v33  ;;  %v4040_v10 = vmul.f32 %v7632_v20, %v4007_v36 }
 0x2f2   : > { %v4002_v16 = vpop.permute.xlu0 %4001 }
 0x2f3   : > { %v4668_v21 = vpack.c.bf16 %v4070_v31, %v4069_v2  ;;  %v4039_v47 = vmul.f32 %v7632_v20, %v4002_v16  ;;  %v4072_v41 = vmax.f32 %v7637_v54, %v4040_v10 }
 0x2f5   : > { %4703 = vst [vmem:[%s4921_s9 + $0x70] sm:$0xff] %v4668_v21   ;;  %v4071_v44 = vmax.f32 %v3744_v35, %v4039_v47  ;;  %4073 = vst [vmem:[#allocation2 - $0x7] sm:$0x80] %v4072_v41 }
 0x2f7   : > { %v4673_v57 = vpack.c.bf16 %v4072_v41, %v4071_v44 }
 0x2f9   : > { %4704 = vst [vmem:[%s4921_s9 + $0x78] sm:$0xff] %v4673_v57  }
 0x2fa PF: > { %s16_s18 = sadd.s32 1, %s4861_s18  }
 0x2fb   : > { %p13_p5 = scmp.ge.s32.totalorder %s16_s18, 6  }
 0x2fd   :  { %15 = sbr.rel (!%p13_p5) target bundleno = 1 (0x1), region = 85 }

</bundles_post_ra>
